<compile_context>
chip_gen: v5e
topology: v5e:2x2
jax: 0.10.0
libtpu: 0.0.40
codegen_flags: <defaults>
</compile_context>

<pallas_src>
import functools

import jax
import jax.numpy as jnp
from jax import lax
from jax.experimental import pallas as pl
from jax.experimental.pallas import tpu as pltpu

_EPS = 1e-8


# ---------------------------------------------------------------------------
# In-kernel helpers (operate on VMEM values / refs)
# ---------------------------------------------------------------------------
def _gln(y, gamma, beta):
    """GlobalLayerNorm over the whole (time, channel) slab of one batch element.

    Single reduction sweep (sum + sum-of-squares); variance clamped at 0 to
    guard E[x^2]-E[x]^2 cancellation in f32.
    """
    n = float(y.shape[0] * y.shape[1])
    s = jnp.sum(y, keepdims=True)                   # (1, 1)
    ss = jnp.sum(y * y, keepdims=True)              # (1, 1)
    mean = s / n
    var = jnp.maximum(ss / n - mean * mean, 0.0)
    return gamma * (y - mean) * lax.rsqrt(var + _EPS) + beta


def _prelu(y, a):
    return jnp.where(y >= 0.0, y, a * y)


def _mm(a_bf16, w_bf16):
    """1x1 conv as channels-last matmul: bf16 operands, f32 accumulation (MXU)."""
    return jnp.dot(a_bf16, w_bf16, preferred_element_type=jnp.float32)


def _nearest_upsample(z, t_out, up_ref):
    """Nearest upsample along time, matching F.interpolate(mode='nearest'):
    out[t] = z[floor(t * t_in / t_out)].

    For exact integer factors (the only case this network produces when T is
    divisible by 2**(depth-1)) this is `factor` strided sublane stores into a
    VMEM scratch slab followed by one contiguous read-back -- no MXU work and
    no selection mask.
    """
    t_in = z.shape[0]
    if t_in == t_out:
        return z
    if t_out % t_in == 0:
        factor = t_out // t_in
        for p in range(factor):                     # out[q*factor + p] = z[q]
            up_ref[pl.ds(p, t_in, factor), :] = z
        return up_ref[pl.ds(0, t_out), :]
    # TODO(synk): non-integer ratio (T not divisible by 2**(depth-1)) keeps a
    # bf16 selection-matmul stopgap; replace with per-row copies if ever hot.
    rows = lax.broadcasted_iota(jnp.int32, (t_out, t_in), 0)
    cols = lax.broadcasted_iota(jnp.int32, (t_out, t_in), 1)
    sel = jnp.logical_and(rows * t_in >= cols * t_out,
                          rows * t_in < (cols + 1) * t_out)
    return jnp.dot(sel.astype(jnp.bfloat16), z.astype(jnp.bfloat16),
                   preferred_element_type=jnp.float32)


def _depthwise_s1(pad_ref, l_out, w_kh):
    """Stride-1 depthwise Conv1d: K contiguous sublane tap reads, f32 VPU MAC."""
    acc = jnp.zeros((l_out, w_kh.shape[-1]), jnp.float32)
    for k in range(w_kh.shape[0]):                  # static, unrolled K-tap MAC
        acc = acc + pad_ref[pl.ds(k, l_out), :] * w_kh[k:k + 1, :]
    return acc


def _depthwise_s2(even_ref, odd_ref, l_out, w_kh):
    """Stride-2 depthwise Conv1d off pre-decimated even/odd phase slabs.

    out[t] = sum_k padded[2t + k] * w[k]; 2t+k lands in the even phase at
    offset k//2 for even k and in the odd phase at offset k//2 for odd k, so
    every tap is a contiguous sublane read.
    """
    acc = jnp.zeros((l_out, w_kh.shape[-1]), jnp.float32)
    for k in range(w_kh.shape[0]):
        src = even_ref if k % 2 == 0 else odd_ref
        acc = acc + src[pl.ds(k // 2, l_out), :] * w_kh[k:k + 1, :]
    return acc


def _fusion_row_offsets(depth, hid):
    """Static row offsets into the packed fusion weight ((3*depth-2)*H rows)."""
    offs, off = [], 0
    for i in range(depth):
        offs.append(off)
        off += (2 if (i == 0 or i == depth - 1) else 3) * hid
    return offs, off


# ---------------------------------------------------------------------------
# Fused whole-network kernel
# ---------------------------------------------------------------------------
def _make_kernel(depth, ksize):
    pad = (ksize - 1) // 2

    def kernel(slopes_ref,                                   # SMEM (depth+2,)
               x_ref,                                        # (T, Cin)
               mw_ref, mb_ref, mg_ref, mbt_ref,              # mapper
               cw_ref, cb_ref, cg_ref, cbt_ref,              # compressors
               dw_ref, db_ref, dg_ref, dbt_ref,              # downsamplers 1..D-1
               fw_ref, fb_ref, fg_ref, fbt_ref,              # fusions (packed W)
               chw_ref, chb_ref, chg_ref, chbt_ref,          # concat head
               hw_ref, hb_ref,                               # head (1x1, no norm)
               o_ref,                                        # (T, Cin)
               pad_ref, even_ref, odd_ref):                  # VMEM scratch
        hid = mw_ref.shape[1]
        x = x_ref[...].astype(jnp.float32)                   # (T, Cin) residual

        # ---- mapper: 1x1 conv -> gLN -> PReLU ------------------------------
        cur = _mm(x.astype(jnp.bfloat16), mw_ref[...]) + mb_ref[...]
        cur = _prelu(_gln(cur, mg_ref[...], mbt_ref[...]), slopes_ref[0])

        # ---- compressor chain (+ downsamplers sharing the same input) ------
        comp_bf, comp_len, downs_bf = [], [], {}
        for i in range(depth):
            l_in = cur.shape[0]
            # Zero-pad `cur` (mapped_x for i==0, compressed[i-1] otherwise)
            # into the VMEM scratch slab ONCE.
            pad_ref[pl.ds(0, pad), :] = jnp.zeros((pad, hid), jnp.float32)
            pad_ref[pl.ds(pad, l_in), :] = cur
            pad_ref[pl.ds(pad + l_in, pad), :] = jnp.zeros((pad, hid),
                                                           jnp.float32)
            if i == 0:
                l_out = l_in + 2 * pad - ksize + 1           # stride 1
                ci = _gln(_depthwise_s1(pad_ref, l_out, cw_ref[0]) + cb_ref[0],
                          cg_ref[0], cbt_ref[0])
            else:
                l_pad = l_in + 2 * pad
                l_out = (l_pad - ksize) // 2 + 1             # stride 2
                # Even/odd decimation once; shared by compressor i AND
                # downsampler i (both read the same padded input).
                n_even = (l_pad + 1) // 2
                n_odd = l_pad // 2
                even_ref[pl.ds(0, n_even), :] = pad_ref[pl.ds(0, n_even, 2), :]
                odd_ref[pl.ds(0, n_odd), :] = pad_ref[pl.ds(1, n_odd, 2), :]
                ci = _gln(_depthwise_s2(even_ref, odd_ref, l_out, cw_ref[i])
                          + cb_ref[i], cg_ref[i], cbt_ref[i])
                di = _gln(_depthwise_s2(even_ref, odd_ref, l_out, dw_ref[i - 1])
                          + db_ref[i - 1], dg_ref[i - 1], dbt_ref[i - 1])
                downs_bf[i] = di.astype(jnp.bfloat16)        # bf16 resident
            comp_bf.append(ci.astype(jnp.bfloat16))          # bf16 resident
            comp_len.append(l_out)
            cur = ci                                          # f32, used once next iter

        # ---- per-scale fusion: split matmuls instead of channel concat -----
        fus_off, _ = _fusion_row_offsets(depth, hid)
        x_fused_bf = []
        for i in range(depth):
            l_i = comp_len[i]
            row = fus_off[i]
            if i > 0:                                        # finer scale, downsampled
                acc = _mm(downs_bf[i], fw_ref[pl.ds(row, hid), :])
                row += hid
                acc = acc + _mm(comp_bf[i], fw_ref[pl.ds(row, hid), :])
            else:
                acc = _mm(comp_bf[i], fw_ref[pl.ds(row, hid), :])
            row += hid
            if i < depth - 1:                                # coarser scale, upsampled
                z = _mm(comp_bf[i + 1], fw_ref[pl.ds(row, hid), :])
                acc = acc + _nearest_upsample(z, l_i, pad_ref)
            acc = acc + fb_ref[i]
            acc = _prelu(_gln(acc, fg_ref[i], fbt_ref[i]), slopes_ref[1 + i])
            x_fused_bf.append(acc.astype(jnp.bfloat16))      # bf16 resident

        # ---- concat head: split matmul + fused nearest upsample ------------
        total_len = comp_len[0]
        acc = _mm(x_fused_bf[0], chw_ref[pl.ds(0, hid), :])  # factor-1, no upsample
        for i in range(1, depth):
            z = _mm(x_fused_bf[i], chw_ref[pl.ds(i * hid, hid), :])
            acc = acc + _nearest_upsample(z, total_len, pad_ref)
        acc = acc + chb_ref[...]
        concat = _prelu(_gln(acc, chg_ref[...], chbt_ref[...]),
                        slopes_ref[1 + depth])

        # ---- head 1x1 conv (no norm / act) + residual -----------------------
        out = _mm(concat.astype(jnp.bfloat16), hw_ref[...]) + hb_ref[...] + x
        o_ref[...] = out.astype(o_ref.dtype)

    return kernel


# ---------------------------------------------------------------------------
# Wrapper: pallas_call plumbing
# ---------------------------------------------------------------------------
def _vmem_limit_bytes():
    """Generation-aware scoped-VMEM request (leave headroom below physical)."""
    try:
        cap = int(pltpu.get_tpu_info().vmem_capacity_bytes)
        return min(int(cap * 0.85), 112 * 1024 * 1024)       # ~54MB v7x, ~108MB v5e/v6e
    except Exception:
        return 64 * 1024 * 1024


def general_subnetwork(x, params, depth, kernel_size):
    """Forward pass of GeneralSubnetwork. x: (B, Cin, T) NCW float32."""
    assert depth >= 2
    B, Cin, T = x.shape
    H = params["map_w"].shape[1]
    K = kernel_size
    pad = (K - 1) // 2
    fus_rows = params["fus_w"].shape[0]

    # Layout plumbing: channels-last (time = sublane axis, channels = lane axis).
    xt = jnp.transpose(x, (0, 2, 1))                          # (B, T, Cin)

    # Constant weights/params: single-buffered (never change across the grid).
    def c2(shape):
        return pl.BlockSpec(shape, lambda b, *_: (0, 0),
                            pipeline_mode=pl.Buffered(1))

    def c3(shape):
        return pl.BlockSpec(shape, lambda b, *_: (0, 0, 0),
                            pipeline_mode=pl.Buffered(1))

    in_specs = [
        pl.BlockSpec((None, T, Cin), lambda b, *_: (b, 0, 0)),    # x (pipelined)
        c2((Cin, H)), c2((1, H)), c2((1, H)), c2((1, H)),         # mapper
        c3((depth, K, H)), c3((depth, 1, H)),                     # compressors
        c3((depth, 1, H)), c3((depth, 1, H)),
        c3((depth - 1, K, H)), c3((depth - 1, 1, H)),             # downsamplers
        c3((depth - 1, 1, H)), c3((depth - 1, 1, H)),
        c2((fus_rows, H)), c3((depth, 1, H)),                     # fusions (packed)
        c3((depth, 1, H)), c3((depth, 1, H)),
        c2((depth * H, H)), c2((1, H)), c2((1, H)), c2((1, H)),   # concat head
        c2((H, Cin)), c2((1, Cin)),                               # head
    ]

    half_rows = (T + 2 * pad + 1) // 2
    grid_spec = pltpu.PrefetchScalarGridSpec(
        num_scalar_prefetch=1,                    # PReLU slopes -> SMEM
        grid=(B,),
        in_specs=in_specs,
        out_specs=pl.BlockSpec((None, T, Cin), lambda b, *_: (b, 0, 0)),
        scratch_shapes=[
            pltpu.VMEM((T + 2 * pad, H), jnp.float32),   # pad slab / upsample slab
            pltpu.VMEM((half_rows, H), jnp.float32),     # even phase (stride-2)
            pltpu.VMEM((half_rows, H), jnp.float32),     # odd phase (stride-2)
        ],
    )

    out_t = pl.pallas_call(
        _make_kernel(depth, K),
        out_shape=jax.ShapeDtypeStruct((B, T, Cin), x.dtype),
        grid_spec=grid_spec,
        compiler_params=pltpu.CompilerParams(
            dimension_semantics=("parallel",),
            vmem_limit_bytes=_vmem_limit_bytes()),
    )(params["slopes"], xt,
      params["map_w"], params["map_b"], params["map_g"], params["map_bt"],
      params["comp_w"], params["comp_b"], params["comp_g"], params["comp_bt"],
      params["down_w"], params["down_b"], params["down_g"], params["down_bt"],
      params["fus_w"], params["fus_b"], params["fus_g"], params["fus_bt"],
      params["ch_w"], params["ch_b"], params["ch_g"], params["ch_bt"],
      params["head_w"], params["head_b"])

    return jnp.transpose(out_t, (0, 2, 1))                    # back to (B, Cin, T)


# ---------------------------------------------------------------------------
# Deterministic parameter initialization (kernel-ready layouts)
#   * pointwise (matmul) weights stored bf16 as (Cin, Cout) -> channels-last MXU
#   * depthwise weights stored f32 as (K, C)   -> lane-major tap rows (VPU path)
#   * bias / gamma / beta stored f32 as (1, C) -> lane-major rows
#   * fusion weights PACKED: 2H rows for i==0 / i==depth-1, 3H rows otherwise.
# ---------------------------------------------------------------------------
def init_params(key, input_channels, hidden_channels, depth, kernel_size):
    H, Cin, K, D = hidden_channels, input_channels, kernel_size, depth
    keys = jax.random.split(key, 12)
    _, fus_rows = _fusion_row_offsets(D, H)

    def nrm(k, shape, dtype=jnp.float32):
        return (0.1 * jax.random.normal(k, shape, jnp.float32)).astype(dtype)

    return dict(
        map_w=nrm(keys[0], (Cin, H), jnp.bfloat16),
        map_b=nrm(keys[1], (1, H)),
        map_g=jnp.ones((1, H), jnp.float32),
        map_bt=jnp.zeros((1, H), jnp.float32),
        comp_w=nrm(keys[2], (D, K, H)),
        comp_b=nrm(keys[3], (D, 1, H)),
        comp_g=jnp.ones((D, 1, H), jnp.float32),
        comp_bt=jnp.zeros((D, 1, H), jnp.float32),
        down_w=nrm(keys[4], (D - 1, K, H)),
        down_b=nrm(keys[5], (D - 1, 1, H)),
        down_g=jnp.ones((D - 1, 1, H), jnp.float32),
        down_bt=jnp.zeros((D - 1, 1, H), jnp.float32),
        fus_w=nrm(keys[6], (fus_rows, H), jnp.bfloat16),
        fus_b=nrm(keys[7], (D, 1, H)),
        fus_g=jnp.ones((D, 1, H), jnp.float32),
        fus_bt=jnp.zeros((D, 1, H), jnp.float32),
        ch_w=nrm(keys[8], (D * H, H), jnp.bfloat16),
        ch_b=nrm(keys[9], (1, H)),
        ch_g=jnp.ones((1, H), jnp.float32),
        ch_bt=jnp.zeros((1, H), jnp.float32),
        head_w=nrm(keys[10], (H, Cin), jnp.bfloat16),
        head_b=nrm(keys[11], (1, Cin)),
        slopes=jnp.full((D + 2,), 0.25, jnp.float32),   # nn.PReLU() init per block
    )


# ---------------------------------------------------------------------------
# Demo
# ---------------------------------------------------------------------------
if __name__ == "__main__":
    B = 2
    INPUT_CHANNELS = 16
    HIDDEN_CHANNELS = 32
    DEPTH = 4
    KERNEL_SIZE = 5
    T = 32          # divisible by 2**(DEPTH-1) so all upsample factors are exact

    root = jax.random.PRNGKey(0)
    k_param, k_x = jax.random.split(root)
    params = init_params(k_param, INPUT_CHANNELS, HIDDEN_CHANNELS, DEPTH,
                         KERNEL_SIZE)
    x = jax.random.normal(k_x, (B, INPUT_CHANNELS, T), jnp.float32)

    fwd = jax.jit(functools.partial(general_subnetwork, depth=DEPTH,
                                    kernel_size=KERNEL_SIZE))
    out = fwd(x, params)
    out = jax.block_until_ready(out)

    assert out.shape == (B, INPUT_CHANNELS, T), out.shape
    assert bool(jnp.all(jnp.isfinite(out)))
    print("KERNEL_OK")
</pallas_src>

<mosaic_0001>
module attributes {stable_mosaic.version = 11 : i64} {
  func.func @kernel(%arg0: i32, %arg1: memref<6xf32, #tpu.memory_space<smem>>, %arg2: memref<1x32x16xf32, #tpu.memory_space<vmem>>, %arg3: memref<16x32xbf16, #tpu.memory_space<vmem>>, %arg4: memref<1x32xf32, #tpu.memory_space<vmem>>, %arg5: memref<1x32xf32, #tpu.memory_space<vmem>>, %arg6: memref<1x32xf32, #tpu.memory_space<vmem>>, %arg7: memref<4x5x32xf32, #tpu.memory_space<vmem>>, %arg8: memref<4x1x32xf32, #tpu.memory_space<vmem>>, %arg9: memref<4x1x32xf32, #tpu.memory_space<vmem>>, %arg10: memref<4x1x32xf32, #tpu.memory_space<vmem>>, %arg11: memref<3x5x32xf32, #tpu.memory_space<vmem>>, %arg12: memref<3x1x32xf32, #tpu.memory_space<vmem>>, %arg13: memref<3x1x32xf32, #tpu.memory_space<vmem>>, %arg14: memref<3x1x32xf32, #tpu.memory_space<vmem>>, %arg15: memref<320x32xbf16, #tpu.memory_space<vmem>>, %arg16: memref<4x1x32xf32, #tpu.memory_space<vmem>>, %arg17: memref<4x1x32xf32, #tpu.memory_space<vmem>>, %arg18: memref<4x1x32xf32, #tpu.memory_space<vmem>>, %arg19: memref<128x32xbf16, #tpu.memory_space<vmem>>, %arg20: memref<1x32xf32, #tpu.memory_space<vmem>>, %arg21: memref<1x32xf32, #tpu.memory_space<vmem>>, %arg22: memref<1x32xf32, #tpu.memory_space<vmem>>, %arg23: memref<32x16xbf16, #tpu.memory_space<vmem>>, %arg24: memref<1x16xf32, #tpu.memory_space<vmem>>, %arg25: memref<1x32x16xf32, #tpu.memory_space<vmem>>, %arg26: memref<36x32xf32, #tpu.memory_space<vmem>>, %arg27: memref<18x32xf32, #tpu.memory_space<vmem>>, %arg28: memref<18x32xf32, #tpu.memory_space<vmem>>) attributes {dimension_semantics = [#tpu.dimension_semantics<parallel>], iteration_bounds = array<i64: 2>, scalar_prefetch = 1 : i64, scratch_operands = 3 : i64, tpu.core_type = #tpu.core_type<tc>, window_params = [{transform_indices = @transform_0, window_bounds = array<i64: 1, 32, 16>}, {pipeline_mode = #tpu.pipeline_mode<synchronous>, transform_indices = @transform_1, window_bounds = array<i64: 16, 32>}, {pipeline_mode = #tpu.pipeline_mode<synchronous>, transform_indices = @transform_2, window_bounds = array<i64: 1, 32>}, {pipeline_mode = #tpu.pipeline_mode<synchronous>, transform_indices = @transform_3, window_bounds = array<i64: 1, 32>}, {pipeline_mode = #tpu.pipeline_mode<synchronous>, transform_indices = @transform_4, window_bounds = array<i64: 1, 32>}, {pipeline_mode = #tpu.pipeline_mode<synchronous>, transform_indices = @transform_5, window_bounds = array<i64: 4, 5, 32>}, {pipeline_mode = #tpu.pipeline_mode<synchronous>, transform_indices = @transform_6, window_bounds = array<i64: 4, 1, 32>}, {pipeline_mode = #tpu.pipeline_mode<synchronous>, transform_indices = @transform_7, window_bounds = array<i64: 4, 1, 32>}, {pipeline_mode = #tpu.pipeline_mode<synchronous>, transform_indices = @transform_8, window_bounds = array<i64: 4, 1, 32>}, {pipeline_mode = #tpu.pipeline_mode<synchronous>, transform_indices = @transform_9, window_bounds = array<i64: 3, 5, 32>}, {pipeline_mode = #tpu.pipeline_mode<synchronous>, transform_indices = @transform_10, window_bounds = array<i64: 3, 1, 32>}, {pipeline_mode = #tpu.pipeline_mode<synchronous>, transform_indices = @transform_11, window_bounds = array<i64: 3, 1, 32>}, {pipeline_mode = #tpu.pipeline_mode<synchronous>, transform_indices = @transform_12, window_bounds = array<i64: 3, 1, 32>}, {pipeline_mode = #tpu.pipeline_mode<synchronous>, transform_indices = @transform_13, window_bounds = array<i64: 320, 32>}, {pipeline_mode = #tpu.pipeline_mode<synchronous>, transform_indices = @transform_14, window_bounds = array<i64: 4, 1, 32>}, {pipeline_mode = #tpu.pipeline_mode<synchronous>, transform_indices = @transform_15, window_bounds = array<i64: 4, 1, 32>}, {pipeline_mode = #tpu.pipeline_mode<synchronous>, transform_indices = @transform_16, window_bounds = array<i64: 4, 1, 32>}, {pipeline_mode = #tpu.pipeline_mode<synchronous>, transform_indices = @transform_17, window_bounds = array<i64: 128, 32>}, {pipeline_mode = #tpu.pipeline_mode<synchronous>, transform_indices = @transform_18, window_bounds = array<i64: 1, 32>}, {pipeline_mode = #tpu.pipeline_mode<synchronous>, transform_indices = @transform_19, window_bounds = array<i64: 1, 32>}, {pipeline_mode = #tpu.pipeline_mode<synchronous>, transform_indices = @transform_20, window_bounds = array<i64: 1, 32>}, {pipeline_mode = #tpu.pipeline_mode<synchronous>, transform_indices = @transform_21, window_bounds = array<i64: 32, 16>}, {pipeline_mode = #tpu.pipeline_mode<synchronous>, transform_indices = @transform_22, window_bounds = array<i64: 1, 16>}, {transform_indices = @transform_23, window_bounds = array<i64: 1, 32, 16>}]} {
    %c0 = arith.constant 0 : index
    %c0_0 = arith.constant 0 : index
    %c0_1 = arith.constant 0 : index
    %0 = vector.load %arg2[%c0, %c0_0, %c0_1] : memref<1x32x16xf32, #tpu.memory_space<vmem>>, vector<1x32x16xf32>
    %1 = vector.shape_cast %0 : vector<1x32x16xf32> to vector<32x16xf32>
    %2 = arith.truncf %1 : vector<32x16xf32> to vector<32x16xbf16>
    %c0_2 = arith.constant 0 : index
    %c0_3 = arith.constant 0 : index
    %3 = vector.load %arg3[%c0_2, %c0_3] : memref<16x32xbf16, #tpu.memory_space<vmem>>, vector<16x32xbf16>
    %cst = arith.constant dense<0.000000e+00> : vector<32x32xf32>
    %4 = tpu.matmul %2, %3, %cst {dimension_numbers = #tpu.dot_dimension_numbers<[1], [0], [0], [1], [0, 0, 1, 1], [], []>} : vector<32x16xbf16>, vector<16x32xbf16>, vector<32x32xf32> -> vector<32x32xf32>
    %c0_4 = arith.constant 0 : index
    %c0_5 = arith.constant 0 : index
    %5 = vector.load %arg4[%c0_4, %c0_5] : memref<1x32xf32, #tpu.memory_space<vmem>>, vector<1x32xf32>
    %6 = vector.broadcast %5 : vector<1x32xf32> to vector<32x32xf32>
    %7 = arith.addf %4, %6 : vector<32x32xf32>
    %c0_6 = arith.constant 0 : index
    %c0_7 = arith.constant 0 : index
    %8 = vector.load %arg5[%c0_6, %c0_7] : memref<1x32xf32, #tpu.memory_space<vmem>>, vector<1x32xf32>
    %c0_8 = arith.constant 0 : index
    %c0_9 = arith.constant 0 : index
    %9 = vector.load %arg6[%c0_8, %c0_9] : memref<1x32xf32, #tpu.memory_space<vmem>>, vector<1x32xf32>
    %10 = vector.shape_cast %7 : vector<32x32xf32> to vector<1x32x32xf32>
    %cst_10 = arith.constant dense<0.000000e+00> : vector<1xf32>
    %11 = vector.multi_reduction <add>, %10, %cst_10 [1, 2] : vector<1x32x32xf32> to vector<1xf32>
    %12 = vector.shape_cast %11 : vector<1xf32> to vector<1x1x1xf32>
    %13 = vector.extract %12[0, 0, 0] : f32 from vector<1x1x1xf32>
    %14 = vector.broadcast %13 : f32 to vector<1x1xf32>
    %15 = arith.mulf %7, %7 : vector<32x32xf32>
    %16 = vector.shape_cast %15 : vector<32x32xf32> to vector<1x32x32xf32>
    %cst_11 = arith.constant dense<0.000000e+00> : vector<1xf32>
    %17 = vector.multi_reduction <add>, %16, %cst_11 [1, 2] : vector<1x32x32xf32> to vector<1xf32>
    %18 = vector.shape_cast %17 : vector<1xf32> to vector<1x1x1xf32>
    %19 = vector.extract %18[0, 0, 0] : f32 from vector<1x1x1xf32>
    %20 = vector.broadcast %19 : f32 to vector<1x1xf32>
    %cst_12 = arith.constant 1.024000e+03 : f32
    %21 = vector.broadcast %cst_12 : f32 to vector<1x1xf32>
    %22 = arith.divf %14, %21 : vector<1x1xf32>
    %cst_13 = arith.constant 1.024000e+03 : f32
    %23 = vector.broadcast %cst_13 : f32 to vector<1x1xf32>
    %24 = arith.divf %20, %23 : vector<1x1xf32>
    %25 = arith.mulf %22, %22 : vector<1x1xf32>
    %26 = arith.subf %24, %25 : vector<1x1xf32>
    %cst_14 = arith.constant 0.000000e+00 : f32
    %27 = vector.broadcast %cst_14 : f32 to vector<1x1xf32>
    %28 = arith.maximumf %26, %27 : vector<1x1xf32>
    %29 = vector.broadcast %22 : vector<1x1xf32> to vector<32x32xf32>
    %30 = arith.subf %7, %29 : vector<32x32xf32>
    %31 = vector.broadcast %8 : vector<1x32xf32> to vector<32x32xf32>
    %32 = arith.mulf %31, %30 : vector<32x32xf32>
    %cst_15 = arith.constant 9.99999993E-9 : f32
    %33 = vector.broadcast %cst_15 : f32 to vector<1x1xf32>
    %34 = arith.addf %28, %33 : vector<1x1xf32>
    %35 = math.rsqrt %34 : vector<1x1xf32>
    %36 = vector.broadcast %35 : vector<1x1xf32> to vector<32x32xf32>
    %37 = arith.mulf %32, %36 : vector<32x32xf32>
    %38 = vector.broadcast %9 : vector<1x32xf32> to vector<32x32xf32>
    %39 = arith.addf %37, %38 : vector<32x32xf32>
    %c0_16 = arith.constant 0 : index
    %40 = memref.load %arg1[%c0_16] : memref<6xf32, #tpu.memory_space<smem>>
    %cst_17 = arith.constant 0.000000e+00 : f32
    %41 = vector.broadcast %cst_17 : f32 to vector<32x32xf32>
    %42 = arith.cmpf oge, %39, %41 : vector<32x32xf32>
    %43 = vector.broadcast %40 : f32 to vector<32x32xf32>
    %44 = arith.mulf %43, %39 : vector<32x32xf32>
    %45 = arith.select %42, %39, %44 : vector<32x32xi1>, vector<32x32xf32>
    %cst_18 = arith.constant 0.000000e+00 : f32
    %46 = vector.broadcast %cst_18 : f32 to vector<2x32xf32>
    %c0_19 = arith.constant 0 : index
    %c0_20 = arith.constant 0 : index
    %47 = vector.load %arg26[%c0_19, %c0_20] : memref<36x32xf32, #tpu.memory_space<vmem>>, vector<2x32xf32>
    tpu.vector_store %arg26[%c0_19, %c0_20], %46 {strides = array<i32>} : memref<36x32xf32, #tpu.memory_space<vmem>>, vector<2x32xf32>,
    %c2 = arith.constant 2 : index
    %c0_21 = arith.constant 0 : index
    %48 = vector.load %arg26[%c2, %c0_21] : memref<36x32xf32, #tpu.memory_space<vmem>>, vector<32x32xf32>
    tpu.vector_store %arg26[%c2, %c0_21], %45 {strides = array<i32>} : memref<36x32xf32, #tpu.memory_space<vmem>>, vector<32x32xf32>,
    %cst_22 = arith.constant 0.000000e+00 : f32
    %49 = vector.broadcast %cst_22 : f32 to vector<2x32xf32>
    %c34 = arith.constant 34 : index
    %c0_23 = arith.constant 0 : index
    %50 = vector.load %arg26[%c34, %c0_23] : memref<36x32xf32, #tpu.memory_space<vmem>>, vector<2x32xf32>
    tpu.vector_store %arg26[%c34, %c0_23], %49 {strides = array<i32>} : memref<36x32xf32, #tpu.memory_space<vmem>>, vector<2x32xf32>,
    %c0_24 = arith.constant 0 : index
    %c0_25 = arith.constant 0 : index
    %c0_26 = arith.constant 0 : index
    %51 = vector.load %arg7[%c0_24, %c0_25, %c0_26] : memref<4x5x32xf32, #tpu.memory_space<vmem>>, vector<1x5x32xf32>
    %52 = vector.shape_cast %51 : vector<1x5x32xf32> to vector<5x32xf32>
    %cst_27 = arith.constant 0.000000e+00 : f32
    %53 = vector.broadcast %cst_27 : f32 to vector<32x32xf32>
    %c0_28 = arith.constant 0 : index
    %c0_29 = arith.constant 0 : index
    %54 = vector.load %arg26[%c0_28, %c0_29] : memref<36x32xf32, #tpu.memory_space<vmem>>, vector<32x32xf32>
    %55 = vector.extract_strided_slice %52 {offsets = [0, 0], sizes = [1, 32], strides = [1, 1]} : vector<5x32xf32> to vector<1x32xf32>
    %56 = vector.broadcast %55 : vector<1x32xf32> to vector<32x32xf32>
    %57 = arith.mulf %54, %56 : vector<32x32xf32>
    %58 = arith.addf %53, %57 : vector<32x32xf32>
    %c1 = arith.constant 1 : index
    %c0_30 = arith.constant 0 : index
    %59 = vector.load %arg26[%c1, %c0_30] : memref<36x32xf32, #tpu.memory_space<vmem>>, vector<32x32xf32>
    %60 = vector.extract_strided_slice %52 {offsets = [1, 0], sizes = [1, 32], strides = [1, 1]} : vector<5x32xf32> to vector<1x32xf32>
    %61 = vector.broadcast %60 : vector<1x32xf32> to vector<32x32xf32>
    %62 = arith.mulf %59, %61 : vector<32x32xf32>
    %63 = arith.addf %58, %62 : vector<32x32xf32>
    %c2_31 = arith.constant 2 : index
    %c0_32 = arith.constant 0 : index
    %64 = vector.load %arg26[%c2_31, %c0_32] : memref<36x32xf32, #tpu.memory_space<vmem>>, vector<32x32xf32>
    %65 = vector.extract_strided_slice %52 {offsets = [2, 0], sizes = [1, 32], strides = [1, 1]} : vector<5x32xf32> to vector<1x32xf32>
    %66 = vector.broadcast %65 : vector<1x32xf32> to vector<32x32xf32>
    %67 = arith.mulf %64, %66 : vector<32x32xf32>
    %68 = arith.addf %63, %67 : vector<32x32xf32>
    %c3 = arith.constant 3 : index
    %c0_33 = arith.constant 0 : index
    %69 = vector.load %arg26[%c3, %c0_33] : memref<36x32xf32, #tpu.memory_space<vmem>>, vector<32x32xf32>
    %70 = vector.extract_strided_slice %52 {offsets = [3, 0], sizes = [1, 32], strides = [1, 1]} : vector<5x32xf32> to vector<1x32xf32>
    %71 = vector.broadcast %70 : vector<1x32xf32> to vector<32x32xf32>
    %72 = arith.mulf %69, %71 : vector<32x32xf32>
    %73 = arith.addf %68, %72 : vector<32x32xf32>
    %c4 = arith.constant 4 : index
    %c0_34 = arith.constant 0 : index
    %74 = vector.load %arg26[%c4, %c0_34] : memref<36x32xf32, #tpu.memory_space<vmem>>, vector<32x32xf32>
    %75 = vector.extract_strided_slice %52 {offsets = [4, 0], sizes = [1, 32], strides = [1, 1]} : vector<5x32xf32> to vector<1x32xf32>
    %76 = vector.broadcast %75 : vector<1x32xf32> to vector<32x32xf32>
    %77 = arith.mulf %74, %76 : vector<32x32xf32>
    %78 = arith.addf %73, %77 : vector<32x32xf32>
    %c0_35 = arith.constant 0 : index
    %c0_36 = arith.constant 0 : index
    %c0_37 = arith.constant 0 : index
    %79 = vector.load %arg8[%c0_35, %c0_36, %c0_37] : memref<4x1x32xf32, #tpu.memory_space<vmem>>, vector<1x1x32xf32>
    %80 = vector.shape_cast %79 : vector<1x1x32xf32> to vector<1x32xf32>
    %81 = vector.broadcast %80 : vector<1x32xf32> to vector<32x32xf32>
    %82 = arith.addf %78, %81 : vector<32x32xf32>
    %c0_38 = arith.constant 0 : index
    %c0_39 = arith.constant 0 : index
    %c0_40 = arith.constant 0 : index
    %83 = vector.load %arg9[%c0_38, %c0_39, %c0_40] : memref<4x1x32xf32, #tpu.memory_space<vmem>>, vector<1x1x32xf32>
    %84 = vector.shape_cast %83 : vector<1x1x32xf32> to vector<1x32xf32>
    %c0_41 = arith.constant 0 : index
    %c0_42 = arith.constant 0 : index
    %c0_43 = arith.constant 0 : index
    %85 = vector.load %arg10[%c0_41, %c0_42, %c0_43] : memref<4x1x32xf32, #tpu.memory_space<vmem>>, vector<1x1x32xf32>
    %86 = vector.shape_cast %85 : vector<1x1x32xf32> to vector<1x32xf32>
    %87 = vector.shape_cast %82 : vector<32x32xf32> to vector<1x32x32xf32>
    %cst_44 = arith.constant dense<0.000000e+00> : vector<1xf32>
    %88 = vector.multi_reduction <add>, %87, %cst_44 [1, 2] : vector<1x32x32xf32> to vector<1xf32>
    %89 = vector.shape_cast %88 : vector<1xf32> to vector<1x1x1xf32>
    %90 = vector.extract %89[0, 0, 0] : f32 from vector<1x1x1xf32>
    %91 = vector.broadcast %90 : f32 to vector<1x1xf32>
    %92 = arith.mulf %82, %82 : vector<32x32xf32>
    %93 = vector.shape_cast %92 : vector<32x32xf32> to vector<1x32x32xf32>
    %cst_45 = arith.constant dense<0.000000e+00> : vector<1xf32>
    %94 = vector.multi_reduction <add>, %93, %cst_45 [1, 2] : vector<1x32x32xf32> to vector<1xf32>
    %95 = vector.shape_cast %94 : vector<1xf32> to vector<1x1x1xf32>
    %96 = vector.extract %95[0, 0, 0] : f32 from vector<1x1x1xf32>
    %97 = vector.broadcast %96 : f32 to vector<1x1xf32>
    %cst_46 = arith.constant 1.024000e+03 : f32
    %98 = vector.broadcast %cst_46 : f32 to vector<1x1xf32>
    %99 = arith.divf %91, %98 : vector<1x1xf32>
    %cst_47 = arith.constant 1.024000e+03 : f32
    %100 = vector.broadcast %cst_47 : f32 to vector<1x1xf32>
    %101 = arith.divf %97, %100 : vector<1x1xf32>
    %102 = arith.mulf %99, %99 : vector<1x1xf32>
    %103 = arith.subf %101, %102 : vector<1x1xf32>
    %cst_48 = arith.constant 0.000000e+00 : f32
    %104 = vector.broadcast %cst_48 : f32 to vector<1x1xf32>
    %105 = arith.maximumf %103, %104 : vector<1x1xf32>
    %106 = vector.broadcast %99 : vector<1x1xf32> to vector<32x32xf32>
    %107 = arith.subf %82, %106 : vector<32x32xf32>
    %108 = vector.broadcast %84 : vector<1x32xf32> to vector<32x32xf32>
    %109 = arith.mulf %108, %107 : vector<32x32xf32>
    %cst_49 = arith.constant 9.99999993E-9 : f32
    %110 = vector.broadcast %cst_49 : f32 to vector<1x1xf32>
    %111 = arith.addf %105, %110 : vector<1x1xf32>
    %112 = math.rsqrt %111 : vector<1x1xf32>
    %113 = vector.broadcast %112 : vector<1x1xf32> to vector<32x32xf32>
    %114 = arith.mulf %109, %113 : vector<32x32xf32>
    %115 = vector.broadcast %86 : vector<1x32xf32> to vector<32x32xf32>
    %116 = arith.addf %114, %115 : vector<32x32xf32>
    %117 = arith.truncf %116 : vector<32x32xf32> to vector<32x32xbf16>
    %cst_50 = arith.constant 0.000000e+00 : f32
    %118 = vector.broadcast %cst_50 : f32 to vector<2x32xf32>
    %c0_51 = arith.constant 0 : index
    %c0_52 = arith.constant 0 : index
    %119 = vector.load %arg26[%c0_51, %c0_52] : memref<36x32xf32, #tpu.memory_space<vmem>>, vector<2x32xf32>
    tpu.vector_store %arg26[%c0_51, %c0_52], %118 {strides = array<i32>} : memref<36x32xf32, #tpu.memory_space<vmem>>, vector<2x32xf32>,
    %c2_53 = arith.constant 2 : index
    %c0_54 = arith.constant 0 : index
    %120 = vector.load %arg26[%c2_53, %c0_54] : memref<36x32xf32, #tpu.memory_space<vmem>>, vector<32x32xf32>
    tpu.vector_store %arg26[%c2_53, %c0_54], %116 {strides = array<i32>} : memref<36x32xf32, #tpu.memory_space<vmem>>, vector<32x32xf32>,
    %cst_55 = arith.constant 0.000000e+00 : f32
    %121 = vector.broadcast %cst_55 : f32 to vector<2x32xf32>
    %c34_56 = arith.constant 34 : index
    %c0_57 = arith.constant 0 : index
    %122 = vector.load %arg26[%c34_56, %c0_57] : memref<36x32xf32, #tpu.memory_space<vmem>>, vector<2x32xf32>
    tpu.vector_store %arg26[%c34_56, %c0_57], %121 {strides = array<i32>} : memref<36x32xf32, #tpu.memory_space<vmem>>, vector<2x32xf32>,
    %c0_58 = arith.constant 0 : index
    %c0_59 = arith.constant 0 : index
    %123 = tpu.strided_load %arg26[%c0_58, %c0_59] {strides = array<i32: 2, 1>} : memref<36x32xf32, #tpu.memory_space<vmem>>, vector<18x32xf32>
    %c0_60 = arith.constant 0 : index
    %c0_61 = arith.constant 0 : index
    %124 = vector.load %arg27[%c0_60, %c0_61] : memref<18x32xf32, #tpu.memory_space<vmem>>, vector<18x32xf32>
    tpu.vector_store %arg27[%c0_60, %c0_61], %123 {strides = array<i32>} : memref<18x32xf32, #tpu.memory_space<vmem>>, vector<18x32xf32>,
    %c1_62 = arith.constant 1 : index
    %c0_63 = arith.constant 0 : index
    %125 = tpu.strided_load %arg26[%c1_62, %c0_63] {strides = array<i32: 2, 1>} : memref<36x32xf32, #tpu.memory_space<vmem>>, vector<18x32xf32>
    %c0_64 = arith.constant 0 : index
    %c0_65 = arith.constant 0 : index
    %126 = vector.load %arg28[%c0_64, %c0_65] : memref<18x32xf32, #tpu.memory_space<vmem>>, vector<18x32xf32>
    tpu.vector_store %arg28[%c0_64, %c0_65], %125 {strides = array<i32>} : memref<18x32xf32, #tpu.memory_space<vmem>>, vector<18x32xf32>,
    %c1_66 = arith.constant 1 : index
    %c0_67 = arith.constant 0 : index
    %c0_68 = arith.constant 0 : index
    %127 = vector.load %arg7[%c1_66, %c0_67, %c0_68] : memref<4x5x32xf32, #tpu.memory_space<vmem>>, vector<1x5x32xf32>
    %128 = vector.shape_cast %127 : vector<1x5x32xf32> to vector<5x32xf32>
    %cst_69 = arith.constant 0.000000e+00 : f32
    %129 = vector.broadcast %cst_69 : f32 to vector<16x32xf32>
    %c0_70 = arith.constant 0 : index
    %c0_71 = arith.constant 0 : index
    %130 = vector.load %arg27[%c0_70, %c0_71] : memref<18x32xf32, #tpu.memory_space<vmem>>, vector<16x32xf32>
    %131 = vector.extract_strided_slice %128 {offsets = [0, 0], sizes = [1, 32], strides = [1, 1]} : vector<5x32xf32> to vector<1x32xf32>
    %132 = vector.broadcast %131 : vector<1x32xf32> to vector<16x32xf32>
    %133 = arith.mulf %130, %132 : vector<16x32xf32>
    %134 = arith.addf %129, %133 : vector<16x32xf32>
    %c0_72 = arith.constant 0 : index
    %c0_73 = arith.constant 0 : index
    %135 = vector.load %arg28[%c0_72, %c0_73] : memref<18x32xf32, #tpu.memory_space<vmem>>, vector<16x32xf32>
    %136 = vector.extract_strided_slice %128 {offsets = [1, 0], sizes = [1, 32], strides = [1, 1]} : vector<5x32xf32> to vector<1x32xf32>
    %137 = vector.broadcast %136 : vector<1x32xf32> to vector<16x32xf32>
    %138 = arith.mulf %135, %137 : vector<16x32xf32>
    %139 = arith.addf %134, %138 : vector<16x32xf32>
    %c1_74 = arith.constant 1 : index
    %c0_75 = arith.constant 0 : index
    %140 = vector.load %arg27[%c1_74, %c0_75] : memref<18x32xf32, #tpu.memory_space<vmem>>, vector<16x32xf32>
    %141 = vector.extract_strided_slice %128 {offsets = [2, 0], sizes = [1, 32], strides = [1, 1]} : vector<5x32xf32> to vector<1x32xf32>
    %142 = vector.broadcast %141 : vector<1x32xf32> to vector<16x32xf32>
    %143 = arith.mulf %140, %142 : vector<16x32xf32>
    %144 = arith.addf %139, %143 : vector<16x32xf32>
    %c1_76 = arith.constant 1 : index
    %c0_77 = arith.constant 0 : index
    %145 = vector.load %arg28[%c1_76, %c0_77] : memref<18x32xf32, #tpu.memory_space<vmem>>, vector<16x32xf32>
    %146 = vector.extract_strided_slice %128 {offsets = [3, 0], sizes = [1, 32], strides = [1, 1]} : vector<5x32xf32> to vector<1x32xf32>
    %147 = vector.broadcast %146 : vector<1x32xf32> to vector<16x32xf32>
    %148 = arith.mulf %145, %147 : vector<16x32xf32>
    %149 = arith.addf %144, %148 : vector<16x32xf32>
    %c2_78 = arith.constant 2 : index
    %c0_79 = arith.constant 0 : index
    %150 = vector.load %arg27[%c2_78, %c0_79] : memref<18x32xf32, #tpu.memory_space<vmem>>, vector<16x32xf32>
    %151 = vector.extract_strided_slice %128 {offsets = [4, 0], sizes = [1, 32], strides = [1, 1]} : vector<5x32xf32> to vector<1x32xf32>
    %152 = vector.broadcast %151 : vector<1x32xf32> to vector<16x32xf32>
    %153 = arith.mulf %150, %152 : vector<16x32xf32>
    %154 = arith.addf %149, %153 : vector<16x32xf32>
    %c1_80 = arith.constant 1 : index
    %c0_81 = arith.constant 0 : index
    %c0_82 = arith.constant 0 : index
    %155 = vector.load %arg8[%c1_80, %c0_81, %c0_82] : memref<4x1x32xf32, #tpu.memory_space<vmem>>, vector<1x1x32xf32>
    %156 = vector.shape_cast %155 : vector<1x1x32xf32> to vector<1x32xf32>
    %157 = vector.broadcast %156 : vector<1x32xf32> to vector<16x32xf32>
    %158 = arith.addf %154, %157 : vector<16x32xf32>
    %c1_83 = arith.constant 1 : index
    %c0_84 = arith.constant 0 : index
    %c0_85 = arith.constant 0 : index
    %159 = vector.load %arg9[%c1_83, %c0_84, %c0_85] : memref<4x1x32xf32, #tpu.memory_space<vmem>>, vector<1x1x32xf32>
    %160 = vector.shape_cast %159 : vector<1x1x32xf32> to vector<1x32xf32>
    %c1_86 = arith.constant 1 : index
    %c0_87 = arith.constant 0 : index
    %c0_88 = arith.constant 0 : index
    %161 = vector.load %arg10[%c1_86, %c0_87, %c0_88] : memref<4x1x32xf32, #tpu.memory_space<vmem>>, vector<1x1x32xf32>
    %162 = vector.shape_cast %161 : vector<1x1x32xf32> to vector<1x32xf32>
    %163 = vector.shape_cast %158 : vector<16x32xf32> to vector<1x16x32xf32>
    %cst_89 = arith.constant dense<0.000000e+00> : vector<1xf32>
    %164 = vector.multi_reduction <add>, %163, %cst_89 [1, 2] : vector<1x16x32xf32> to vector<1xf32>
    %165 = vector.shape_cast %164 : vector<1xf32> to vector<1x1x1xf32>
    %166 = vector.extract %165[0, 0, 0] : f32 from vector<1x1x1xf32>
    %167 = vector.broadcast %166 : f32 to vector<1x1xf32>
    %168 = arith.mulf %158, %158 : vector<16x32xf32>
    %169 = vector.shape_cast %168 : vector<16x32xf32> to vector<1x16x32xf32>
    %cst_90 = arith.constant dense<0.000000e+00> : vector<1xf32>
    %170 = vector.multi_reduction <add>, %169, %cst_90 [1, 2] : vector<1x16x32xf32> to vector<1xf32>
    %171 = vector.shape_cast %170 : vector<1xf32> to vector<1x1x1xf32>
    %172 = vector.extract %171[0, 0, 0] : f32 from vector<1x1x1xf32>
    %173 = vector.broadcast %172 : f32 to vector<1x1xf32>
    %cst_91 = arith.constant 5.120000e+02 : f32
    %174 = vector.broadcast %cst_91 : f32 to vector<1x1xf32>
    %175 = arith.divf %167, %174 : vector<1x1xf32>
    %cst_92 = arith.constant 5.120000e+02 : f32
    %176 = vector.broadcast %cst_92 : f32 to vector<1x1xf32>
    %177 = arith.divf %173, %176 : vector<1x1xf32>
    %178 = arith.mulf %175, %175 : vector<1x1xf32>
    %179 = arith.subf %177, %178 : vector<1x1xf32>
    %cst_93 = arith.constant 0.000000e+00 : f32
    %180 = vector.broadcast %cst_93 : f32 to vector<1x1xf32>
    %181 = arith.maximumf %179, %180 : vector<1x1xf32>
    %182 = vector.broadcast %175 : vector<1x1xf32> to vector<16x32xf32>
    %183 = arith.subf %158, %182 : vector<16x32xf32>
    %184 = vector.broadcast %160 : vector<1x32xf32> to vector<16x32xf32>
    %185 = arith.mulf %184, %183 : vector<16x32xf32>
    %cst_94 = arith.constant 9.99999993E-9 : f32
    %186 = vector.broadcast %cst_94 : f32 to vector<1x1xf32>
    %187 = arith.addf %181, %186 : vector<1x1xf32>
    %188 = math.rsqrt %187 : vector<1x1xf32>
    %189 = vector.broadcast %188 : vector<1x1xf32> to vector<16x32xf32>
    %190 = arith.mulf %185, %189 : vector<16x32xf32>
    %191 = vector.broadcast %162 : vector<1x32xf32> to vector<16x32xf32>
    %192 = arith.addf %190, %191 : vector<16x32xf32>
    %c0_95 = arith.constant 0 : index
    %c0_96 = arith.constant 0 : index
    %c0_97 = arith.constant 0 : index
    %193 = vector.load %arg11[%c0_95, %c0_96, %c0_97] : memref<3x5x32xf32, #tpu.memory_space<vmem>>, vector<1x5x32xf32>
    %194 = vector.shape_cast %193 : vector<1x5x32xf32> to vector<5x32xf32>
    %cst_98 = arith.constant 0.000000e+00 : f32
    %195 = vector.broadcast %cst_98 : f32 to vector<16x32xf32>
    %c0_99 = arith.constant 0 : index
    %c0_100 = arith.constant 0 : index
    %196 = vector.load %arg27[%c0_99, %c0_100] : memref<18x32xf32, #tpu.memory_space<vmem>>, vector<16x32xf32>
    %197 = vector.extract_strided_slice %194 {offsets = [0, 0], sizes = [1, 32], strides = [1, 1]} : vector<5x32xf32> to vector<1x32xf32>
    %198 = vector.broadcast %197 : vector<1x32xf32> to vector<16x32xf32>
    %199 = arith.mulf %196, %198 : vector<16x32xf32>
    %200 = arith.addf %195, %199 : vector<16x32xf32>
    %c0_101 = arith.constant 0 : index
    %c0_102 = arith.constant 0 : index
    %201 = vector.load %arg28[%c0_101, %c0_102] : memref<18x32xf32, #tpu.memory_space<vmem>>, vector<16x32xf32>
    %202 = vector.extract_strided_slice %194 {offsets = [1, 0], sizes = [1, 32], strides = [1, 1]} : vector<5x32xf32> to vector<1x32xf32>
    %203 = vector.broadcast %202 : vector<1x32xf32> to vector<16x32xf32>
    %204 = arith.mulf %201, %203 : vector<16x32xf32>
    %205 = arith.addf %200, %204 : vector<16x32xf32>
    %c1_103 = arith.constant 1 : index
    %c0_104 = arith.constant 0 : index
    %206 = vector.load %arg27[%c1_103, %c0_104] : memref<18x32xf32, #tpu.memory_space<vmem>>, vector<16x32xf32>
    %207 = vector.extract_strided_slice %194 {offsets = [2, 0], sizes = [1, 32], strides = [1, 1]} : vector<5x32xf32> to vector<1x32xf32>
    %208 = vector.broadcast %207 : vector<1x32xf32> to vector<16x32xf32>
    %209 = arith.mulf %206, %208 : vector<16x32xf32>
    %210 = arith.addf %205, %209 : vector<16x32xf32>
    %c1_105 = arith.constant 1 : index
    %c0_106 = arith.constant 0 : index
    %211 = vector.load %arg28[%c1_105, %c0_106] : memref<18x32xf32, #tpu.memory_space<vmem>>, vector<16x32xf32>
    %212 = vector.extract_strided_slice %194 {offsets = [3, 0], sizes = [1, 32], strides = [1, 1]} : vector<5x32xf32> to vector<1x32xf32>
    %213 = vector.broadcast %212 : vector<1x32xf32> to vector<16x32xf32>
    %214 = arith.mulf %211, %213 : vector<16x32xf32>
    %215 = arith.addf %210, %214 : vector<16x32xf32>
    %c2_107 = arith.constant 2 : index
    %c0_108 = arith.constant 0 : index
    %216 = vector.load %arg27[%c2_107, %c0_108] : memref<18x32xf32, #tpu.memory_space<vmem>>, vector<16x32xf32>
    %217 = vector.extract_strided_slice %194 {offsets = [4, 0], sizes = [1, 32], strides = [1, 1]} : vector<5x32xf32> to vector<1x32xf32>
    %218 = vector.broadcast %217 : vector<1x32xf32> to vector<16x32xf32>
    %219 = arith.mulf %216, %218 : vector<16x32xf32>
    %220 = arith.addf %215, %219 : vector<16x32xf32>
    %c0_109 = arith.constant 0 : index
    %c0_110 = arith.constant 0 : index
    %c0_111 = arith.constant 0 : index
    %221 = vector.load %arg12[%c0_109, %c0_110, %c0_111] : memref<3x1x32xf32, #tpu.memory_space<vmem>>, vector<1x1x32xf32>
    %222 = vector.shape_cast %221 : vector<1x1x32xf32> to vector<1x32xf32>
    %223 = vector.broadcast %222 : vector<1x32xf32> to vector<16x32xf32>
    %224 = arith.addf %220, %223 : vector<16x32xf32>
    %c0_112 = arith.constant 0 : index
    %c0_113 = arith.constant 0 : index
    %c0_114 = arith.constant 0 : index
    %225 = vector.load %arg13[%c0_112, %c0_113, %c0_114] : memref<3x1x32xf32, #tpu.memory_space<vmem>>, vector<1x1x32xf32>
    %226 = vector.shape_cast %225 : vector<1x1x32xf32> to vector<1x32xf32>
    %c0_115 = arith.constant 0 : index
    %c0_116 = arith.constant 0 : index
    %c0_117 = arith.constant 0 : index
    %227 = vector.load %arg14[%c0_115, %c0_116, %c0_117] : memref<3x1x32xf32, #tpu.memory_space<vmem>>, vector<1x1x32xf32>
    %228 = vector.shape_cast %227 : vector<1x1x32xf32> to vector<1x32xf32>
    %229 = vector.shape_cast %224 : vector<16x32xf32> to vector<1x16x32xf32>
    %cst_118 = arith.constant dense<0.000000e+00> : vector<1xf32>
    %230 = vector.multi_reduction <add>, %229, %cst_118 [1, 2] : vector<1x16x32xf32> to vector<1xf32>
    %231 = vector.shape_cast %230 : vector<1xf32> to vector<1x1x1xf32>
    %232 = vector.extract %231[0, 0, 0] : f32 from vector<1x1x1xf32>
    %233 = vector.broadcast %232 : f32 to vector<1x1xf32>
    %234 = arith.mulf %224, %224 : vector<16x32xf32>
    %235 = vector.shape_cast %234 : vector<16x32xf32> to vector<1x16x32xf32>
    %cst_119 = arith.constant dense<0.000000e+00> : vector<1xf32>
    %236 = vector.multi_reduction <add>, %235, %cst_119 [1, 2] : vector<1x16x32xf32> to vector<1xf32>
    %237 = vector.shape_cast %236 : vector<1xf32> to vector<1x1x1xf32>
    %238 = vector.extract %237[0, 0, 0] : f32 from vector<1x1x1xf32>
    %239 = vector.broadcast %238 : f32 to vector<1x1xf32>
    %cst_120 = arith.constant 5.120000e+02 : f32
    %240 = vector.broadcast %cst_120 : f32 to vector<1x1xf32>
    %241 = arith.divf %233, %240 : vector<1x1xf32>
    %cst_121 = arith.constant 5.120000e+02 : f32
    %242 = vector.broadcast %cst_121 : f32 to vector<1x1xf32>
    %243 = arith.divf %239, %242 : vector<1x1xf32>
    %244 = arith.mulf %241, %241 : vector<1x1xf32>
    %245 = arith.subf %243, %244 : vector<1x1xf32>
    %cst_122 = arith.constant 0.000000e+00 : f32
    %246 = vector.broadcast %cst_122 : f32 to vector<1x1xf32>
    %247 = arith.maximumf %245, %246 : vector<1x1xf32>
    %248 = vector.broadcast %241 : vector<1x1xf32> to vector<16x32xf32>
    %249 = arith.subf %224, %248 : vector<16x32xf32>
    %250 = vector.broadcast %226 : vector<1x32xf32> to vector<16x32xf32>
    %251 = arith.mulf %250, %249 : vector<16x32xf32>
    %cst_123 = arith.constant 9.99999993E-9 : f32
    %252 = vector.broadcast %cst_123 : f32 to vector<1x1xf32>
    %253 = arith.addf %247, %252 : vector<1x1xf32>
    %254 = math.rsqrt %253 : vector<1x1xf32>
    %255 = vector.broadcast %254 : vector<1x1xf32> to vector<16x32xf32>
    %256 = arith.mulf %251, %255 : vector<16x32xf32>
    %257 = vector.broadcast %228 : vector<1x32xf32> to vector<16x32xf32>
    %258 = arith.addf %256, %257 : vector<16x32xf32>
    %259 = arith.truncf %258 : vector<16x32xf32> to vector<16x32xbf16>
    %260 = arith.truncf %192 : vector<16x32xf32> to vector<16x32xbf16>
    %cst_124 = arith.constant 0.000000e+00 : f32
    %261 = vector.broadcast %cst_124 : f32 to vector<2x32xf32>
    %c0_125 = arith.constant 0 : index
    %c0_126 = arith.constant 0 : index
    %262 = vector.load %arg26[%c0_125, %c0_126] : memref<36x32xf32, #tpu.memory_space<vmem>>, vector<2x32xf32>
    tpu.vector_store %arg26[%c0_125, %c0_126], %261 {strides = array<i32>} : memref<36x32xf32, #tpu.memory_space<vmem>>, vector<2x32xf32>,
    %c2_127 = arith.constant 2 : index
    %c0_128 = arith.constant 0 : index
    %263 = vector.load %arg26[%c2_127, %c0_128] : memref<36x32xf32, #tpu.memory_space<vmem>>, vector<16x32xf32>
    tpu.vector_store %arg26[%c2_127, %c0_128], %192 {strides = array<i32>} : memref<36x32xf32, #tpu.memory_space<vmem>>, vector<16x32xf32>,
    %cst_129 = arith.constant 0.000000e+00 : f32
    %264 = vector.broadcast %cst_129 : f32 to vector<2x32xf32>
    %c18 = arith.constant 18 : index
    %c0_130 = arith.constant 0 : index
    %265 = vector.load %arg26[%c18, %c0_130] : memref<36x32xf32, #tpu.memory_space<vmem>>, vector<2x32xf32>
    tpu.vector_store %arg26[%c18, %c0_130], %264 {strides = array<i32>} : memref<36x32xf32, #tpu.memory_space<vmem>>, vector<2x32xf32>,
    %c0_131 = arith.constant 0 : index
    %c0_132 = arith.constant 0 : index
    %266 = tpu.strided_load %arg26[%c0_131, %c0_132] {strides = array<i32: 2, 1>} : memref<36x32xf32, #tpu.memory_space<vmem>>, vector<10x32xf32>
    %c0_133 = arith.constant 0 : index
    %c0_134 = arith.constant 0 : index
    %267 = vector.load %arg27[%c0_133, %c0_134] : memref<18x32xf32, #tpu.memory_space<vmem>>, vector<10x32xf32>
    tpu.vector_store %arg27[%c0_133, %c0_134], %266 {strides = array<i32>} : memref<18x32xf32, #tpu.memory_space<vmem>>, vector<10x32xf32>,
    %c1_135 = arith.constant 1 : index
    %c0_136 = arith.constant 0 : index
    %268 = tpu.strided_load %arg26[%c1_135, %c0_136] {strides = array<i32: 2, 1>} : memref<36x32xf32, #tpu.memory_space<vmem>>, vector<10x32xf32>
    %c0_137 = arith.constant 0 : index
    %c0_138 = arith.constant 0 : index
    %269 = vector.load %arg28[%c0_137, %c0_138] : memref<18x32xf32, #tpu.memory_space<vmem>>, vector<10x32xf32>
    tpu.vector_store %arg28[%c0_137, %c0_138], %268 {strides = array<i32>} : memref<18x32xf32, #tpu.memory_space<vmem>>, vector<10x32xf32>,
    %c2_139 = arith.constant 2 : index
    %c0_140 = arith.constant 0 : index
    %c0_141 = arith.constant 0 : index
    %270 = vector.load %arg7[%c2_139, %c0_140, %c0_141] : memref<4x5x32xf32, #tpu.memory_space<vmem>>, vector<1x5x32xf32>
    %271 = vector.shape_cast %270 : vector<1x5x32xf32> to vector<5x32xf32>
    %cst_142 = arith.constant 0.000000e+00 : f32
    %272 = vector.broadcast %cst_142 : f32 to vector<8x32xf32>
    %c0_143 = arith.constant 0 : index
    %c0_144 = arith.constant 0 : index
    %273 = vector.load %arg27[%c0_143, %c0_144] : memref<18x32xf32, #tpu.memory_space<vmem>>, vector<8x32xf32>
    %274 = vector.extract_strided_slice %271 {offsets = [0, 0], sizes = [1, 32], strides = [1, 1]} : vector<5x32xf32> to vector<1x32xf32>
    %275 = vector.broadcast %274 : vector<1x32xf32> to vector<8x32xf32>
    %276 = arith.mulf %273, %275 : vector<8x32xf32>
    %277 = arith.addf %272, %276 : vector<8x32xf32>
    %c0_145 = arith.constant 0 : index
    %c0_146 = arith.constant 0 : index
    %278 = vector.load %arg28[%c0_145, %c0_146] : memref<18x32xf32, #tpu.memory_space<vmem>>, vector<8x32xf32>
    %279 = vector.extract_strided_slice %271 {offsets = [1, 0], sizes = [1, 32], strides = [1, 1]} : vector<5x32xf32> to vector<1x32xf32>
    %280 = vector.broadcast %279 : vector<1x32xf32> to vector<8x32xf32>
    %281 = arith.mulf %278, %280 : vector<8x32xf32>
    %282 = arith.addf %277, %281 : vector<8x32xf32>
    %c1_147 = arith.constant 1 : index
    %c0_148 = arith.constant 0 : index
    %283 = vector.load %arg27[%c1_147, %c0_148] : memref<18x32xf32, #tpu.memory_space<vmem>>, vector<8x32xf32>
    %284 = vector.extract_strided_slice %271 {offsets = [2, 0], sizes = [1, 32], strides = [1, 1]} : vector<5x32xf32> to vector<1x32xf32>
    %285 = vector.broadcast %284 : vector<1x32xf32> to vector<8x32xf32>
    %286 = arith.mulf %283, %285 : vector<8x32xf32>
    %287 = arith.addf %282, %286 : vector<8x32xf32>
    %c1_149 = arith.constant 1 : index
    %c0_150 = arith.constant 0 : index
    %288 = vector.load %arg28[%c1_149, %c0_150] : memref<18x32xf32, #tpu.memory_space<vmem>>, vector<8x32xf32>
    %289 = vector.extract_strided_slice %271 {offsets = [3, 0], sizes = [1, 32], strides = [1, 1]} : vector<5x32xf32> to vector<1x32xf32>
    %290 = vector.broadcast %289 : vector<1x32xf32> to vector<8x32xf32>
    %291 = arith.mulf %288, %290 : vector<8x32xf32>
    %292 = arith.addf %287, %291 : vector<8x32xf32>
    %c2_151 = arith.constant 2 : index
    %c0_152 = arith.constant 0 : index
    %293 = vector.load %arg27[%c2_151, %c0_152] : memref<18x32xf32, #tpu.memory_space<vmem>>, vector<8x32xf32>
    %294 = vector.extract_strided_slice %271 {offsets = [4, 0], sizes = [1, 32], strides = [1, 1]} : vector<5x32xf32> to vector<1x32xf32>
    %295 = vector.broadcast %294 : vector<1x32xf32> to vector<8x32xf32>
    %296 = arith.mulf %293, %295 : vector<8x32xf32>
    %297 = arith.addf %292, %296 : vector<8x32xf32>
    %c2_153 = arith.constant 2 : index
    %c0_154 = arith.constant 0 : index
    %c0_155 = arith.constant 0 : index
    %298 = vector.load %arg8[%c2_153, %c0_154, %c0_155] : memref<4x1x32xf32, #tpu.memory_space<vmem>>, vector<1x1x32xf32>
    %299 = vector.shape_cast %298 : vector<1x1x32xf32> to vector<1x32xf32>
    %300 = vector.broadcast %299 : vector<1x32xf32> to vector<8x32xf32>
    %301 = arith.addf %297, %300 : vector<8x32xf32>
    %c2_156 = arith.constant 2 : index
    %c0_157 = arith.constant 0 : index
    %c0_158 = arith.constant 0 : index
    %302 = vector.load %arg9[%c2_156, %c0_157, %c0_158] : memref<4x1x32xf32, #tpu.memory_space<vmem>>, vector<1x1x32xf32>
    %303 = vector.shape_cast %302 : vector<1x1x32xf32> to vector<1x32xf32>
    %c2_159 = arith.constant 2 : index
    %c0_160 = arith.constant 0 : index
    %c0_161 = arith.constant 0 : index
    %304 = vector.load %arg10[%c2_159, %c0_160, %c0_161] : memref<4x1x32xf32, #tpu.memory_space<vmem>>, vector<1x1x32xf32>
    %305 = vector.shape_cast %304 : vector<1x1x32xf32> to vector<1x32xf32>
    %306 = vector.shape_cast %301 : vector<8x32xf32> to vector<1x8x32xf32>
    %cst_162 = arith.constant dense<0.000000e+00> : vector<1xf32>
    %307 = vector.multi_reduction <add>, %306, %cst_162 [1, 2] : vector<1x8x32xf32> to vector<1xf32>
    %308 = vector.shape_cast %307 : vector<1xf32> to vector<1x1x1xf32>
    %309 = vector.extract %308[0, 0, 0] : f32 from vector<1x1x1xf32>
    %310 = vector.broadcast %309 : f32 to vector<1x1xf32>
    %311 = arith.mulf %301, %301 : vector<8x32xf32>
    %312 = vector.shape_cast %311 : vector<8x32xf32> to vector<1x8x32xf32>
    %cst_163 = arith.constant dense<0.000000e+00> : vector<1xf32>
    %313 = vector.multi_reduction <add>, %312, %cst_163 [1, 2] : vector<1x8x32xf32> to vector<1xf32>
    %314 = vector.shape_cast %313 : vector<1xf32> to vector<1x1x1xf32>
    %315 = vector.extract %314[0, 0, 0] : f32 from vector<1x1x1xf32>
    %316 = vector.broadcast %315 : f32 to vector<1x1xf32>
    %cst_164 = arith.constant 2.560000e+02 : f32
    %317 = vector.broadcast %cst_164 : f32 to vector<1x1xf32>
    %318 = arith.divf %310, %317 : vector<1x1xf32>
    %cst_165 = arith.constant 2.560000e+02 : f32
    %319 = vector.broadcast %cst_165 : f32 to vector<1x1xf32>
    %320 = arith.divf %316, %319 : vector<1x1xf32>
    %321 = arith.mulf %318, %318 : vector<1x1xf32>
    %322 = arith.subf %320, %321 : vector<1x1xf32>
    %cst_166 = arith.constant 0.000000e+00 : f32
    %323 = vector.broadcast %cst_166 : f32 to vector<1x1xf32>
    %324 = arith.maximumf %322, %323 : vector<1x1xf32>
    %325 = vector.broadcast %318 : vector<1x1xf32> to vector<8x32xf32>
    %326 = arith.subf %301, %325 : vector<8x32xf32>
    %327 = vector.broadcast %303 : vector<1x32xf32> to vector<8x32xf32>
    %328 = arith.mulf %327, %326 : vector<8x32xf32>
    %cst_167 = arith.constant 9.99999993E-9 : f32
    %329 = vector.broadcast %cst_167 : f32 to vector<1x1xf32>
    %330 = arith.addf %324, %329 : vector<1x1xf32>
    %331 = math.rsqrt %330 : vector<1x1xf32>
    %332 = vector.broadcast %331 : vector<1x1xf32> to vector<8x32xf32>
    %333 = arith.mulf %328, %332 : vector<8x32xf32>
    %334 = vector.broadcast %305 : vector<1x32xf32> to vector<8x32xf32>
    %335 = arith.addf %333, %334 : vector<8x32xf32>
    %c1_168 = arith.constant 1 : index
    %c0_169 = arith.constant 0 : index
    %c0_170 = arith.constant 0 : index
    %336 = vector.load %arg11[%c1_168, %c0_169, %c0_170] : memref<3x5x32xf32, #tpu.memory_space<vmem>>, vector<1x5x32xf32>
    %337 = vector.shape_cast %336 : vector<1x5x32xf32> to vector<5x32xf32>
    %cst_171 = arith.constant 0.000000e+00 : f32
    %338 = vector.broadcast %cst_171 : f32 to vector<8x32xf32>
    %c0_172 = arith.constant 0 : index
    %c0_173 = arith.constant 0 : index
    %339 = vector.load %arg27[%c0_172, %c0_173] : memref<18x32xf32, #tpu.memory_space<vmem>>, vector<8x32xf32>
    %340 = vector.extract_strided_slice %337 {offsets = [0, 0], sizes = [1, 32], strides = [1, 1]} : vector<5x32xf32> to vector<1x32xf32>
    %341 = vector.broadcast %340 : vector<1x32xf32> to vector<8x32xf32>
    %342 = arith.mulf %339, %341 : vector<8x32xf32>
    %343 = arith.addf %338, %342 : vector<8x32xf32>
    %c0_174 = arith.constant 0 : index
    %c0_175 = arith.constant 0 : index
    %344 = vector.load %arg28[%c0_174, %c0_175] : memref<18x32xf32, #tpu.memory_space<vmem>>, vector<8x32xf32>
    %345 = vector.extract_strided_slice %337 {offsets = [1, 0], sizes = [1, 32], strides = [1, 1]} : vector<5x32xf32> to vector<1x32xf32>
    %346 = vector.broadcast %345 : vector<1x32xf32> to vector<8x32xf32>
    %347 = arith.mulf %344, %346 : vector<8x32xf32>
    %348 = arith.addf %343, %347 : vector<8x32xf32>
    %c1_176 = arith.constant 1 : index
    %c0_177 = arith.constant 0 : index
    %349 = vector.load %arg27[%c1_176, %c0_177] : memref<18x32xf32, #tpu.memory_space<vmem>>, vector<8x32xf32>
    %350 = vector.extract_strided_slice %337 {offsets = [2, 0], sizes = [1, 32], strides = [1, 1]} : vector<5x32xf32> to vector<1x32xf32>
    %351 = vector.broadcast %350 : vector<1x32xf32> to vector<8x32xf32>
    %352 = arith.mulf %349, %351 : vector<8x32xf32>
    %353 = arith.addf %348, %352 : vector<8x32xf32>
    %c1_178 = arith.constant 1 : index
    %c0_179 = arith.constant 0 : index
    %354 = vector.load %arg28[%c1_178, %c0_179] : memref<18x32xf32, #tpu.memory_space<vmem>>, vector<8x32xf32>
    %355 = vector.extract_strided_slice %337 {offsets = [3, 0], sizes = [1, 32], strides = [1, 1]} : vector<5x32xf32> to vector<1x32xf32>
    %356 = vector.broadcast %355 : vector<1x32xf32> to vector<8x32xf32>
    %357 = arith.mulf %354, %356 : vector<8x32xf32>
    %358 = arith.addf %353, %357 : vector<8x32xf32>
    %c2_180 = arith.constant 2 : index
    %c0_181 = arith.constant 0 : index
    %359 = vector.load %arg27[%c2_180, %c0_181] : memref<18x32xf32, #tpu.memory_space<vmem>>, vector<8x32xf32>
    %360 = vector.extract_strided_slice %337 {offsets = [4, 0], sizes = [1, 32], strides = [1, 1]} : vector<5x32xf32> to vector<1x32xf32>
    %361 = vector.broadcast %360 : vector<1x32xf32> to vector<8x32xf32>
    %362 = arith.mulf %359, %361 : vector<8x32xf32>
    %363 = arith.addf %358, %362 : vector<8x32xf32>
    %c1_182 = arith.constant 1 : index
    %c0_183 = arith.constant 0 : index
    %c0_184 = arith.constant 0 : index
    %364 = vector.load %arg12[%c1_182, %c0_183, %c0_184] : memref<3x1x32xf32, #tpu.memory_space<vmem>>, vector<1x1x32xf32>
    %365 = vector.shape_cast %364 : vector<1x1x32xf32> to vector<1x32xf32>
    %366 = vector.broadcast %365 : vector<1x32xf32> to vector<8x32xf32>
    %367 = arith.addf %363, %366 : vector<8x32xf32>
    %c1_185 = arith.constant 1 : index
    %c0_186 = arith.constant 0 : index
    %c0_187 = arith.constant 0 : index
    %368 = vector.load %arg13[%c1_185, %c0_186, %c0_187] : memref<3x1x32xf32, #tpu.memory_space<vmem>>, vector<1x1x32xf32>
    %369 = vector.shape_cast %368 : vector<1x1x32xf32> to vector<1x32xf32>
    %c1_188 = arith.constant 1 : index
    %c0_189 = arith.constant 0 : index
    %c0_190 = arith.constant 0 : index
    %370 = vector.load %arg14[%c1_188, %c0_189, %c0_190] : memref<3x1x32xf32, #tpu.memory_space<vmem>>, vector<1x1x32xf32>
    %371 = vector.shape_cast %370 : vector<1x1x32xf32> to vector<1x32xf32>
    %372 = vector.shape_cast %367 : vector<8x32xf32> to vector<1x8x32xf32>
    %cst_191 = arith.constant dense<0.000000e+00> : vector<1xf32>
    %373 = vector.multi_reduction <add>, %372, %cst_191 [1, 2] : vector<1x8x32xf32> to vector<1xf32>
    %374 = vector.shape_cast %373 : vector<1xf32> to vector<1x1x1xf32>
    %375 = vector.extract %374[0, 0, 0] : f32 from vector<1x1x1xf32>
    %376 = vector.broadcast %375 : f32 to vector<1x1xf32>
    %377 = arith.mulf %367, %367 : vector<8x32xf32>
    %378 = vector.shape_cast %377 : vector<8x32xf32> to vector<1x8x32xf32>
    %cst_192 = arith.constant dense<0.000000e+00> : vector<1xf32>
    %379 = vector.multi_reduction <add>, %378, %cst_192 [1, 2] : vector<1x8x32xf32> to vector<1xf32>
    %380 = vector.shape_cast %379 : vector<1xf32> to vector<1x1x1xf32>
    %381 = vector.extract %380[0, 0, 0] : f32 from vector<1x1x1xf32>
    %382 = vector.broadcast %381 : f32 to vector<1x1xf32>
    %cst_193 = arith.constant 2.560000e+02 : f32
    %383 = vector.broadcast %cst_193 : f32 to vector<1x1xf32>
    %384 = arith.divf %376, %383 : vector<1x1xf32>
    %cst_194 = arith.constant 2.560000e+02 : f32
    %385 = vector.broadcast %cst_194 : f32 to vector<1x1xf32>
    %386 = arith.divf %382, %385 : vector<1x1xf32>
    %387 = arith.mulf %384, %384 : vector<1x1xf32>
    %388 = arith.subf %386, %387 : vector<1x1xf32>
    %cst_195 = arith.constant 0.000000e+00 : f32
    %389 = vector.broadcast %cst_195 : f32 to vector<1x1xf32>
    %390 = arith.maximumf %388, %389 : vector<1x1xf32>
    %391 = vector.broadcast %384 : vector<1x1xf32> to vector<8x32xf32>
    %392 = arith.subf %367, %391 : vector<8x32xf32>
    %393 = vector.broadcast %369 : vector<1x32xf32> to vector<8x32xf32>
    %394 = arith.mulf %393, %392 : vector<8x32xf32>
    %cst_196 = arith.constant 9.99999993E-9 : f32
    %395 = vector.broadcast %cst_196 : f32 to vector<1x1xf32>
    %396 = arith.addf %390, %395 : vector<1x1xf32>
    %397 = math.rsqrt %396 : vector<1x1xf32>
    %398 = vector.broadcast %397 : vector<1x1xf32> to vector<8x32xf32>
    %399 = arith.mulf %394, %398 : vector<8x32xf32>
    %400 = vector.broadcast %371 : vector<1x32xf32> to vector<8x32xf32>
    %401 = arith.addf %399, %400 : vector<8x32xf32>
    %402 = arith.truncf %401 : vector<8x32xf32> to vector<8x32xbf16>
    %403 = arith.truncf %335 : vector<8x32xf32> to vector<8x32xbf16>
    %cst_197 = arith.constant 0.000000e+00 : f32
    %404 = vector.broadcast %cst_197 : f32 to vector<2x32xf32>
    %c0_198 = arith.constant 0 : index
    %c0_199 = arith.constant 0 : index
    %405 = vector.load %arg26[%c0_198, %c0_199] : memref<36x32xf32, #tpu.memory_space<vmem>>, vector<2x32xf32>
    tpu.vector_store %arg26[%c0_198, %c0_199], %404 {strides = array<i32>} : memref<36x32xf32, #tpu.memory_space<vmem>>, vector<2x32xf32>,
    %c2_200 = arith.constant 2 : index
    %c0_201 = arith.constant 0 : index
    %406 = vector.load %arg26[%c2_200, %c0_201] : memref<36x32xf32, #tpu.memory_space<vmem>>, vector<8x32xf32>
    tpu.vector_store %arg26[%c2_200, %c0_201], %335 {strides = array<i32>} : memref<36x32xf32, #tpu.memory_space<vmem>>, vector<8x32xf32>,
    %cst_202 = arith.constant 0.000000e+00 : f32
    %407 = vector.broadcast %cst_202 : f32 to vector<2x32xf32>
    %c10 = arith.constant 10 : index
    %c0_203 = arith.constant 0 : index
    %408 = vector.load %arg26[%c10, %c0_203] : memref<36x32xf32, #tpu.memory_space<vmem>>, vector<2x32xf32>
    tpu.vector_store %arg26[%c10, %c0_203], %407 {strides = array<i32>} : memref<36x32xf32, #tpu.memory_space<vmem>>, vector<2x32xf32>,
    %c0_204 = arith.constant 0 : index
    %c0_205 = arith.constant 0 : index
    %409 = tpu.strided_load %arg26[%c0_204, %c0_205] {strides = array<i32: 2, 1>} : memref<36x32xf32, #tpu.memory_space<vmem>>, vector<6x32xf32>
    %c0_206 = arith.constant 0 : index
    %c0_207 = arith.constant 0 : index
    %410 = vector.load %arg27[%c0_206, %c0_207] : memref<18x32xf32, #tpu.memory_space<vmem>>, vector<6x32xf32>
    tpu.vector_store %arg27[%c0_206, %c0_207], %409 {strides = array<i32>} : memref<18x32xf32, #tpu.memory_space<vmem>>, vector<6x32xf32>,
    %c1_208 = arith.constant 1 : index
    %c0_209 = arith.constant 0 : index
    %411 = tpu.strided_load %arg26[%c1_208, %c0_209] {strides = array<i32: 2, 1>} : memref<36x32xf32, #tpu.memory_space<vmem>>, vector<6x32xf32>
    %c0_210 = arith.constant 0 : index
    %c0_211 = arith.constant 0 : index
    %412 = vector.load %arg28[%c0_210, %c0_211] : memref<18x32xf32, #tpu.memory_space<vmem>>, vector<6x32xf32>
    tpu.vector_store %arg28[%c0_210, %c0_211], %411 {strides = array<i32>} : memref<18x32xf32, #tpu.memory_space<vmem>>, vector<6x32xf32>,
    %c3_212 = arith.constant 3 : index
    %c0_213 = arith.constant 0 : index
    %c0_214 = arith.constant 0 : index
    %413 = vector.load %arg7[%c3_212, %c0_213, %c0_214] : memref<4x5x32xf32, #tpu.memory_space<vmem>>, vector<1x5x32xf32>
    %414 = vector.shape_cast %413 : vector<1x5x32xf32> to vector<5x32xf32>
    %cst_215 = arith.constant 0.000000e+00 : f32
    %415 = vector.broadcast %cst_215 : f32 to vector<4x32xf32>
    %c0_216 = arith.constant 0 : index
    %c0_217 = arith.constant 0 : index
    %416 = vector.load %arg27[%c0_216, %c0_217] : memref<18x32xf32, #tpu.memory_space<vmem>>, vector<4x32xf32>
    %417 = vector.extract_strided_slice %414 {offsets = [0, 0], sizes = [1, 32], strides = [1, 1]} : vector<5x32xf32> to vector<1x32xf32>
    %418 = vector.broadcast %417 : vector<1x32xf32> to vector<4x32xf32>
    %419 = arith.mulf %416, %418 : vector<4x32xf32>
    %420 = arith.addf %415, %419 : vector<4x32xf32>
    %c0_218 = arith.constant 0 : index
    %c0_219 = arith.constant 0 : index
    %421 = vector.load %arg28[%c0_218, %c0_219] : memref<18x32xf32, #tpu.memory_space<vmem>>, vector<4x32xf32>
    %422 = vector.extract_strided_slice %414 {offsets = [1, 0], sizes = [1, 32], strides = [1, 1]} : vector<5x32xf32> to vector<1x32xf32>
    %423 = vector.broadcast %422 : vector<1x32xf32> to vector<4x32xf32>
    %424 = arith.mulf %421, %423 : vector<4x32xf32>
    %425 = arith.addf %420, %424 : vector<4x32xf32>
    %c1_220 = arith.constant 1 : index
    %c0_221 = arith.constant 0 : index
    %426 = vector.load %arg27[%c1_220, %c0_221] : memref<18x32xf32, #tpu.memory_space<vmem>>, vector<4x32xf32>
    %427 = vector.extract_strided_slice %414 {offsets = [2, 0], sizes = [1, 32], strides = [1, 1]} : vector<5x32xf32> to vector<1x32xf32>
    %428 = vector.broadcast %427 : vector<1x32xf32> to vector<4x32xf32>
    %429 = arith.mulf %426, %428 : vector<4x32xf32>
    %430 = arith.addf %425, %429 : vector<4x32xf32>
    %c1_222 = arith.constant 1 : index
    %c0_223 = arith.constant 0 : index
    %431 = vector.load %arg28[%c1_222, %c0_223] : memref<18x32xf32, #tpu.memory_space<vmem>>, vector<4x32xf32>
    %432 = vector.extract_strided_slice %414 {offsets = [3, 0], sizes = [1, 32], strides = [1, 1]} : vector<5x32xf32> to vector<1x32xf32>
    %433 = vector.broadcast %432 : vector<1x32xf32> to vector<4x32xf32>
    %434 = arith.mulf %431, %433 : vector<4x32xf32>
    %435 = arith.addf %430, %434 : vector<4x32xf32>
    %c2_224 = arith.constant 2 : index
    %c0_225 = arith.constant 0 : index
    %436 = vector.load %arg27[%c2_224, %c0_225] : memref<18x32xf32, #tpu.memory_space<vmem>>, vector<4x32xf32>
    %437 = vector.extract_strided_slice %414 {offsets = [4, 0], sizes = [1, 32], strides = [1, 1]} : vector<5x32xf32> to vector<1x32xf32>
    %438 = vector.broadcast %437 : vector<1x32xf32> to vector<4x32xf32>
    %439 = arith.mulf %436, %438 : vector<4x32xf32>
    %440 = arith.addf %435, %439 : vector<4x32xf32>
    %c3_226 = arith.constant 3 : index
    %c0_227 = arith.constant 0 : index
    %c0_228 = arith.constant 0 : index
    %441 = vector.load %arg8[%c3_226, %c0_227, %c0_228] : memref<4x1x32xf32, #tpu.memory_space<vmem>>, vector<1x1x32xf32>
    %442 = vector.shape_cast %441 : vector<1x1x32xf32> to vector<1x32xf32>
    %443 = vector.broadcast %442 : vector<1x32xf32> to vector<4x32xf32>
    %444 = arith.addf %440, %443 : vector<4x32xf32>
    %c3_229 = arith.constant 3 : index
    %c0_230 = arith.constant 0 : index
    %c0_231 = arith.constant 0 : index
    %445 = vector.load %arg9[%c3_229, %c0_230, %c0_231] : memref<4x1x32xf32, #tpu.memory_space<vmem>>, vector<1x1x32xf32>
    %446 = vector.shape_cast %445 : vector<1x1x32xf32> to vector<1x32xf32>
    %c3_232 = arith.constant 3 : index
    %c0_233 = arith.constant 0 : index
    %c0_234 = arith.constant 0 : index
    %447 = vector.load %arg10[%c3_232, %c0_233, %c0_234] : memref<4x1x32xf32, #tpu.memory_space<vmem>>, vector<1x1x32xf32>
    %448 = vector.shape_cast %447 : vector<1x1x32xf32> to vector<1x32xf32>
    %449 = vector.shape_cast %444 : vector<4x32xf32> to vector<1x4x32xf32>
    %cst_235 = arith.constant dense<0.000000e+00> : vector<1xf32>
    %450 = vector.multi_reduction <add>, %449, %cst_235 [1, 2] : vector<1x4x32xf32> to vector<1xf32>
    %451 = vector.shape_cast %450 : vector<1xf32> to vector<1x1x1xf32>
    %452 = vector.extract %451[0, 0, 0] : f32 from vector<1x1x1xf32>
    %453 = vector.broadcast %452 : f32 to vector<1x1xf32>
    %454 = arith.mulf %444, %444 : vector<4x32xf32>
    %455 = vector.shape_cast %454 : vector<4x32xf32> to vector<1x4x32xf32>
    %cst_236 = arith.constant dense<0.000000e+00> : vector<1xf32>
    %456 = vector.multi_reduction <add>, %455, %cst_236 [1, 2] : vector<1x4x32xf32> to vector<1xf32>
    %457 = vector.shape_cast %456 : vector<1xf32> to vector<1x1x1xf32>
    %458 = vector.extract %457[0, 0, 0] : f32 from vector<1x1x1xf32>
    %459 = vector.broadcast %458 : f32 to vector<1x1xf32>
    %cst_237 = arith.constant 1.280000e+02 : f32
    %460 = vector.broadcast %cst_237 : f32 to vector<1x1xf32>
    %461 = arith.divf %453, %460 : vector<1x1xf32>
    %cst_238 = arith.constant 1.280000e+02 : f32
    %462 = vector.broadcast %cst_238 : f32 to vector<1x1xf32>
    %463 = arith.divf %459, %462 : vector<1x1xf32>
    %464 = arith.mulf %461, %461 : vector<1x1xf32>
    %465 = arith.subf %463, %464 : vector<1x1xf32>
    %cst_239 = arith.constant 0.000000e+00 : f32
    %466 = vector.broadcast %cst_239 : f32 to vector<1x1xf32>
    %467 = arith.maximumf %465, %466 : vector<1x1xf32>
    %468 = vector.broadcast %461 : vector<1x1xf32> to vector<4x32xf32>
    %469 = arith.subf %444, %468 : vector<4x32xf32>
    %470 = vector.broadcast %446 : vector<1x32xf32> to vector<4x32xf32>
    %471 = arith.mulf %470, %469 : vector<4x32xf32>
    %cst_240 = arith.constant 9.99999993E-9 : f32
    %472 = vector.broadcast %cst_240 : f32 to vector<1x1xf32>
    %473 = arith.addf %467, %472 : vector<1x1xf32>
    %474 = math.rsqrt %473 : vector<1x1xf32>
    %475 = vector.broadcast %474 : vector<1x1xf32> to vector<4x32xf32>
    %476 = arith.mulf %471, %475 : vector<4x32xf32>
    %477 = vector.broadcast %448 : vector<1x32xf32> to vector<4x32xf32>
    %478 = arith.addf %476, %477 : vector<4x32xf32>
    %c2_241 = arith.constant 2 : index
    %c0_242 = arith.constant 0 : index
    %c0_243 = arith.constant 0 : index
    %479 = vector.load %arg11[%c2_241, %c0_242, %c0_243] : memref<3x5x32xf32, #tpu.memory_space<vmem>>, vector<1x5x32xf32>
    %480 = vector.shape_cast %479 : vector<1x5x32xf32> to vector<5x32xf32>
    %cst_244 = arith.constant 0.000000e+00 : f32
    %481 = vector.broadcast %cst_244 : f32 to vector<4x32xf32>
    %c0_245 = arith.constant 0 : index
    %c0_246 = arith.constant 0 : index
    %482 = vector.load %arg27[%c0_245, %c0_246] : memref<18x32xf32, #tpu.memory_space<vmem>>, vector<4x32xf32>
    %483 = vector.extract_strided_slice %480 {offsets = [0, 0], sizes = [1, 32], strides = [1, 1]} : vector<5x32xf32> to vector<1x32xf32>
    %484 = vector.broadcast %483 : vector<1x32xf32> to vector<4x32xf32>
    %485 = arith.mulf %482, %484 : vector<4x32xf32>
    %486 = arith.addf %481, %485 : vector<4x32xf32>
    %c0_247 = arith.constant 0 : index
    %c0_248 = arith.constant 0 : index
    %487 = vector.load %arg28[%c0_247, %c0_248] : memref<18x32xf32, #tpu.memory_space<vmem>>, vector<4x32xf32>
    %488 = vector.extract_strided_slice %480 {offsets = [1, 0], sizes = [1, 32], strides = [1, 1]} : vector<5x32xf32> to vector<1x32xf32>
    %489 = vector.broadcast %488 : vector<1x32xf32> to vector<4x32xf32>
    %490 = arith.mulf %487, %489 : vector<4x32xf32>
    %491 = arith.addf %486, %490 : vector<4x32xf32>
    %c1_249 = arith.constant 1 : index
    %c0_250 = arith.constant 0 : index
    %492 = vector.load %arg27[%c1_249, %c0_250] : memref<18x32xf32, #tpu.memory_space<vmem>>, vector<4x32xf32>
    %493 = vector.extract_strided_slice %480 {offsets = [2, 0], sizes = [1, 32], strides = [1, 1]} : vector<5x32xf32> to vector<1x32xf32>
    %494 = vector.broadcast %493 : vector<1x32xf32> to vector<4x32xf32>
    %495 = arith.mulf %492, %494 : vector<4x32xf32>
    %496 = arith.addf %491, %495 : vector<4x32xf32>
    %c1_251 = arith.constant 1 : index
    %c0_252 = arith.constant 0 : index
    %497 = vector.load %arg28[%c1_251, %c0_252] : memref<18x32xf32, #tpu.memory_space<vmem>>, vector<4x32xf32>
    %498 = vector.extract_strided_slice %480 {offsets = [3, 0], sizes = [1, 32], strides = [1, 1]} : vector<5x32xf32> to vector<1x32xf32>
    %499 = vector.broadcast %498 : vector<1x32xf32> to vector<4x32xf32>
    %500 = arith.mulf %497, %499 : vector<4x32xf32>
    %501 = arith.addf %496, %500 : vector<4x32xf32>
    %c2_253 = arith.constant 2 : index
    %c0_254 = arith.constant 0 : index
    %502 = vector.load %arg27[%c2_253, %c0_254] : memref<18x32xf32, #tpu.memory_space<vmem>>, vector<4x32xf32>
    %503 = vector.extract_strided_slice %480 {offsets = [4, 0], sizes = [1, 32], strides = [1, 1]} : vector<5x32xf32> to vector<1x32xf32>
    %504 = vector.broadcast %503 : vector<1x32xf32> to vector<4x32xf32>
    %505 = arith.mulf %502, %504 : vector<4x32xf32>
    %506 = arith.addf %501, %505 : vector<4x32xf32>
    %c2_255 = arith.constant 2 : index
    %c0_256 = arith.constant 0 : index
    %c0_257 = arith.constant 0 : index
    %507 = vector.load %arg12[%c2_255, %c0_256, %c0_257] : memref<3x1x32xf32, #tpu.memory_space<vmem>>, vector<1x1x32xf32>
    %508 = vector.shape_cast %507 : vector<1x1x32xf32> to vector<1x32xf32>
    %509 = vector.broadcast %508 : vector<1x32xf32> to vector<4x32xf32>
    %510 = arith.addf %506, %509 : vector<4x32xf32>
    %c2_258 = arith.constant 2 : index
    %c0_259 = arith.constant 0 : index
    %c0_260 = arith.constant 0 : index
    %511 = vector.load %arg13[%c2_258, %c0_259, %c0_260] : memref<3x1x32xf32, #tpu.memory_space<vmem>>, vector<1x1x32xf32>
    %512 = vector.shape_cast %511 : vector<1x1x32xf32> to vector<1x32xf32>
    %c2_261 = arith.constant 2 : index
    %c0_262 = arith.constant 0 : index
    %c0_263 = arith.constant 0 : index
    %513 = vector.load %arg14[%c2_261, %c0_262, %c0_263] : memref<3x1x32xf32, #tpu.memory_space<vmem>>, vector<1x1x32xf32>
    %514 = vector.shape_cast %513 : vector<1x1x32xf32> to vector<1x32xf32>
    %515 = vector.shape_cast %510 : vector<4x32xf32> to vector<1x4x32xf32>
    %cst_264 = arith.constant dense<0.000000e+00> : vector<1xf32>
    %516 = vector.multi_reduction <add>, %515, %cst_264 [1, 2] : vector<1x4x32xf32> to vector<1xf32>
    %517 = vector.shape_cast %516 : vector<1xf32> to vector<1x1x1xf32>
    %518 = vector.extract %517[0, 0, 0] : f32 from vector<1x1x1xf32>
    %519 = vector.broadcast %518 : f32 to vector<1x1xf32>
    %520 = arith.mulf %510, %510 : vector<4x32xf32>
    %521 = vector.shape_cast %520 : vector<4x32xf32> to vector<1x4x32xf32>
    %cst_265 = arith.constant dense<0.000000e+00> : vector<1xf32>
    %522 = vector.multi_reduction <add>, %521, %cst_265 [1, 2] : vector<1x4x32xf32> to vector<1xf32>
    %523 = vector.shape_cast %522 : vector<1xf32> to vector<1x1x1xf32>
    %524 = vector.extract %523[0, 0, 0] : f32 from vector<1x1x1xf32>
    %525 = vector.broadcast %524 : f32 to vector<1x1xf32>
    %cst_266 = arith.constant 1.280000e+02 : f32
    %526 = vector.broadcast %cst_266 : f32 to vector<1x1xf32>
    %527 = arith.divf %519, %526 : vector<1x1xf32>
    %cst_267 = arith.constant 1.280000e+02 : f32
    %528 = vector.broadcast %cst_267 : f32 to vector<1x1xf32>
    %529 = arith.divf %525, %528 : vector<1x1xf32>
    %530 = arith.mulf %527, %527 : vector<1x1xf32>
    %531 = arith.subf %529, %530 : vector<1x1xf32>
    %cst_268 = arith.constant 0.000000e+00 : f32
    %532 = vector.broadcast %cst_268 : f32 to vector<1x1xf32>
    %533 = arith.maximumf %531, %532 : vector<1x1xf32>
    %534 = vector.broadcast %527 : vector<1x1xf32> to vector<4x32xf32>
    %535 = arith.subf %510, %534 : vector<4x32xf32>
    %536 = vector.broadcast %512 : vector<1x32xf32> to vector<4x32xf32>
    %537 = arith.mulf %536, %535 : vector<4x32xf32>
    %cst_269 = arith.constant 9.99999993E-9 : f32
    %538 = vector.broadcast %cst_269 : f32 to vector<1x1xf32>
    %539 = arith.addf %533, %538 : vector<1x1xf32>
    %540 = math.rsqrt %539 : vector<1x1xf32>
    %541 = vector.broadcast %540 : vector<1x1xf32> to vector<4x32xf32>
    %542 = arith.mulf %537, %541 : vector<4x32xf32>
    %543 = vector.broadcast %514 : vector<1x32xf32> to vector<4x32xf32>
    %544 = arith.addf %542, %543 : vector<4x32xf32>
    %545 = arith.truncf %544 : vector<4x32xf32> to vector<4x32xbf16>
    %546 = arith.truncf %478 : vector<4x32xf32> to vector<4x32xbf16>
    %c0_270 = arith.constant 0 : index
    %c0_271 = arith.constant 0 : index
    %547 = vector.load %arg15[%c0_270, %c0_271] : memref<320x32xbf16, #tpu.memory_space<vmem>>, vector<32x32xbf16>
    %cst_272 = arith.constant dense<0.000000e+00> : vector<32x32xf32>
    %548 = tpu.matmul %117, %547, %cst_272 {dimension_numbers = #tpu.dot_dimension_numbers<[1], [0], [0], [1], [0, 0, 1, 1], [], []>} : vector<32x32xbf16>, vector<32x32xbf16>, vector<32x32xf32> -> vector<32x32xf32>
    %c32 = arith.constant 32 : index
    %c0_273 = arith.constant 0 : index
    %549 = vector.load %arg15[%c32, %c0_273] : memref<320x32xbf16, #tpu.memory_space<vmem>>, vector<32x32xbf16>
    %cst_274 = arith.constant dense<0.000000e+00> : vector<16x32xf32>
    %550 = tpu.matmul %260, %549, %cst_274 {dimension_numbers = #tpu.dot_dimension_numbers<[1], [0], [0], [1], [0, 0, 1, 1], [], []>} : vector<16x32xbf16>, vector<32x32xbf16>, vector<16x32xf32> -> vector<16x32xf32>
    %c0_275 = arith.constant 0 : index
    %c0_276 = arith.constant 0 : index
    %551 = tpu.strided_load %arg26[%c0_275, %c0_276] {strides = array<i32: 2, 1>} : memref<36x32xf32, #tpu.memory_space<vmem>>, vector<16x32xf32>
    tpu.strided_store %arg26[%c0_275, %c0_276], %550 {strides = array<i32: 2, 1>} : memref<36x32xf32, #tpu.memory_space<vmem>>, vector<16x32xf32>
    %c1_277 = arith.constant 1 : index
    %c0_278 = arith.constant 0 : index
    %552 = tpu.strided_load %arg26[%c1_277, %c0_278] {strides = array<i32: 2, 1>} : memref<36x32xf32, #tpu.memory_space<vmem>>, vector<16x32xf32>
    tpu.strided_store %arg26[%c1_277, %c0_278], %550 {strides = array<i32: 2, 1>} : memref<36x32xf32, #tpu.memory_space<vmem>>, vector<16x32xf32>
    %c0_279 = arith.constant 0 : index
    %c0_280 = arith.constant 0 : index
    %553 = vector.load %arg26[%c0_279, %c0_280] : memref<36x32xf32, #tpu.memory_space<vmem>>, vector<32x32xf32>
    %554 = arith.addf %548, %553 : vector<32x32xf32>
    %c0_281 = arith.constant 0 : index
    %c0_282 = arith.constant 0 : index
    %c0_283 = arith.constant 0 : index
    %555 = vector.load %arg16[%c0_281, %c0_282, %c0_283] : memref<4x1x32xf32, #tpu.memory_space<vmem>>, vector<1x1x32xf32>
    %556 = vector.shape_cast %555 : vector<1x1x32xf32> to vector<1x32xf32>
    %557 = vector.broadcast %556 : vector<1x32xf32> to vector<32x32xf32>
    %558 = arith.addf %554, %557 : vector<32x32xf32>
    %c0_284 = arith.constant 0 : index
    %c0_285 = arith.constant 0 : index
    %c0_286 = arith.constant 0 : index
    %559 = vector.load %arg17[%c0_284, %c0_285, %c0_286] : memref<4x1x32xf32, #tpu.memory_space<vmem>>, vector<1x1x32xf32>
    %560 = vector.shape_cast %559 : vector<1x1x32xf32> to vector<1x32xf32>
    %c0_287 = arith.constant 0 : index
    %c0_288 = arith.constant 0 : index
    %c0_289 = arith.constant 0 : index
    %561 = vector.load %arg18[%c0_287, %c0_288, %c0_289] : memref<4x1x32xf32, #tpu.memory_space<vmem>>, vector<1x1x32xf32>
    %562 = vector.shape_cast %561 : vector<1x1x32xf32> to vector<1x32xf32>
    %563 = vector.shape_cast %558 : vector<32x32xf32> to vector<1x32x32xf32>
    %cst_290 = arith.constant dense<0.000000e+00> : vector<1xf32>
    %564 = vector.multi_reduction <add>, %563, %cst_290 [1, 2] : vector<1x32x32xf32> to vector<1xf32>
    %565 = vector.shape_cast %564 : vector<1xf32> to vector<1x1x1xf32>
    %566 = vector.extract %565[0, 0, 0] : f32 from vector<1x1x1xf32>
    %567 = vector.broadcast %566 : f32 to vector<1x1xf32>
    %568 = arith.mulf %558, %558 : vector<32x32xf32>
    %569 = vector.shape_cast %568 : vector<32x32xf32> to vector<1x32x32xf32>
    %cst_291 = arith.constant dense<0.000000e+00> : vector<1xf32>
    %570 = vector.multi_reduction <add>, %569, %cst_291 [1, 2] : vector<1x32x32xf32> to vector<1xf32>
    %571 = vector.shape_cast %570 : vector<1xf32> to vector<1x1x1xf32>
    %572 = vector.extract %571[0, 0, 0] : f32 from vector<1x1x1xf32>
    %573 = vector.broadcast %572 : f32 to vector<1x1xf32>
    %cst_292 = arith.constant 1.024000e+03 : f32
    %574 = vector.broadcast %cst_292 : f32 to vector<1x1xf32>
    %575 = arith.divf %567, %574 : vector<1x1xf32>
    %cst_293 = arith.constant 1.024000e+03 : f32
    %576 = vector.broadcast %cst_293 : f32 to vector<1x1xf32>
    %577 = arith.divf %573, %576 : vector<1x1xf32>
    %578 = arith.mulf %575, %575 : vector<1x1xf32>
    %579 = arith.subf %577, %578 : vector<1x1xf32>
    %cst_294 = arith.constant 0.000000e+00 : f32
    %580 = vector.broadcast %cst_294 : f32 to vector<1x1xf32>
    %581 = arith.maximumf %579, %580 : vector<1x1xf32>
    %582 = vector.broadcast %575 : vector<1x1xf32> to vector<32x32xf32>
    %583 = arith.subf %558, %582 : vector<32x32xf32>
    %584 = vector.broadcast %560 : vector<1x32xf32> to vector<32x32xf32>
    %585 = arith.mulf %584, %583 : vector<32x32xf32>
    %cst_295 = arith.constant 9.99999993E-9 : f32
    %586 = vector.broadcast %cst_295 : f32 to vector<1x1xf32>
    %587 = arith.addf %581, %586 : vector<1x1xf32>
    %588 = math.rsqrt %587 : vector<1x1xf32>
    %589 = vector.broadcast %588 : vector<1x1xf32> to vector<32x32xf32>
    %590 = arith.mulf %585, %589 : vector<32x32xf32>
    %591 = vector.broadcast %562 : vector<1x32xf32> to vector<32x32xf32>
    %592 = arith.addf %590, %591 : vector<32x32xf32>
    %c1_296 = arith.constant 1 : index
    %593 = memref.load %arg1[%c1_296] : memref<6xf32, #tpu.memory_space<smem>>
    %cst_297 = arith.constant 0.000000e+00 : f32
    %594 = vector.broadcast %cst_297 : f32 to vector<32x32xf32>
    %595 = arith.cmpf oge, %592, %594 : vector<32x32xf32>
    %596 = vector.broadcast %593 : f32 to vector<32x32xf32>
    %597 = arith.mulf %596, %592 : vector<32x32xf32>
    %598 = arith.select %595, %592, %597 : vector<32x32xi1>, vector<32x32xf32>
    %599 = arith.truncf %598 : vector<32x32xf32> to vector<32x32xbf16>
    %c64 = arith.constant 64 : index
    %c0_298 = arith.constant 0 : index
    %600 = vector.load %arg15[%c64, %c0_298] : memref<320x32xbf16, #tpu.memory_space<vmem>>, vector<32x32xbf16>
    %cst_299 = arith.constant dense<0.000000e+00> : vector<16x32xf32>
    %601 = tpu.matmul %259, %600, %cst_299 {dimension_numbers = #tpu.dot_dimension_numbers<[1], [0], [0], [1], [0, 0, 1, 1], [], []>} : vector<16x32xbf16>, vector<32x32xbf16>, vector<16x32xf32> -> vector<16x32xf32>
    %c96 = arith.constant 96 : index
    %c0_300 = arith.constant 0 : index
    %602 = vector.load %arg15[%c96, %c0_300] : memref<320x32xbf16, #tpu.memory_space<vmem>>, vector<32x32xbf16>
    %cst_301 = arith.constant dense<0.000000e+00> : vector<16x32xf32>
    %603 = tpu.matmul %260, %602, %cst_301 {dimension_numbers = #tpu.dot_dimension_numbers<[1], [0], [0], [1], [0, 0, 1, 1], [], []>} : vector<16x32xbf16>, vector<32x32xbf16>, vector<16x32xf32> -> vector<16x32xf32>
    %604 = arith.addf %601, %603 : vector<16x32xf32>
    %c128 = arith.constant 128 : index
    %c0_302 = arith.constant 0 : index
    %605 = vector.load %arg15[%c128, %c0_302] : memref<320x32xbf16, #tpu.memory_space<vmem>>, vector<32x32xbf16>
    %cst_303 = arith.constant dense<0.000000e+00> : vector<8x32xf32>
    %606 = tpu.matmul %403, %605, %cst_303 {dimension_numbers = #tpu.dot_dimension_numbers<[1], [0], [0], [1], [0, 0, 1, 1], [], []>} : vector<8x32xbf16>, vector<32x32xbf16>, vector<8x32xf32> -> vector<8x32xf32>
    %c0_304 = arith.constant 0 : index
    %c0_305 = arith.constant 0 : index
    %607 = tpu.strided_load %arg26[%c0_304, %c0_305] {strides = array<i32: 2, 1>} : memref<36x32xf32, #tpu.memory_space<vmem>>, vector<8x32xf32>
    tpu.strided_store %arg26[%c0_304, %c0_305], %606 {strides = array<i32: 2, 1>} : memref<36x32xf32, #tpu.memory_space<vmem>>, vector<8x32xf32>
    %c1_306 = arith.constant 1 : index
    %c0_307 = arith.constant 0 : index
    %608 = tpu.strided_load %arg26[%c1_306, %c0_307] {strides = array<i32: 2, 1>} : memref<36x32xf32, #tpu.memory_space<vmem>>, vector<8x32xf32>
    tpu.strided_store %arg26[%c1_306, %c0_307], %606 {strides = array<i32: 2, 1>} : memref<36x32xf32, #tpu.memory_space<vmem>>, vector<8x32xf32>
    %c0_308 = arith.constant 0 : index
    %c0_309 = arith.constant 0 : index
    %609 = vector.load %arg26[%c0_308, %c0_309] : memref<36x32xf32, #tpu.memory_space<vmem>>, vector<16x32xf32>
    %610 = arith.addf %604, %609 : vector<16x32xf32>
    %c1_310 = arith.constant 1 : index
    %c0_311 = arith.constant 0 : index
    %c0_312 = arith.constant 0 : index
    %611 = vector.load %arg16[%c1_310, %c0_311, %c0_312] : memref<4x1x32xf32, #tpu.memory_space<vmem>>, vector<1x1x32xf32>
    %612 = vector.shape_cast %611 : vector<1x1x32xf32> to vector<1x32xf32>
    %613 = vector.broadcast %612 : vector<1x32xf32> to vector<16x32xf32>
    %614 = arith.addf %610, %613 : vector<16x32xf32>
    %c1_313 = arith.constant 1 : index
    %c0_314 = arith.constant 0 : index
    %c0_315 = arith.constant 0 : index
    %615 = vector.load %arg17[%c1_313, %c0_314, %c0_315] : memref<4x1x32xf32, #tpu.memory_space<vmem>>, vector<1x1x32xf32>
    %616 = vector.shape_cast %615 : vector<1x1x32xf32> to vector<1x32xf32>
    %c1_316 = arith.constant 1 : index
    %c0_317 = arith.constant 0 : index
    %c0_318 = arith.constant 0 : index
    %617 = vector.load %arg18[%c1_316, %c0_317, %c0_318] : memref<4x1x32xf32, #tpu.memory_space<vmem>>, vector<1x1x32xf32>
    %618 = vector.shape_cast %617 : vector<1x1x32xf32> to vector<1x32xf32>
    %619 = vector.shape_cast %614 : vector<16x32xf32> to vector<1x16x32xf32>
    %cst_319 = arith.constant dense<0.000000e+00> : vector<1xf32>
    %620 = vector.multi_reduction <add>, %619, %cst_319 [1, 2] : vector<1x16x32xf32> to vector<1xf32>
    %621 = vector.shape_cast %620 : vector<1xf32> to vector<1x1x1xf32>
    %622 = vector.extract %621[0, 0, 0] : f32 from vector<1x1x1xf32>
    %623 = vector.broadcast %622 : f32 to vector<1x1xf32>
    %624 = arith.mulf %614, %614 : vector<16x32xf32>
    %625 = vector.shape_cast %624 : vector<16x32xf32> to vector<1x16x32xf32>
    %cst_320 = arith.constant dense<0.000000e+00> : vector<1xf32>
    %626 = vector.multi_reduction <add>, %625, %cst_320 [1, 2] : vector<1x16x32xf32> to vector<1xf32>
    %627 = vector.shape_cast %626 : vector<1xf32> to vector<1x1x1xf32>
    %628 = vector.extract %627[0, 0, 0] : f32 from vector<1x1x1xf32>
    %629 = vector.broadcast %628 : f32 to vector<1x1xf32>
    %cst_321 = arith.constant 5.120000e+02 : f32
    %630 = vector.broadcast %cst_321 : f32 to vector<1x1xf32>
    %631 = arith.divf %623, %630 : vector<1x1xf32>
    %cst_322 = arith.constant 5.120000e+02 : f32
    %632 = vector.broadcast %cst_322 : f32 to vector<1x1xf32>
    %633 = arith.divf %629, %632 : vector<1x1xf32>
    %634 = arith.mulf %631, %631 : vector<1x1xf32>
    %635 = arith.subf %633, %634 : vector<1x1xf32>
    %cst_323 = arith.constant 0.000000e+00 : f32
    %636 = vector.broadcast %cst_323 : f32 to vector<1x1xf32>
    %637 = arith.maximumf %635, %636 : vector<1x1xf32>
    %638 = vector.broadcast %631 : vector<1x1xf32> to vector<16x32xf32>
    %639 = arith.subf %614, %638 : vector<16x32xf32>
    %640 = vector.broadcast %616 : vector<1x32xf32> to vector<16x32xf32>
    %641 = arith.mulf %640, %639 : vector<16x32xf32>
    %cst_324 = arith.constant 9.99999993E-9 : f32
    %642 = vector.broadcast %cst_324 : f32 to vector<1x1xf32>
    %643 = arith.addf %637, %642 : vector<1x1xf32>
    %644 = math.rsqrt %643 : vector<1x1xf32>
    %645 = vector.broadcast %644 : vector<1x1xf32> to vector<16x32xf32>
    %646 = arith.mulf %641, %645 : vector<16x32xf32>
    %647 = vector.broadcast %618 : vector<1x32xf32> to vector<16x32xf32>
    %648 = arith.addf %646, %647 : vector<16x32xf32>
    %c2_325 = arith.constant 2 : index
    %649 = memref.load %arg1[%c2_325] : memref<6xf32, #tpu.memory_space<smem>>
    %cst_326 = arith.constant 0.000000e+00 : f32
    %650 = vector.broadcast %cst_326 : f32 to vector<16x32xf32>
    %651 = arith.cmpf oge, %648, %650 : vector<16x32xf32>
    %652 = vector.broadcast %649 : f32 to vector<16x32xf32>
    %653 = arith.mulf %652, %648 : vector<16x32xf32>
    %654 = arith.select %651, %648, %653 : vector<16x32xi1>, vector<16x32xf32>
    %655 = arith.truncf %654 : vector<16x32xf32> to vector<16x32xbf16>
    %c160 = arith.constant 160 : index
    %c0_327 = arith.constant 0 : index
    %656 = vector.load %arg15[%c160, %c0_327] : memref<320x32xbf16, #tpu.memory_space<vmem>>, vector<32x32xbf16>
    %cst_328 = arith.constant dense<0.000000e+00> : vector<8x32xf32>
    %657 = tpu.matmul %402, %656, %cst_328 {dimension_numbers = #tpu.dot_dimension_numbers<[1], [0], [0], [1], [0, 0, 1, 1], [], []>} : vector<8x32xbf16>, vector<32x32xbf16>, vector<8x32xf32> -> vector<8x32xf32>
    %c192 = arith.constant 192 : index
    %c0_329 = arith.constant 0 : index
    %658 = vector.load %arg15[%c192, %c0_329] : memref<320x32xbf16, #tpu.memory_space<vmem>>, vector<32x32xbf16>
    %cst_330 = arith.constant dense<0.000000e+00> : vector<8x32xf32>
    %659 = tpu.matmul %403, %658, %cst_330 {dimension_numbers = #tpu.dot_dimension_numbers<[1], [0], [0], [1], [0, 0, 1, 1], [], []>} : vector<8x32xbf16>, vector<32x32xbf16>, vector<8x32xf32> -> vector<8x32xf32>
    %660 = arith.addf %657, %659 : vector<8x32xf32>
    %c224 = arith.constant 224 : index
    %c0_331 = arith.constant 0 : index
    %661 = vector.load %arg15[%c224, %c0_331] : memref<320x32xbf16, #tpu.memory_space<vmem>>, vector<32x32xbf16>
    %cst_332 = arith.constant dense<0.000000e+00> : vector<4x32xf32>
    %662 = tpu.matmul %546, %661, %cst_332 {dimension_numbers = #tpu.dot_dimension_numbers<[1], [0], [0], [1], [0, 0, 1, 1], [], []>} : vector<4x32xbf16>, vector<32x32xbf16>, vector<4x32xf32> -> vector<4x32xf32>
    %c0_333 = arith.constant 0 : index
    %c0_334 = arith.constant 0 : index
    %663 = tpu.strided_load %arg26[%c0_333, %c0_334] {strides = array<i32: 2, 1>} : memref<36x32xf32, #tpu.memory_space<vmem>>, vector<4x32xf32>
    tpu.strided_store %arg26[%c0_333, %c0_334], %662 {strides = array<i32: 2, 1>} : memref<36x32xf32, #tpu.memory_space<vmem>>, vector<4x32xf32>
    %c1_335 = arith.constant 1 : index
    %c0_336 = arith.constant 0 : index
    %664 = tpu.strided_load %arg26[%c1_335, %c0_336] {strides = array<i32: 2, 1>} : memref<36x32xf32, #tpu.memory_space<vmem>>, vector<4x32xf32>
    tpu.strided_store %arg26[%c1_335, %c0_336], %662 {strides = array<i32: 2, 1>} : memref<36x32xf32, #tpu.memory_space<vmem>>, vector<4x32xf32>
    %c0_337 = arith.constant 0 : index
    %c0_338 = arith.constant 0 : index
    %665 = vector.load %arg26[%c0_337, %c0_338] : memref<36x32xf32, #tpu.memory_space<vmem>>, vector<8x32xf32>
    %666 = arith.addf %660, %665 : vector<8x32xf32>
    %c2_339 = arith.constant 2 : index
    %c0_340 = arith.constant 0 : index
    %c0_341 = arith.constant 0 : index
    %667 = vector.load %arg16[%c2_339, %c0_340, %c0_341] : memref<4x1x32xf32, #tpu.memory_space<vmem>>, vector<1x1x32xf32>
    %668 = vector.shape_cast %667 : vector<1x1x32xf32> to vector<1x32xf32>
    %669 = vector.broadcast %668 : vector<1x32xf32> to vector<8x32xf32>
    %670 = arith.addf %666, %669 : vector<8x32xf32>
    %c2_342 = arith.constant 2 : index
    %c0_343 = arith.constant 0 : index
    %c0_344 = arith.constant 0 : index
    %671 = vector.load %arg17[%c2_342, %c0_343, %c0_344] : memref<4x1x32xf32, #tpu.memory_space<vmem>>, vector<1x1x32xf32>
    %672 = vector.shape_cast %671 : vector<1x1x32xf32> to vector<1x32xf32>
    %c2_345 = arith.constant 2 : index
    %c0_346 = arith.constant 0 : index
    %c0_347 = arith.constant 0 : index
    %673 = vector.load %arg18[%c2_345, %c0_346, %c0_347] : memref<4x1x32xf32, #tpu.memory_space<vmem>>, vector<1x1x32xf32>
    %674 = vector.shape_cast %673 : vector<1x1x32xf32> to vector<1x32xf32>
    %675 = vector.shape_cast %670 : vector<8x32xf32> to vector<1x8x32xf32>
    %cst_348 = arith.constant dense<0.000000e+00> : vector<1xf32>
    %676 = vector.multi_reduction <add>, %675, %cst_348 [1, 2] : vector<1x8x32xf32> to vector<1xf32>
    %677 = vector.shape_cast %676 : vector<1xf32> to vector<1x1x1xf32>
    %678 = vector.extract %677[0, 0, 0] : f32 from vector<1x1x1xf32>
    %679 = vector.broadcast %678 : f32 to vector<1x1xf32>
    %680 = arith.mulf %670, %670 : vector<8x32xf32>
    %681 = vector.shape_cast %680 : vector<8x32xf32> to vector<1x8x32xf32>
    %cst_349 = arith.constant dense<0.000000e+00> : vector<1xf32>
    %682 = vector.multi_reduction <add>, %681, %cst_349 [1, 2] : vector<1x8x32xf32> to vector<1xf32>
    %683 = vector.shape_cast %682 : vector<1xf32> to vector<1x1x1xf32>
    %684 = vector.extract %683[0, 0, 0] : f32 from vector<1x1x1xf32>
    %685 = vector.broadcast %684 : f32 to vector<1x1xf32>
    %cst_350 = arith.constant 2.560000e+02 : f32
    %686 = vector.broadcast %cst_350 : f32 to vector<1x1xf32>
    %687 = arith.divf %679, %686 : vector<1x1xf32>
    %cst_351 = arith.constant 2.560000e+02 : f32
    %688 = vector.broadcast %cst_351 : f32 to vector<1x1xf32>
    %689 = arith.divf %685, %688 : vector<1x1xf32>
    %690 = arith.mulf %687, %687 : vector<1x1xf32>
    %691 = arith.subf %689, %690 : vector<1x1xf32>
    %cst_352 = arith.constant 0.000000e+00 : f32
    %692 = vector.broadcast %cst_352 : f32 to vector<1x1xf32>
    %693 = arith.maximumf %691, %692 : vector<1x1xf32>
    %694 = vector.broadcast %687 : vector<1x1xf32> to vector<8x32xf32>
    %695 = arith.subf %670, %694 : vector<8x32xf32>
    %696 = vector.broadcast %672 : vector<1x32xf32> to vector<8x32xf32>
    %697 = arith.mulf %696, %695 : vector<8x32xf32>
    %cst_353 = arith.constant 9.99999993E-9 : f32
    %698 = vector.broadcast %cst_353 : f32 to vector<1x1xf32>
    %699 = arith.addf %693, %698 : vector<1x1xf32>
    %700 = math.rsqrt %699 : vector<1x1xf32>
    %701 = vector.broadcast %700 : vector<1x1xf32> to vector<8x32xf32>
    %702 = arith.mulf %697, %701 : vector<8x32xf32>
    %703 = vector.broadcast %674 : vector<1x32xf32> to vector<8x32xf32>
    %704 = arith.addf %702, %703 : vector<8x32xf32>
    %c3_354 = arith.constant 3 : index
    %705 = memref.load %arg1[%c3_354] : memref<6xf32, #tpu.memory_space<smem>>
    %cst_355 = arith.constant 0.000000e+00 : f32
    %706 = vector.broadcast %cst_355 : f32 to vector<8x32xf32>
    %707 = arith.cmpf oge, %704, %706 : vector<8x32xf32>
    %708 = vector.broadcast %705 : f32 to vector<8x32xf32>
    %709 = arith.mulf %708, %704 : vector<8x32xf32>
    %710 = arith.select %707, %704, %709 : vector<8x32xi1>, vector<8x32xf32>
    %711 = arith.truncf %710 : vector<8x32xf32> to vector<8x32xbf16>
    %c256 = arith.constant 256 : index
    %c0_356 = arith.constant 0 : index
    %712 = vector.load %arg15[%c256, %c0_356] : memref<320x32xbf16, #tpu.memory_space<vmem>>, vector<32x32xbf16>
    %cst_357 = arith.constant dense<0.000000e+00> : vector<4x32xf32>
    %713 = tpu.matmul %545, %712, %cst_357 {dimension_numbers = #tpu.dot_dimension_numbers<[1], [0], [0], [1], [0, 0, 1, 1], [], []>} : vector<4x32xbf16>, vector<32x32xbf16>, vector<4x32xf32> -> vector<4x32xf32>
    %c288 = arith.constant 288 : index
    %c0_358 = arith.constant 0 : index
    %714 = vector.load %arg15[%c288, %c0_358] : memref<320x32xbf16, #tpu.memory_space<vmem>>, vector<32x32xbf16>
    %cst_359 = arith.constant dense<0.000000e+00> : vector<4x32xf32>
    %715 = tpu.matmul %546, %714, %cst_359 {dimension_numbers = #tpu.dot_dimension_numbers<[1], [0], [0], [1], [0, 0, 1, 1], [], []>} : vector<4x32xbf16>, vector<32x32xbf16>, vector<4x32xf32> -> vector<4x32xf32>
    %716 = arith.addf %713, %715 : vector<4x32xf32>
    %c3_360 = arith.constant 3 : index
    %c0_361 = arith.constant 0 : index
    %c0_362 = arith.constant 0 : index
    %717 = vector.load %arg16[%c3_360, %c0_361, %c0_362] : memref<4x1x32xf32, #tpu.memory_space<vmem>>, vector<1x1x32xf32>
    %718 = vector.shape_cast %717 : vector<1x1x32xf32> to vector<1x32xf32>
    %719 = vector.broadcast %718 : vector<1x32xf32> to vector<4x32xf32>
    %720 = arith.addf %716, %719 : vector<4x32xf32>
    %c3_363 = arith.constant 3 : index
    %c0_364 = arith.constant 0 : index
    %c0_365 = arith.constant 0 : index
    %721 = vector.load %arg17[%c3_363, %c0_364, %c0_365] : memref<4x1x32xf32, #tpu.memory_space<vmem>>, vector<1x1x32xf32>
    %722 = vector.shape_cast %721 : vector<1x1x32xf32> to vector<1x32xf32>
    %c3_366 = arith.constant 3 : index
    %c0_367 = arith.constant 0 : index
    %c0_368 = arith.constant 0 : index
    %723 = vector.load %arg18[%c3_366, %c0_367, %c0_368] : memref<4x1x32xf32, #tpu.memory_space<vmem>>, vector<1x1x32xf32>
    %724 = vector.shape_cast %723 : vector<1x1x32xf32> to vector<1x32xf32>
    %725 = vector.shape_cast %720 : vector<4x32xf32> to vector<1x4x32xf32>
    %cst_369 = arith.constant dense<0.000000e+00> : vector<1xf32>
    %726 = vector.multi_reduction <add>, %725, %cst_369 [1, 2] : vector<1x4x32xf32> to vector<1xf32>
    %727 = vector.shape_cast %726 : vector<1xf32> to vector<1x1x1xf32>
    %728 = vector.extract %727[0, 0, 0] : f32 from vector<1x1x1xf32>
    %729 = vector.broadcast %728 : f32 to vector<1x1xf32>
    %730 = arith.mulf %720, %720 : vector<4x32xf32>
    %731 = vector.shape_cast %730 : vector<4x32xf32> to vector<1x4x32xf32>
    %cst_370 = arith.constant dense<0.000000e+00> : vector<1xf32>
    %732 = vector.multi_reduction <add>, %731, %cst_370 [1, 2] : vector<1x4x32xf32> to vector<1xf32>
    %733 = vector.shape_cast %732 : vector<1xf32> to vector<1x1x1xf32>
    %734 = vector.extract %733[0, 0, 0] : f32 from vector<1x1x1xf32>
    %735 = vector.broadcast %734 : f32 to vector<1x1xf32>
    %cst_371 = arith.constant 1.280000e+02 : f32
    %736 = vector.broadcast %cst_371 : f32 to vector<1x1xf32>
    %737 = arith.divf %729, %736 : vector<1x1xf32>
    %cst_372 = arith.constant 1.280000e+02 : f32
    %738 = vector.broadcast %cst_372 : f32 to vector<1x1xf32>
    %739 = arith.divf %735, %738 : vector<1x1xf32>
    %740 = arith.mulf %737, %737 : vector<1x1xf32>
    %741 = arith.subf %739, %740 : vector<1x1xf32>
    %cst_373 = arith.constant 0.000000e+00 : f32
    %742 = vector.broadcast %cst_373 : f32 to vector<1x1xf32>
    %743 = arith.maximumf %741, %742 : vector<1x1xf32>
    %744 = vector.broadcast %737 : vector<1x1xf32> to vector<4x32xf32>
    %745 = arith.subf %720, %744 : vector<4x32xf32>
    %746 = vector.broadcast %722 : vector<1x32xf32> to vector<4x32xf32>
    %747 = arith.mulf %746, %745 : vector<4x32xf32>
    %cst_374 = arith.constant 9.99999993E-9 : f32
    %748 = vector.broadcast %cst_374 : f32 to vector<1x1xf32>
    %749 = arith.addf %743, %748 : vector<1x1xf32>
    %750 = math.rsqrt %749 : vector<1x1xf32>
    %751 = vector.broadcast %750 : vector<1x1xf32> to vector<4x32xf32>
    %752 = arith.mulf %747, %751 : vector<4x32xf32>
    %753 = vector.broadcast %724 : vector<1x32xf32> to vector<4x32xf32>
    %754 = arith.addf %752, %753 : vector<4x32xf32>
    %c4_375 = arith.constant 4 : index
    %755 = memref.load %arg1[%c4_375] : memref<6xf32, #tpu.memory_space<smem>>
    %cst_376 = arith.constant 0.000000e+00 : f32
    %756 = vector.broadcast %cst_376 : f32 to vector<4x32xf32>
    %757 = arith.cmpf oge, %754, %756 : vector<4x32xf32>
    %758 = vector.broadcast %755 : f32 to vector<4x32xf32>
    %759 = arith.mulf %758, %754 : vector<4x32xf32>
    %760 = arith.select %757, %754, %759 : vector<4x32xi1>, vector<4x32xf32>
    %761 = arith.truncf %760 : vector<4x32xf32> to vector<4x32xbf16>
    %c0_377 = arith.constant 0 : index
    %c0_378 = arith.constant 0 : index
    %762 = vector.load %arg19[%c0_377, %c0_378] : memref<128x32xbf16, #tpu.memory_space<vmem>>, vector<32x32xbf16>
    %cst_379 = arith.constant dense<0.000000e+00> : vector<32x32xf32>
    %763 = tpu.matmul %599, %762, %cst_379 {dimension_numbers = #tpu.dot_dimension_numbers<[1], [0], [0], [1], [0, 0, 1, 1], [], []>} : vector<32x32xbf16>, vector<32x32xbf16>, vector<32x32xf32> -> vector<32x32xf32>
    %c32_380 = arith.constant 32 : index
    %c0_381 = arith.constant 0 : index
    %764 = vector.load %arg19[%c32_380, %c0_381] : memref<128x32xbf16, #tpu.memory_space<vmem>>, vector<32x32xbf16>
    %cst_382 = arith.constant dense<0.000000e+00> : vector<16x32xf32>
    %765 = tpu.matmul %655, %764, %cst_382 {dimension_numbers = #tpu.dot_dimension_numbers<[1], [0], [0], [1], [0, 0, 1, 1], [], []>} : vector<16x32xbf16>, vector<32x32xbf16>, vector<16x32xf32> -> vector<16x32xf32>
    %c0_383 = arith.constant 0 : index
    %c0_384 = arith.constant 0 : index
    %766 = tpu.strided_load %arg26[%c0_383, %c0_384] {strides = array<i32: 2, 1>} : memref<36x32xf32, #tpu.memory_space<vmem>>, vector<16x32xf32>
    tpu.strided_store %arg26[%c0_383, %c0_384], %765 {strides = array<i32: 2, 1>} : memref<36x32xf32, #tpu.memory_space<vmem>>, vector<16x32xf32>
    %c1_385 = arith.constant 1 : index
    %c0_386 = arith.constant 0 : index
    %767 = tpu.strided_load %arg26[%c1_385, %c0_386] {strides = array<i32: 2, 1>} : memref<36x32xf32, #tpu.memory_space<vmem>>, vector<16x32xf32>
    tpu.strided_store %arg26[%c1_385, %c0_386], %765 {strides = array<i32: 2, 1>} : memref<36x32xf32, #tpu.memory_space<vmem>>, vector<16x32xf32>
    %c0_387 = arith.constant 0 : index
    %c0_388 = arith.constant 0 : index
    %768 = vector.load %arg26[%c0_387, %c0_388] : memref<36x32xf32, #tpu.memory_space<vmem>>, vector<32x32xf32>
    %769 = arith.addf %763, %768 : vector<32x32xf32>
    %c64_389 = arith.constant 64 : index
    %c0_390 = arith.constant 0 : index
    %770 = vector.load %arg19[%c64_389, %c0_390] : memref<128x32xbf16, #tpu.memory_space<vmem>>, vector<32x32xbf16>
    %cst_391 = arith.constant dense<0.000000e+00> : vector<8x32xf32>
    %771 = tpu.matmul %711, %770, %cst_391 {dimension_numbers = #tpu.dot_dimension_numbers<[1], [0], [0], [1], [0, 0, 1, 1], [], []>} : vector<8x32xbf16>, vector<32x32xbf16>, vector<8x32xf32> -> vector<8x32xf32>
    %c0_392 = arith.constant 0 : index
    %c0_393 = arith.constant 0 : index
    %772 = tpu.strided_load %arg26[%c0_392, %c0_393] {strides = array<i32: 4, 1>} : memref<36x32xf32, #tpu.memory_space<vmem>>, vector<8x32xf32>
    tpu.strided_store %arg26[%c0_392, %c0_393], %771 {strides = array<i32: 4, 1>} : memref<36x32xf32, #tpu.memory_space<vmem>>, vector<8x32xf32>
    %c1_394 = arith.constant 1 : index
    %c0_395 = arith.constant 0 : index
    %773 = tpu.strided_load %arg26[%c1_394, %c0_395] {strides = array<i32: 4, 1>} : memref<36x32xf32, #tpu.memory_space<vmem>>, vector<8x32xf32>
    tpu.strided_store %arg26[%c1_394, %c0_395], %771 {strides = array<i32: 4, 1>} : memref<36x32xf32, #tpu.memory_space<vmem>>, vector<8x32xf32>
    %c2_396 = arith.constant 2 : index
    %c0_397 = arith.constant 0 : index
    %774 = tpu.strided_load %arg26[%c2_396, %c0_397] {strides = array<i32: 4, 1>} : memref<36x32xf32, #tpu.memory_space<vmem>>, vector<8x32xf32>
    tpu.strided_store %arg26[%c2_396, %c0_397], %771 {strides = array<i32: 4, 1>} : memref<36x32xf32, #tpu.memory_space<vmem>>, vector<8x32xf32>
    %c3_398 = arith.constant 3 : index
    %c0_399 = arith.constant 0 : index
    %775 = tpu.strided_load %arg26[%c3_398, %c0_399] {strides = array<i32: 4, 1>} : memref<36x32xf32, #tpu.memory_space<vmem>>, vector<8x32xf32>
    tpu.strided_store %arg26[%c3_398, %c0_399], %771 {strides = array<i32: 4, 1>} : memref<36x32xf32, #tpu.memory_space<vmem>>, vector<8x32xf32>
    %c0_400 = arith.constant 0 : index
    %c0_401 = arith.constant 0 : index
    %776 = vector.load %arg26[%c0_400, %c0_401] : memref<36x32xf32, #tpu.memory_space<vmem>>, vector<32x32xf32>
    %777 = arith.addf %769, %776 : vector<32x32xf32>
    %c96_402 = arith.constant 96 : index
    %c0_403 = arith.constant 0 : index
    %778 = vector.load %arg19[%c96_402, %c0_403] : memref<128x32xbf16, #tpu.memory_space<vmem>>, vector<32x32xbf16>
    %cst_404 = arith.constant dense<0.000000e+00> : vector<4x32xf32>
    %779 = tpu.matmul %761, %778, %cst_404 {dimension_numbers = #tpu.dot_dimension_numbers<[1], [0], [0], [1], [0, 0, 1, 1], [], []>} : vector<4x32xbf16>, vector<32x32xbf16>, vector<4x32xf32> -> vector<4x32xf32>
    %c0_405 = arith.constant 0 : index
    %c0_406 = arith.constant 0 : index
    %780 = tpu.strided_load %arg26[%c0_405, %c0_406] {strides = array<i32: 8, 1>} : memref<36x32xf32, #tpu.memory_space<vmem>>, vector<4x32xf32>
    tpu.strided_store %arg26[%c0_405, %c0_406], %779 {strides = array<i32: 8, 1>} : memref<36x32xf32, #tpu.memory_space<vmem>>, vector<4x32xf32>
    %c1_407 = arith.constant 1 : index
    %c0_408 = arith.constant 0 : index
    %781 = tpu.strided_load %arg26[%c1_407, %c0_408] {strides = array<i32: 8, 1>} : memref<36x32xf32, #tpu.memory_space<vmem>>, vector<4x32xf32>
    tpu.strided_store %arg26[%c1_407, %c0_408], %779 {strides = array<i32: 8, 1>} : memref<36x32xf32, #tpu.memory_space<vmem>>, vector<4x32xf32>
    %c2_409 = arith.constant 2 : index
    %c0_410 = arith.constant 0 : index
    %782 = tpu.strided_load %arg26[%c2_409, %c0_410] {strides = array<i32: 8, 1>} : memref<36x32xf32, #tpu.memory_space<vmem>>, vector<4x32xf32>
    tpu.strided_store %arg26[%c2_409, %c0_410], %779 {strides = array<i32: 8, 1>} : memref<36x32xf32, #tpu.memory_space<vmem>>, vector<4x32xf32>
    %c3_411 = arith.constant 3 : index
    %c0_412 = arith.constant 0 : index
    %783 = tpu.strided_load %arg26[%c3_411, %c0_412] {strides = array<i32: 8, 1>} : memref<36x32xf32, #tpu.memory_space<vmem>>, vector<4x32xf32>
    tpu.strided_store %arg26[%c3_411, %c0_412], %779 {strides = array<i32: 8, 1>} : memref<36x32xf32, #tpu.memory_space<vmem>>, vector<4x32xf32>
    %c4_413 = arith.constant 4 : index
    %c0_414 = arith.constant 0 : index
    %784 = tpu.strided_load %arg26[%c4_413, %c0_414] {strides = array<i32: 8, 1>} : memref<36x32xf32, #tpu.memory_space<vmem>>, vector<4x32xf32>
    tpu.strided_store %arg26[%c4_413, %c0_414], %779 {strides = array<i32: 8, 1>} : memref<36x32xf32, #tpu.memory_space<vmem>>, vector<4x32xf32>
    %c5 = arith.constant 5 : index
    %c0_415 = arith.constant 0 : index
    %785 = tpu.strided_load %arg26[%c5, %c0_415] {strides = array<i32: 8, 1>} : memref<36x32xf32, #tpu.memory_space<vmem>>, vector<4x32xf32>
    tpu.strided_store %arg26[%c5, %c0_415], %779 {strides = array<i32: 8, 1>} : memref<36x32xf32, #tpu.memory_space<vmem>>, vector<4x32xf32>
    %c6 = arith.constant 6 : index
    %c0_416 = arith.constant 0 : index
    %786 = tpu.strided_load %arg26[%c6, %c0_416] {strides = array<i32: 8, 1>} : memref<36x32xf32, #tpu.memory_space<vmem>>, vector<4x32xf32>
    tpu.strided_store %arg26[%c6, %c0_416], %779 {strides = array<i32: 8, 1>} : memref<36x32xf32, #tpu.memory_space<vmem>>, vector<4x32xf32>
    %c7 = arith.constant 7 : index
    %c0_417 = arith.constant 0 : index
    %787 = tpu.strided_load %arg26[%c7, %c0_417] {strides = array<i32: 8, 1>} : memref<36x32xf32, #tpu.memory_space<vmem>>, vector<4x32xf32>
    tpu.strided_store %arg26[%c7, %c0_417], %779 {strides = array<i32: 8, 1>} : memref<36x32xf32, #tpu.memory_space<vmem>>, vector<4x32xf32>
    %c0_418 = arith.constant 0 : index
    %c0_419 = arith.constant 0 : index
    %788 = vector.load %arg26[%c0_418, %c0_419] : memref<36x32xf32, #tpu.memory_space<vmem>>, vector<32x32xf32>
    %789 = arith.addf %777, %788 : vector<32x32xf32>
    %c0_420 = arith.constant 0 : index
    %c0_421 = arith.constant 0 : index
    %790 = vector.load %arg20[%c0_420, %c0_421] : memref<1x32xf32, #tpu.memory_space<vmem>>, vector<1x32xf32>
    %791 = vector.broadcast %790 : vector<1x32xf32> to vector<32x32xf32>
    %792 = arith.addf %789, %791 : vector<32x32xf32>
    %c0_422 = arith.constant 0 : index
    %c0_423 = arith.constant 0 : index
    %793 = vector.load %arg21[%c0_422, %c0_423] : memref<1x32xf32, #tpu.memory_space<vmem>>, vector<1x32xf32>
    %c0_424 = arith.constant 0 : index
    %c0_425 = arith.constant 0 : index
    %794 = vector.load %arg22[%c0_424, %c0_425] : memref<1x32xf32, #tpu.memory_space<vmem>>, vector<1x32xf32>
    %795 = vector.shape_cast %792 : vector<32x32xf32> to vector<1x32x32xf32>
    %cst_426 = arith.constant dense<0.000000e+00> : vector<1xf32>
    %796 = vector.multi_reduction <add>, %795, %cst_426 [1, 2] : vector<1x32x32xf32> to vector<1xf32>
    %797 = vector.shape_cast %796 : vector<1xf32> to vector<1x1x1xf32>
    %798 = vector.extract %797[0, 0, 0] : f32 from vector<1x1x1xf32>
    %799 = vector.broadcast %798 : f32 to vector<1x1xf32>
    %800 = arith.mulf %792, %792 : vector<32x32xf32>
    %801 = vector.shape_cast %800 : vector<32x32xf32> to vector<1x32x32xf32>
    %cst_427 = arith.constant dense<0.000000e+00> : vector<1xf32>
    %802 = vector.multi_reduction <add>, %801, %cst_427 [1, 2] : vector<1x32x32xf32> to vector<1xf32>
    %803 = vector.shape_cast %802 : vector<1xf32> to vector<1x1x1xf32>
    %804 = vector.extract %803[0, 0, 0] : f32 from vector<1x1x1xf32>
    %805 = vector.broadcast %804 : f32 to vector<1x1xf32>
    %cst_428 = arith.constant 1.024000e+03 : f32
    %806 = vector.broadcast %cst_428 : f32 to vector<1x1xf32>
    %807 = arith.divf %799, %806 : vector<1x1xf32>
    %cst_429 = arith.constant 1.024000e+03 : f32
    %808 = vector.broadcast %cst_429 : f32 to vector<1x1xf32>
    %809 = arith.divf %805, %808 : vector<1x1xf32>
    %810 = arith.mulf %807, %807 : vector<1x1xf32>
    %811 = arith.subf %809, %810 : vector<1x1xf32>
    %cst_430 = arith.constant 0.000000e+00 : f32
    %812 = vector.broadcast %cst_430 : f32 to vector<1x1xf32>
    %813 = arith.maximumf %811, %812 : vector<1x1xf32>
    %814 = vector.broadcast %807 : vector<1x1xf32> to vector<32x32xf32>
    %815 = arith.subf %792, %814 : vector<32x32xf32>
    %816 = vector.broadcast %793 : vector<1x32xf32> to vector<32x32xf32>
    %817 = arith.mulf %816, %815 : vector<32x32xf32>
    %cst_431 = arith.constant 9.99999993E-9 : f32
    %818 = vector.broadcast %cst_431 : f32 to vector<1x1xf32>
    %819 = arith.addf %813, %818 : vector<1x1xf32>
    %820 = math.rsqrt %819 : vector<1x1xf32>
    %821 = vector.broadcast %820 : vector<1x1xf32> to vector<32x32xf32>
    %822 = arith.mulf %817, %821 : vector<32x32xf32>
    %823 = vector.broadcast %794 : vector<1x32xf32> to vector<32x32xf32>
    %824 = arith.addf %822, %823 : vector<32x32xf32>
    %c5_432 = arith.constant 5 : index
    %825 = memref.load %arg1[%c5_432] : memref<6xf32, #tpu.memory_space<smem>>
    %cst_433 = arith.constant 0.000000e+00 : f32
    %826 = vector.broadcast %cst_433 : f32 to vector<32x32xf32>
    %827 = arith.cmpf oge, %824, %826 : vector<32x32xf32>
    %828 = vector.broadcast %825 : f32 to vector<32x32xf32>
    %829 = arith.mulf %828, %824 : vector<32x32xf32>
    %830 = arith.select %827, %824, %829 : vector<32x32xi1>, vector<32x32xf32>
    %831 = arith.truncf %830 : vector<32x32xf32> to vector<32x32xbf16>
    %c0_434 = arith.constant 0 : index
    %c0_435 = arith.constant 0 : index
    %832 = vector.load %arg23[%c0_434, %c0_435] : memref<32x16xbf16, #tpu.memory_space<vmem>>, vector<32x16xbf16>
    %cst_436 = arith.constant dense<0.000000e+00> : vector<32x16xf32>
    %833 = tpu.matmul %831, %832, %cst_436 {dimension_numbers = #tpu.dot_dimension_numbers<[1], [0], [0], [1], [0, 0, 1, 1], [], []>} : vector<32x32xbf16>, vector<32x16xbf16>, vector<32x16xf32> -> vector<32x16xf32>
    %c0_437 = arith.constant 0 : index
    %c0_438 = arith.constant 0 : index
    %834 = vector.load %arg24[%c0_437, %c0_438] : memref<1x16xf32, #tpu.memory_space<vmem>>, vector<1x16xf32>
    %835 = vector.broadcast %834 : vector<1x16xf32> to vector<32x16xf32>
    %836 = arith.addf %833, %835 : vector<32x16xf32>
    %837 = arith.addf %836, %1 : vector<32x16xf32>
    %c0_439 = arith.constant 0 : index
    %c0_440 = arith.constant 0 : index
    %c0_441 = arith.constant 0 : index
    %838 = vector.load %arg25[%c0_439, %c0_440, %c0_441] : memref<1x32x16xf32, #tpu.memory_space<vmem>>, vector<1x32x16xf32>
    %839 = vector.shape_cast %838 : vector<1x32x16xf32> to vector<32x16xf32>
    %840 = vector.shape_cast %837 : vector<32x16xf32> to vector<1x32x16xf32>
    tpu.vector_store %arg25[%c0_439, %c0_440, %c0_441], %840 {strides = array<i32>} : memref<1x32x16xf32, #tpu.memory_space<vmem>>, vector<1x32x16xf32>,
    return
  }
  func.func @transform_0(%arg0: i32, %arg1: memref<6xf32, #tpu.memory_space<smem>>) -> (i32, i32, i32) {
    %c0_i32 = arith.constant 0 : i32
    %c0_i32_0 = arith.constant 0 : i32
    %c0_i32_1 = arith.constant 0 : i32
    return %arg0, %c0_i32, %c0_i32_0 : i32, i32, i32
  }
  func.func @transform_1(%arg0: i32, %arg1: memref<6xf32, #tpu.memory_space<smem>>) -> (i32, i32) {
    %c0_i32 = arith.constant 0 : i32
    %c0_i32_0 = arith.constant 0 : i32
    %c0_i32_1 = arith.constant 0 : i32
    return %c0_i32, %c0_i32_0 : i32, i32
  }
  func.func @transform_2(%arg0: i32, %arg1: memref<6xf32, #tpu.memory_space<smem>>) -> (i32, i32) {
    %c0_i32 = arith.constant 0 : i32
    %c0_i32_0 = arith.constant 0 : i32
    %c0_i32_1 = arith.constant 0 : i32
    return %c0_i32, %c0_i32_0 : i32, i32
  }
  func.func @transform_3(%arg0: i32, %arg1: memref<6xf32, #tpu.memory_space<smem>>) -> (i32, i32) {
    %c0_i32 = arith.constant 0 : i32
    %c0_i32_0 = arith.constant 0 : i32
    %c0_i32_1 = arith.constant 0 : i32
    return %c0_i32, %c0_i32_0 : i32, i32
  }
  func.func @transform_4(%arg0: i32, %arg1: memref<6xf32, #tpu.memory_space<smem>>) -> (i32, i32) {
    %c0_i32 = arith.constant 0 : i32
    %c0_i32_0 = arith.constant 0 : i32
    %c0_i32_1 = arith.constant 0 : i32
    return %c0_i32, %c0_i32_0 : i32, i32
  }
  func.func @transform_5(%arg0: i32, %arg1: memref<6xf32, #tpu.memory_space<smem>>) -> (i32, i32, i32) {
    %c0_i32 = arith.constant 0 : i32
    %c0_i32_0 = arith.constant 0 : i32
    %c0_i32_1 = arith.constant 0 : i32
    %c0_i32_2 = arith.constant 0 : i32
    return %c0_i32, %c0_i32_0, %c0_i32_1 : i32, i32, i32
  }
  func.func @transform_6(%arg0: i32, %arg1: memref<6xf32, #tpu.memory_space<smem>>) -> (i32, i32, i32) {
    %c0_i32 = arith.constant 0 : i32
    %c0_i32_0 = arith.constant 0 : i32
    %c0_i32_1 = arith.constant 0 : i32
    %c0_i32_2 = arith.constant 0 : i32
    return %c0_i32, %c0_i32_0, %c0_i32_1 : i32, i32, i32
  }
  func.func @transform_7(%arg0: i32, %arg1: memref<6xf32, #tpu.memory_space<smem>>) -> (i32, i32, i32) {
    %c0_i32 = arith.constant 0 : i32
    %c0_i32_0 = arith.constant 0 : i32
    %c0_i32_1 = arith.constant 0 : i32
    %c0_i32_2 = arith.constant 0 : i32
    return %c0_i32, %c0_i32_0, %c0_i32_1 : i32, i32, i32
  }
  func.func @transform_8(%arg0: i32, %arg1: memref<6xf32, #tpu.memory_space<smem>>) -> (i32, i32, i32) {
    %c0_i32 = arith.constant 0 : i32
    %c0_i32_0 = arith.constant 0 : i32
    %c0_i32_1 = arith.constant 0 : i32
    %c0_i32_2 = arith.constant 0 : i32
    return %c0_i32, %c0_i32_0, %c0_i32_1 : i32, i32, i32
  }
  func.func @transform_9(%arg0: i32, %arg1: memref<6xf32, #tpu.memory_space<smem>>) -> (i32, i32, i32) {
    %c0_i32 = arith.constant 0 : i32
    %c0_i32_0 = arith.constant 0 : i32
    %c0_i32_1 = arith.constant 0 : i32
    %c0_i32_2 = arith.constant 0 : i32
    return %c0_i32, %c0_i32_0, %c0_i32_1 : i32, i32, i32
  }
  func.func @transform_10(%arg0: i32, %arg1: memref<6xf32, #tpu.memory_space<smem>>) -> (i32, i32, i32) {
    %c0_i32 = arith.constant 0 : i32
    %c0_i32_0 = arith.constant 0 : i32
    %c0_i32_1 = arith.constant 0 : i32
    %c0_i32_2 = arith.constant 0 : i32
    return %c0_i32, %c0_i32_0, %c0_i32_1 : i32, i32, i32
  }
  func.func @transform_11(%arg0: i32, %arg1: memref<6xf32, #tpu.memory_space<smem>>) -> (i32, i32, i32) {
    %c0_i32 = arith.constant 0 : i32
    %c0_i32_0 = arith.constant 0 : i32
    %c0_i32_1 = arith.constant 0 : i32
    %c0_i32_2 = arith.constant 0 : i32
    return %c0_i32, %c0_i32_0, %c0_i32_1 : i32, i32, i32
  }
  func.func @transform_12(%arg0: i32, %arg1: memref<6xf32, #tpu.memory_space<smem>>) -> (i32, i32, i32) {
    %c0_i32 = arith.constant 0 : i32
    %c0_i32_0 = arith.constant 0 : i32
    %c0_i32_1 = arith.constant 0 : i32
    %c0_i32_2 = arith.constant 0 : i32
    return %c0_i32, %c0_i32_0, %c0_i32_1 : i32, i32, i32
  }
  func.func @transform_13(%arg0: i32, %arg1: memref<6xf32, #tpu.memory_space<smem>>) -> (i32, i32) {
    %c0_i32 = arith.constant 0 : i32
    %c0_i32_0 = arith.constant 0 : i32
    %c0_i32_1 = arith.constant 0 : i32
    return %c0_i32, %c0_i32_0 : i32, i32
  }
  func.func @transform_14(%arg0: i32, %arg1: memref<6xf32, #tpu.memory_space<smem>>) -> (i32, i32, i32) {
    %c0_i32 = arith.constant 0 : i32
    %c0_i32_0 = arith.constant 0 : i32
    %c0_i32_1 = arith.constant 0 : i32
    %c0_i32_2 = arith.constant 0 : i32
    return %c0_i32, %c0_i32_0, %c0_i32_1 : i32, i32, i32
  }
  func.func @transform_15(%arg0: i32, %arg1: memref<6xf32, #tpu.memory_space<smem>>) -> (i32, i32, i32) {
    %c0_i32 = arith.constant 0 : i32
    %c0_i32_0 = arith.constant 0 : i32
    %c0_i32_1 = arith.constant 0 : i32
    %c0_i32_2 = arith.constant 0 : i32
    return %c0_i32, %c0_i32_0, %c0_i32_1 : i32, i32, i32
  }
  func.func @transform_16(%arg0: i32, %arg1: memref<6xf32, #tpu.memory_space<smem>>) -> (i32, i32, i32) {
    %c0_i32 = arith.constant 0 : i32
    %c0_i32_0 = arith.constant 0 : i32
    %c0_i32_1 = arith.constant 0 : i32
    %c0_i32_2 = arith.constant 0 : i32
    return %c0_i32, %c0_i32_0, %c0_i32_1 : i32, i32, i32
  }
  func.func @transform_17(%arg0: i32, %arg1: memref<6xf32, #tpu.memory_space<smem>>) -> (i32, i32) {
    %c0_i32 = arith.constant 0 : i32
    %c0_i32_0 = arith.constant 0 : i32
    %c0_i32_1 = arith.constant 0 : i32
    return %c0_i32, %c0_i32_0 : i32, i32
  }
  func.func @transform_18(%arg0: i32, %arg1: memref<6xf32, #tpu.memory_space<smem>>) -> (i32, i32) {
    %c0_i32 = arith.constant 0 : i32
    %c0_i32_0 = arith.constant 0 : i32
    %c0_i32_1 = arith.constant 0 : i32
    return %c0_i32, %c0_i32_0 : i32, i32
  }
  func.func @transform_19(%arg0: i32, %arg1: memref<6xf32, #tpu.memory_space<smem>>) -> (i32, i32) {
    %c0_i32 = arith.constant 0 : i32
    %c0_i32_0 = arith.constant 0 : i32
    %c0_i32_1 = arith.constant 0 : i32
    return %c0_i32, %c0_i32_0 : i32, i32
  }
  func.func @transform_20(%arg0: i32, %arg1: memref<6xf32, #tpu.memory_space<smem>>) -> (i32, i32) {
    %c0_i32 = arith.constant 0 : i32
    %c0_i32_0 = arith.constant 0 : i32
    %c0_i32_1 = arith.constant 0 : i32
    return %c0_i32, %c0_i32_0 : i32, i32
  }
  func.func @transform_21(%arg0: i32, %arg1: memref<6xf32, #tpu.memory_space<smem>>) -> (i32, i32) {
    %c0_i32 = arith.constant 0 : i32
    %c0_i32_0 = arith.constant 0 : i32
    %c0_i32_1 = arith.constant 0 : i32
    return %c0_i32, %c0_i32_0 : i32, i32
  }
  func.func @transform_22(%arg0: i32, %arg1: memref<6xf32, #tpu.memory_space<smem>>) -> (i32, i32) {
    %c0_i32 = arith.constant 0 : i32
    %c0_i32_0 = arith.constant 0 : i32
    %c0_i32_1 = arith.constant 0 : i32
    return %c0_i32, %c0_i32_0 : i32, i32
  }
  func.func @transform_23(%arg0: i32, %arg1: memref<6xf32, #tpu.memory_space<smem>>) -> (i32, i32, i32) {
    %c0_i32 = arith.constant 0 : i32
    %c0_i32_0 = arith.constant 0 : i32
    %c0_i32_1 = arith.constant 0 : i32
    return %arg0, %c0_i32, %c0_i32_0 : i32, i32, i32
  }
}

</mosaic_0001>

<bundles_post_ra>
// kernel: general_subnetwork.1
= control target key start
LH: loop header
LB: loop body
LE: loop exit
PB: predicated region body
PF: predicated region fallthrough
CT: control target
= control target key end

     0   :  { %s3046_s28 = smov [#allocation6]   ;;  %s3799_s0 = inlined_call_operand.vmem [shape: f32[6], index: 0, kind: input, shape index: {}]   ;;  %s3800_s1 = inlined_call_operand.vmem [shape: f32[2,32,16], index: 1, kind: input, shape index: {}]   ;;  %s3801_s2 = inlined_call_operand.vmem [shape: bf16[16,32], index: 2, kind: input, shape index: {}]   ;;  %s3802_s3 = inlined_call_operand.vmem [shape: f32[1,32], index: 3, kind: input, shape index: {}]   ;;  %s3803_s4 = inlined_call_operand.vmem [shape: f32[1,32], index: 4, kind: input, shape index: {}]   ;;  %s3804_s5 = inlined_call_operand.vmem [shape: f32[1,32], index: 5, kind: input, shape index: {}]   ;;  %s3805_s6 = inlined_call_operand.vmem [shape: f32[4,5,32], index: 6, kind: input, shape index: {}]   ;;  %s3806_s7 = inlined_call_operand.vmem [shape: f32[4,1,32], index: 7, kind: input, shape index: {}]   ;;  %s3807_s8 = inlined_call_operand.vmem [shape: f32[4,1,32], index: 8, kind: input, shape index: {}]   ;;  %s3808_s9 = inlined_call_operand.vmem [shape: f32[4,1,32], index: 9, kind: input, shape index: {}]   ;;  %s3809_s10 = inlined_call_operand.vmem [shape: f32[3,5,32], index: 10, kind: input, shape index: {}]   ;;  %s3810_s11 = inlined_call_operand.vmem [shape: f32[3,1,32], index: 11, kind: input, shape index: {}]   ;;  %s3811_s12 = inlined_call_operand.vmem [shape: f32[3,1,32], index: 12, kind: input, shape index: {}]   ;;  %s3812_s13 = inlined_call_operand.vmem [shape: f32[3,1,32], index: 13, kind: input, shape index: {}]   ;;  %s3813_s14 = inlined_call_operand.vmem [shape: bf16[320,32], index: 14, kind: input, shape index: {}]   ;;  %s3814_s15 = inlined_call_operand.vmem [shape: f32[4,1,32], index: 15, kind: input, shape index: {}]   ;;  %s3815_s16 = inlined_call_operand.vmem [shape: f32[4,1,32], index: 16, kind: input, shape index: {}]   ;;  %s3816_s17 = inlined_call_operand.vmem [shape: f32[4,1,32], index: 17, kind: input, shape index: {}]   ;;  %s3817_s18 = inlined_call_operand.vmem [shape: bf16[128,32], index: 18, kind: input, shape index: {}]   ;;  %s3818_s19 = inlined_call_operand.vmem [shape: f32[1,32], index: 19, kind: input, shape index: {}]   ;;  %s3819_s20 = inlined_call_operand.vmem [shape: f32[1,32], index: 20, kind: input, shape index: {}]   ;;  %s3820_s21 = inlined_call_operand.vmem [shape: f32[1,32], index: 21, kind: input, shape index: {}]   ;;  %s3821_s22 = inlined_call_operand.vmem [shape: bf16[32,16], index: 22, kind: input, shape index: {}]   ;;  %s3822_s23 = inlined_call_operand.vmem [shape: f32[1,16], index: 23, kind: input, shape index: {}]   ;;  %s3823_s24 = inlined_call_operand.vmem [shape: f32[2,32,16], index: 24, kind: output, shape index: {}]  }
   0x1   :  { %3828 = sst [smem:[#allocation8_spill]] %s3799_s0 }
   0x2   :  { %3829 = sst [smem:[#allocation9_spill]] %s3800_s1 }
   0x3   :  { %3830 = sst [smem:[#allocation10_spill]] %s3801_s2 }
   0x4   :  { %3831 = sst [smem:[#allocation11_spill]] %s3802_s3 }
   0x5   :  { %3832 = sst [smem:[#allocation12_spill]] %s3803_s4 }
   0x6   :  { %3833 = sst [smem:[#allocation13_spill]] %s3804_s5 }
   0x7   :  { %3834 = sst [smem:[#allocation14_spill]] %s3805_s6 }
   0x8   :  { %3835 = sst [smem:[#allocation15_spill]] %s3806_s7 }
   0x9   :  { %3836 = sst [smem:[#allocation16_spill]] %s3807_s8 }
   0xa   :  { %3837 = sst [smem:[#allocation17_spill]] %s3816_s17 }
   0xb   :  { %s3838_s27 = sld [smem:[#allocation8_spill]] }
  0x11   :  { %s30_s17 = sshll.u32 %s3838_s27, 4  ;;  %s31_s17 = int_to_ptr.vmem [resolvable:$true] %s30_s17 }
  0x12   :  { %33 = dma.vmem_to_smem %s31_s17, 16, %s3046_s28, [#allocation5] }
  0x13   :  { %3040 = dma.done.wait [#allocation5], 16 }
  0x14   :  { %3041 = vsyncadd [#allocation5], 4294967280 }
  0x15   :  { %36 = sfence }
  0x16   :  { %s3180_s6 = smov 0  }
  0x17 LB: > { %s2658_s2 = sadd.s32 4294967295, %s3044_s6   ;;  %p2662_p0 = scmp.ge.s32.totalorder %s3044_s6, 1  ;;  %s3044_s6 = sphi %s3180_s6, %s42_s6  }
  0x18   : > { %p646_p1 = scmp.lt.s32.totalorder %s3044_s6, 3 }
  0x1a   : > { %p647_p2 = pnand %p2662_p0, %p646_p1 }
  0x1b   : > { %s3839_s0 = sld [smem:[#allocation10_spill]] (!%p647_p2)  ;;  %p710_p3 = scmp.lt.s32.totalorder (!%p647_p2), %s2658_s2, 1 }
  0x1c   : > { %650 = sbr.rel (%p647_p2) target bundleno = 2308 (0x904), region = 112  ;;  %s3840_s25 = sld [smem:[#allocation9_spill]] (!%p647_p2) }
  0x1d   : > { %s3841_s5 = sld [smem:[#allocation11_spill]] (!%p647_p2) }
  0x1e   : > { %s851_s28 = sld [smem:[#allocation6]] (!%p647_p2) }
  0x1f   : > { %s3847_s3 = sld [smem:[#allocation17_spill]] (!%p647_p2) }
  0x20   : > { %s2743_s30 = sld [smem:[#allocation6 + $0x2]] (!%p647_p2) }
  0x21   : > { %v2849_v0 = vld [vmem:[%s3839_s0] sm:$0xff]  ;;  %s3849_s2 = smov (!%p710_p3, %s2658_s2), 1  ;;  %vm739_vm0 = vcmask 130048   ;;  %vm767_vm1 = vcmask 261120   ;;  %v3047_v48 = vmov 1024.0   ;;  %vm865_vm3 = vcmask 254976  }
  0x22   : > { %753 = vmatpush.bf16.msra.mxu0 %v2849_v0  ;;  %s2847_s7 = sshll.u32 %s3849_s2, 5  ;;  %2986 = vrcp.f32 %v3047_v48  ;;  %v3048_v61 = vmov 0.0   ;;  %s3842_s0 = sld [smem:[#allocation12_spill]] }
  0x23   : > { %s3199_s8 = scalar_lea.vmem %s3840_s25, %s2847_s7  ;;  %v2946_v9 = vld [vmem:[%s3841_s5] ss:$0 sm:$0xff]  ;;  %866 = vst.msk [vmem:[#allocation2] sm:$0x3] %vm865_vm3, %v3048_v61  ;;  %s3843_s25 = sld [smem:[#allocation13_spill]] }
  0x24   : > { %v721_v1 = vld [vmem:[%s3199_s8] sm:$0xff]  ;;  %v722_v2 = vld [vmem:[%s3199_s8 + $0x8] sm:$0xff]  ;;  %v723_v4 = vld [vmem:[%s3199_s8 + $0x10] sm:$0xff]  ;;  %871 = vst.msk [vmem:[#allocation2 + $0x22] sm:$0x3] %vm865_vm3, %v3048_v61  ;;  %s3844_s5 = sld [smem:[#allocation14_spill]] }
  0x25   : > { %v725_v3 = vpack.c.bf16 %v722_v2, %v721_v1  ;;  %v724_v5 = vld [vmem:[%s3199_s8 + $0x18] sm:$0xff] }
  0x26   : > { %v726_v6 = vpack.c.bf16 %v724_v5, %v723_v4 }
  0x27   : > { %2671 = vmatmul.msk.bf16.vlgmr.msra.gmra.mxu0 %vm739_vm0, %v725_v3 }
  0x28   : > { %v2987_v49 = vpop.eup %2986 }
  0x29   : > { %v807_v50 = vmul.f32 1024.0, %v2987_v49  ;;  %vm811_vm2 = vweird.f32 %v2987_v49 }
  0x2b   : > { %v808_v51 = vsub.f32 1.0, %v807_v50 }
  0x2d   : > { %v809_v52 = vmul.f32 %v2987_v49, %v808_v51 }
  0x2f   : > { %v810_v53 = vadd.f32 %v2987_v49, %v809_v52 }
  0x31   : > { %v3238_v55 = vsel %vm811_vm2, %v2987_v49, %v810_v53 }
  0x37   : > { %2672 = vmatmul.msk.bf16.gmra.mxu0 %vm739_vm0, %v726_v6 }
  0xa4   : > { %v755_v7 = vpop.f32.mrf.mxu0 }
  0xa5   : > { %v3212_v12 = vadd.f32 %v2946_v9, %v755_v7 }
  0xa7   : > { %v768_v15 = vsel %vm767_vm1, %v3212_v12, 0.0  ;;  %v785_v22 = vmul.f32 %v3212_v12, %v3212_v12 }
  0xa9   : > { %v789_v28 = vsel %vm767_vm1, %v785_v22, 0.0 }
  0xac   : > { %v757_v8 = vpop.f32.mrf.mxu0 }
  0xad   : > { %v3210_v11 = vadd.f32 %v2946_v9, %v757_v8  ;;  %v2947_v8 = vld [vmem:[%s3842_s0] ss:$0 sm:$0xff] }
  0xaf   : > { %v769_v14 = vsel %vm767_vm1, %v3210_v11, 0.0  ;;  %v786_v19 = vmul.f32 %v3210_v11, %v3210_v11 }
  0xb0   : > { %v770_v18 = vadd.f32 %v769_v14, %v768_v15 }
  0xb1   : > { %v790_v27 = vsel %vm767_vm1, %v786_v19, 0.0 }
  0xb2   : > { %v791_v30 = vadd.f32 %v790_v27, %v789_v28 }
  0xb4   : > { %v760_v10 = vpop.f32.mrf.mxu0 }
  0xb5   : > { %v3214_v13 = vadd.f32 %v2946_v9, %v760_v10 }
  0xb7   : > { %v771_v16 = vsel %vm767_vm1, %v3214_v13, 0.0  ;;  %v787_v23 = vmul.f32 %v3214_v13, %v3214_v13 }
  0xb8   : > { %v772_v21 = vadd.f32 %v771_v16, %v770_v18 }
  0xb9   : > { %v792_v29 = vsel %vm767_vm1, %v787_v23, 0.0 }
  0xba   : > { %v793_v32 = vadd.f32 %v792_v29, %v791_v30 }
  0xbc   : > { %v762_v17 = vpop.f32.mrf.mxu0 }
  0xbd   : > { %v3224_v20 = vadd.f32 %v2946_v9, %v762_v17 }
  0xbf   : > { %v773_v24 = vsel %vm767_vm1, %v3224_v20, 0.0  ;;  %v788_v26 = vmul.f32 %v3224_v20, %v3224_v20 }
  0xc0   : > { %v774_v25 = vadd.f32 %v773_v24, %v772_v21  ;;  %v856_v21 = vstv %s851_s28  ;;  %s3845_s28 = sld [smem:[#allocation15_spill]] }
  0xc1   : > { %v794_v31 = vsel %vm767_vm1, %v788_v26, 0.0 }
  0xc2   : > { %775 = vadd.xlane.f32.xlu0 %v774_v25  ;;  %v795_v33 = vadd.f32 %v794_v31, %v793_v32 }
  0xca   : > { %796 = vadd.xlane.f32.xlu0 %v795_v33 }
 0x135   : > { %v776_v34 = vpop.xlane.xlu0 %775 }
 0x136   : > { %v777_v35 = vrot.slane %v776_v34, 4 }
 0x138   : > { %v778_v36 = vadd.f32 %v777_v35, %v776_v34  ;;  %v872_v34 = vld [vmem:[%s3844_s5] sm:$0x1f] }
 0x139   : > { %v877_v35 = vperm.slane %v872_v34, 0  ;;  %v929_v51 = vperm.slane %v872_v34, 4 }
 0x13a   : > { %v779_v37 = vrot.slane %v778_v36, 2 }
 0x13c   : > { %v780_v38 = vadd.f32 %v779_v37, %v778_v36  ;;  %v890_v36 = vperm.slane %v872_v34, 1  ;;  %v903_v37 = vperm.slane %v872_v34, 2 }
 0x13d   : > { %v797_v39 = vpop.xlane.xlu0 %796 }
 0x13e   : > { %v798_v40 = vrot.slane %v797_v39, 4  ;;  %v781_v41 = vrot.slane %v780_v38, 1 }
 0x140   : > { %v799_v42 = vadd.f32 %v798_v40, %v797_v39  ;;  %v782_v43 = vadd.f32 %v781_v41, %v780_v38 }
 0x142   : > { %v800_v44 = vrot.slane %v799_v42, 2  ;;  %2880 = vpush %v782_v43 }
 0x144   : > { %v801_v45 = vadd.f32 %v800_v44, %v799_v42 }
 0x146   : > { %v802_v46 = vrot.slane %v801_v45, 1 }
 0x148   : > { %v803_v47 = vadd.f32 %v802_v46, %v801_v45  ;;  %v916_v45 = vperm.slane %v872_v34, 3 }
 0x14a   : > { %2882 = vpush %v803_v47 }
 0x173   : > { %s2881_s26 = spop %2880 }
 0x174   : > { %v784_v54 = vstv %s2881_s26  ;;  %s3846_s26 = sld [smem:[#allocation16_spill]] }
 0x175   : > { %v813_v56 = vmul.f32 %v3238_v55, %v784_v54 }
 0x177   : > { %v815_v59 = vmul.f32 %v813_v56, %v813_v56  ;;  %v818_v4 = vsub.f32 %v3212_v12, %v813_v56  ;;  %v819_v5 = vsub.f32 %v3210_v11, %v813_v56  ;;  %v820_v6 = vsub.f32 %v3214_v13, %v813_v56  ;;  %v2948_v11 = vld [vmem:[%s3843_s25] ss:$0 sm:$0xff] }
 0x178   : > { %v821_v7 = vsub.f32 %v3224_v20, %v813_v56 }
 0x179   : > { %v825_v14 = vmul.f32 %v2947_v8, %v818_v4  ;;  %v826_v15 = vmul.f32 %v2947_v8, %v819_v5  ;;  %v827_v16 = vmul.f32 %v2947_v8, %v820_v6 }
 0x17a   : > { %v828_v17 = vmul.f32 %v2947_v8, %v821_v7 }
 0x17b   : > { %s2883_s27 = spop %2882 }
 0x17c   : > { %v805_v57 = vstv %s2883_s27 }
 0x17d   : > { %v814_v58 = vmul.f32 %v3238_v55, %v805_v57 }
 0x17f   : > { %v816_v60 = vsub.f32 %v814_v58, %v815_v59 }
 0x181   : > { %v817_v62 = vmax.f32 %v816_v60, 0.0 }
 0x183   : > { %v829_v63 = vadd.f32 1e-08, %v817_v62 }
 0x185   : > { %2988 = vrsqrt.f32 %v829_v63  ;;  %vm836_vm5 = vweird.f32 %v829_v63 }
 0x18b   : > { %v2989_v0 = vpop.eup %2988 }
 0x18c   : > { %v831_v1 = vmul.f32 %v2989_v0, %v829_v63  ;;  %vm837_vm4 = vweird.f32 %v2989_v0 }
 0x18d   : > { %vm838_vm6 = vmor %vm836_vm5, %vm837_vm4 }
 0x18e   : > { %v832_v2 = vmul.f32 %v2989_v0, %v831_v1 }
 0x190   : > { %v833_v3 = vmul.f32 0.5, %v832_v2 }
 0x192   : > { %v834_v9 = vsub.f32 1.5, %v833_v3 }
 0x194   : > { %v835_v10 = vmul.f32 %v2989_v0, %v834_v9 }
 0x196   : > { %v839_v12 = vsel %vm838_vm6, %v2989_v0, %v835_v10 }
 0x197   : > { %v840_v13 = vmul.f32 %v839_v12, %v825_v14  ;;  %v841_v18 = vmul.f32 %v839_v12, %v826_v15  ;;  %v842_v19 = vmul.f32 %v839_v12, %v827_v16  ;;  %v843_v20 = vmul.f32 %v839_v12, %v828_v17 }
 0x199   : > { %v847_v22 = vadd.f32 %v2948_v11, %v840_v13  ;;  %v848_v23 = vadd.f32 %v2948_v11, %v841_v18  ;;  %v849_v24 = vadd.f32 %v2948_v11, %v842_v19  ;;  %v850_v25 = vadd.f32 %v2948_v11, %v843_v20  ;;  %v2949_v18 = vld [vmem:[%s3845_s28] ss:$0 sm:$0xff] }
 0x19b   : > { %vm852_vm7 = vcmp.ge.f32.partialorder %v847_v22, 0.0  ;;  %vm853_vm8 = vcmp.ge.f32.partialorder %v848_v23, 0.0  ;;  %vm854_vm9 = vcmp.ge.f32.partialorder %v849_v24, 0.0  ;;  %vm855_vm10 = vcmp.ge.f32.partialorder %v850_v25, 0.0 }
 0x19c   : > { %v857_v26 = vmul.f32 %v856_v21, %v847_v22  ;;  %v858_v27 = vmul.f32 %v856_v21, %v848_v23  ;;  %v859_v28 = vmul.f32 %v856_v21, %v849_v24  ;;  %v860_v29 = vmul.f32 %v856_v21, %v850_v25 }
 0x19e   : > { %v861_v30 = vsel %vm852_vm7, %v847_v22, %v857_v26  ;;  %v862_v31 = vsel %vm853_vm8, %v848_v23, %v858_v27  ;;  %v863_v32 = vsel %vm854_vm9, %v849_v24, %v859_v28  ;;  %v864_v33 = vsel %vm855_vm10, %v850_v25, %v860_v29 }
 0x19f   : > { %867 = vst.msk [vmem:[#allocation2 + $0x2] sm:$0xff] %vm767_vm1, %v861_v30 }
 0x1a0   : > { %868 = vst.msk [vmem:[#allocation2 + $0xa] sm:$0xff] %vm767_vm1, %v862_v31 }
 0x1a1   : > { %869 = vst.msk [vmem:[#allocation2 + $0x12] sm:$0xff] %vm767_vm1, %v863_v32 }
 0x1a2   : > { %870 = vst.msk [vmem:[#allocation2 + $0x1a] sm:$0xff] %vm767_vm1, %v864_v33 }
 0x1a6   : > { %v873_v38 = vld [vmem:[#allocation2] sm:$0xff] }
 0x1a7   : > { %v886_v39 = vld [vmem:[#allocation2 + $0x1] sm:$0xff]  ;;  %v887_v42 = vld [vmem:[#allocation2 + $0x9] sm:$0xff]  ;;  %v878_v43 = vmul.f32 %v877_v35, %v873_v38 }
 0x1a8   : > { %v899_v40 = vld [vmem:[#allocation2 + $0x2] sm:$0xff]  ;;  %1026 = vst.msk [vmem:[#allocation2] sm:$0x3] %vm865_vm3, %v3048_v61  ;;  %v891_v44 = vmul.f32 %v890_v36, %v886_v39  ;;  %v875_v46 = vld [vmem:[#allocation2 + $0x10] sm:$0xff]  ;;  %v892_v50 = vmul.f32 %v890_v36, %v887_v42 }
 0x1a9   : > { %v874_v41 = vld [vmem:[#allocation2 + $0x8] sm:$0xff]  ;;  %v888_v47 = vld [vmem:[#allocation2 + $0x11] sm:$0xff]  ;;  %v889_v53 = vld [vmem:[#allocation2 + $0x19] sm:$0xff]  ;;  %v880_v54 = vmul.f32 %v877_v35, %v875_v46  ;;  %v904_v58 = vmul.f32 %v903_v37, %v899_v40 }
 0x1aa   : > { %v912_v48 = vld [vmem:[#allocation2 + $0x3] sm:$0xff]  ;;  %v879_v49 = vmul.f32 %v877_v35, %v874_v41  ;;  %v876_v52 = vld [vmem:[#allocation2 + $0x18] sm:$0xff]  ;;  %v893_v56 = vmul.f32 %v890_v36, %v888_v47  ;;  %v895_v57 = vadd.f32 %v891_v44, %v878_v43  ;;  %v913_v59 = vld [vmem:[#allocation2 + $0xb] sm:$0xff]  ;;  %v894_v0 = vmul.f32 %v890_v36, %v889_v53 }
 0x1ab   : > { %v914_v60 = vld [vmem:[#allocation2 + $0x13] sm:$0xff]  ;;  %v925_v62 = vld [vmem:[#allocation2 + $0x4] sm:$0xff]  ;;  %v881_v63 = vmul.f32 %v877_v35, %v876_v52  ;;  %v915_v2 = vld [vmem:[#allocation2 + $0x1b] sm:$0xff]  ;;  %v917_v7 = vmul.f32 %v916_v45, %v912_v48  ;;  %v918_v20 = vmul.f32 %v916_v45, %v913_v59 }
 0x1ac   : > { %v896_v1 = vadd.f32 %v892_v50, %v879_v49  ;;  %v928_v3 = vld [vmem:[#allocation2 + $0x1c] sm:$0xff]  ;;  %v897_v4 = vadd.f32 %v893_v56, %v880_v54  ;;  %v900_v5 = vld [vmem:[#allocation2 + $0xa] sm:$0xff]  ;;  %v908_v6 = vadd.f32 %v904_v58, %v895_v57  ;;  %v901_v9 = vld [vmem:[#allocation2 + $0x12] sm:$0xff]  ;;  %v930_v13 = vmul.f32 %v929_v51, %v925_v62 }
 0x1ad   : > { %1031 = vst.msk [vmem:[#allocation2 + $0x22] sm:$0x3] %vm865_vm3, %v3048_v61  ;;  %v898_v8 = vadd.f32 %v894_v0, %v881_v63  ;;  %v902_v10 = vld [vmem:[#allocation2 + $0x1a] sm:$0xff]  ;;  %v905_v14 = vmul.f32 %v903_v37, %v900_v5  ;;  %v926_v15 = vld [vmem:[#allocation2 + $0xc] sm:$0xff]  ;;  %v906_v17 = vmul.f32 %v903_v37, %v901_v9  ;;  %v919_v21 = vmul.f32 %v916_v45, %v914_v60 }
 0x1ae   : > { %v927_v16 = vld [vmem:[#allocation2 + $0x14] sm:$0xff]  ;;  %v907_v11 = vmul.f32 %v903_v37, %v902_v10  ;;  %v921_v12 = vadd.f32 %v917_v7, %v908_v6  ;;  %v920_v24 = vmul.f32 %v916_v45, %v915_v2  ;;  %v931_v27 = vmul.f32 %v929_v51, %v926_v15  ;;  %v2851_v9 = vld [vmem:[%s3813_s14 + $0x8] sm:$0xff] }
 0x1af   : > { %v909_v19 = vadd.f32 %v905_v14, %v896_v1  ;;  %v910_v22 = vadd.f32 %v906_v17, %v897_v4  ;;  %v932_v28 = vmul.f32 %v929_v51, %v927_v16  ;;  %v933_v31 = vmul.f32 %v929_v51, %v928_v3  ;;  %1678 = vmatpush.bf16.msra.mxu2 %v2851_v9  ;;  %v2850_v14 = vld [vmem:[%s3813_s14] sm:$0xff] }
 0x1b0   : > { %v911_v23 = vadd.f32 %v907_v11, %v898_v8  ;;  %v934_v25 = vadd.f32 %v930_v13, %v921_v12 }
 0x1b1   : > { %v922_v26 = vadd.f32 %v918_v20, %v909_v19  ;;  %v923_v29 = vadd.f32 %v919_v21, %v910_v22 }
 0x1b2   : > { %v924_v30 = vadd.f32 %v920_v24, %v911_v23  ;;  %v3270_v32 = vadd.f32 %v2949_v18, %v934_v25  ;;  %v2950_v25 = vld [vmem:[%s3846_s26] ss:$0 sm:$0xff] }
 0x1b3   : > { %v935_v33 = vadd.f32 %v931_v27, %v922_v26  ;;  %v936_v34 = vadd.f32 %v932_v28, %v923_v29  ;;  %1679 = vmatpush.bf16.msra.mxu2 %v2850_v14 }
 0x1b4   : > { %v937_v35 = vadd.f32 %v933_v31, %v924_v30  ;;  %v948_v37 = vsel %vm767_vm1, %v3270_v32, 0.0  ;;  %v965_v38 = vmul.f32 %v3270_v32, %v3270_v32 }
 0x1b5   : > { %v3272_v36 = vadd.f32 %v2949_v18, %v935_v33  ;;  %v3278_v39 = vadd.f32 %v2949_v18, %v936_v34 }
 0x1b6   : > { %v3280_v40 = vadd.f32 %v2949_v18, %v937_v35  ;;  %v969_v45 = vsel %vm767_vm1, %v965_v38, 0.0 }
 0x1b7   : > { %v949_v41 = vsel %vm767_vm1, %v3272_v36, 0.0  ;;  %v966_v42 = vmul.f32 %v3272_v36, %v3272_v36  ;;  %v951_v44 = vsel %vm767_vm1, %v3278_v39, 0.0  ;;  %v967_v49 = vmul.f32 %v3278_v39, %v3278_v39 }
 0x1b8   : > { %v950_v43 = vadd.f32 %v949_v41, %v948_v37  ;;  %v953_v48 = vsel %vm767_vm1, %v3280_v40, 0.0  ;;  %v968_v52 = vmul.f32 %v3280_v40, %v3280_v40 }
 0x1b9   : > { %v970_v46 = vsel %vm767_vm1, %v966_v42, 0.0  ;;  %v972_v53 = vsel %vm767_vm1, %v967_v49, 0.0 }
 0x1ba   : > { %v952_v47 = vadd.f32 %v951_v44, %v950_v43  ;;  %v971_v51 = vadd.f32 %v970_v46, %v969_v45  ;;  %v974_v56 = vsel %vm767_vm1, %v968_v52, 0.0 }
 0x1bc   : > { %v954_v50 = vadd.f32 %v953_v48, %v952_v47  ;;  %v973_v54 = vadd.f32 %v972_v53, %v971_v51  ;;  %v3325_v47 = vld [vmem:[%s3809_s10] sm:$0x1f]  ;;  %v3330_v48 = vld [vmem:[%s3844_s5 + $0x8] sm:$0x1f] }
 0x1bd   : > { %v1163_v53 = vperm.slane %v3325_v47, 0 }
 0x1be   : > { %955 = vadd.xlane.f32.xlu1 %v954_v50  ;;  %v975_v57 = vadd.f32 %v974_v56, %v973_v54  ;;  %v1053_v54 = vperm.slane %v3330_v48, 0  ;;  %v1168_v56 = vperm.slane %v3325_v47, 1 }
 0x1c6   : > { %976 = vadd.xlane.f32.xlu1 %v975_v57  ;;  %v1060_v57 = vperm.slane %v3330_v48, 1 }
 0x231   : > { %v956_v58 = vpop.xlane.xlu1 %955 }
 0x232   : > { %v957_v59 = vrot.slane %v956_v58, 4 }
 0x234   : > { %v958_v60 = vadd.f32 %v957_v59, %v956_v58 }
 0x236   : > { %v959_v62 = vrot.slane %v958_v60, 2 }
 0x238   : > { %v960_v63 = vadd.f32 %v959_v62, %v958_v60  ;;  %v1173_v60 = vperm.slane %v3325_v47, 2 }
 0x239   : > { %v977_v0 = vpop.xlane.xlu1 %976 }
 0x23a   : > { %v978_v1 = vrot.slane %v977_v0, 4  ;;  %v961_v2 = vrot.slane %v960_v63, 1 }
 0x23c   : > { %v979_v3 = vadd.f32 %v978_v1, %v977_v0  ;;  %v962_v4 = vadd.f32 %v961_v2, %v960_v63  ;;  %v1178_v2 = vperm.slane %v3325_v47, 3 }
 0x23e   : > { %v980_v5 = vrot.slane %v979_v3, 2  ;;  %2884 = vpush %v962_v4 }
 0x240   : > { %v981_v6 = vadd.f32 %v980_v5, %v979_v3 }
 0x242   : > { %v982_v7 = vrot.slane %v981_v6, 1 }
 0x244   : > { %v983_v8 = vadd.f32 %v982_v7, %v981_v6  ;;  %v1183_v6 = vperm.slane %v3325_v47, 4  ;;  %v1067_v7 = vperm.slane %v3330_v48, 2 }
 0x246   : > { %2886 = vpush %v983_v8 }
 0x26f   : > { %s2885_s29 = spop %2884 }
 0x270   : > { %v964_v10 = vstv %s2885_s29 }
 0x271   : > { %v986_v15 = vmul.f32 %v964_v10, %v3238_v55 }
 0x273   : > { %v988_v11 = vmul.f32 %v986_v15, %v986_v15  ;;  %v991_v23 = vsub.f32 %v3270_v32, %v986_v15  ;;  %v992_v24 = vsub.f32 %v3272_v36, %v986_v15  ;;  %v993_v26 = vsub.f32 %v3278_v39, %v986_v15  ;;  %v2951_v32 = vld [vmem:[%s3808_s9] ss:$0 sm:$0xff] }
 0x274   : > { %v994_v27 = vsub.f32 %v3280_v40, %v986_v15 }
 0x275   : > { %v998_v30 = vmul.f32 %v2950_v25, %v991_v23  ;;  %v999_v31 = vmul.f32 %v2950_v25, %v992_v24  ;;  %v1000_v33 = vmul.f32 %v2950_v25, %v993_v26  ;;  %v1081_v26 = vperm.slane %v3330_v48, 4 }
 0x276   : > { %v1001_v34 = vmul.f32 %v2950_v25, %v994_v27 }
 0x277   : > { %s2887_s25 = spop %2886 }
 0x278   : > { %v985_v16 = vstv %s2887_s25 }
 0x279   : > { %v987_v17 = vmul.f32 %v985_v16, %v3238_v55 }
 0x27b   : > { %v989_v12 = vsub.f32 %v987_v17, %v988_v11 }
 0x27d   : > { %v990_v13 = vmax.f32 %v989_v12, 0.0 }
 0x27f   : > { %v1002_v18 = vadd.f32 1e-08, %v990_v13  ;;  %v1074_v13 = vperm.slane %v3330_v48, 3 }
 0x281   : > { %2990 = vrsqrt.f32 %v1002_v18  ;;  %vm1009_vm12 = vweird.f32 %v1002_v18 }
 0x287   : > { %v2991_v19 = vpop.eup %2990 }
 0x288   : > { %v1004_v20 = vmul.f32 %v2991_v19, %v1002_v18  ;;  %vm1010_vm11 = vweird.f32 %v2991_v19 }
 0x289   : > { %vm1011_vm13 = vmor %vm1009_vm12, %vm1010_vm11 }
 0x28a   : > { %v1005_v21 = vmul.f32 %v2991_v19, %v1004_v20 }
 0x28c   : > { %v1006_v22 = vmul.f32 0.5, %v1005_v21 }
 0x28e   : > { %v1007_v28 = vsub.f32 1.5, %v1006_v22 }
 0x290   : > { %v1008_v29 = vmul.f32 %v2991_v19, %v1007_v28 }
 0x292   : > { %v1012_v35 = vsel %vm1011_vm13, %v2991_v19, %v1008_v29 }
 0x293   : > { %v1013_v36 = vmul.f32 %v1012_v35, %v998_v30  ;;  %v1014_v37 = vmul.f32 %v1012_v35, %v999_v31  ;;  %v1015_v38 = vmul.f32 %v1012_v35, %v1000_v33  ;;  %v1016_v39 = vmul.f32 %v1012_v35, %v1001_v34  ;;  %v2952_v30 = vld [vmem:[%s3810_s11] ss:$0 sm:$0xff] }
 0x295   : > { %v1020_v41 = vadd.f32 %v2951_v32, %v1013_v36  ;;  %v1021_v40 = vadd.f32 %v2951_v32, %v1014_v37  ;;  %v1022_v42 = vadd.f32 %v2951_v32, %v1015_v38  ;;  %v1023_v43 = vadd.f32 %v2951_v32, %v1016_v39 }
 0x297   : > { %v1024_v44 = vpack.c.bf16 %v1021_v40, %v1020_v41  ;;  %1027 = vst.msk [vmem:[#allocation2 + $0x2] sm:$0xff] %vm767_vm1, %v1020_v41  ;;  %v1025_v58 = vpack.c.bf16 %v1023_v43, %v1022_v42 }
 0x298   : > { %1028 = vst.msk [vmem:[#allocation2 + $0xa] sm:$0xff] %vm767_vm1, %v1021_v40 }
 0x299   : > { %2710 = vmatmul.msk.bf16.vlgmr.msra.gmra.mxu2 %vm767_vm1, %v1024_v44  ;;  %1029 = vst.msk [vmem:[#allocation2 + $0x12] sm:$0xff] %vm767_vm1, %v1022_v42 }
 0x29a   : > { %1030 = vst.msk [vmem:[#allocation2 + $0x1a] sm:$0xff] %vm767_vm1, %v1023_v43  ;;  %v2953_v43 = vld [vmem:[%s3845_s28 + $0x1] ss:$0 sm:$0xff] }
 0x29f   : > { %v1032_v45 = vld [vmem:[#allocation2] ss:$2 sm:$0xff]  ;;  %v1041_v46 = vld [vmem:[#allocation2 + $0x1] ss:$2 sm:$0xff] }
 0x2a0   : > { %1037 = vst.msk [vmem:[#allocation3] sm:$0xff] %vm767_vm1, %v1032_v45 }
 0x2a1   : > { %1046 = vst.msk [vmem:[#allocation4] sm:$0xff] %vm767_vm1, %v1041_v46  ;;  %v1034_v49 = vld [vmem:[#allocation2 + $0x10] ss:$2 sm:$0xff]  ;;  %v1036_v50 = vld [vmem:[#allocation2 + $0x20] ss:$2 sm:$0x3] }
 0x2a2   : > { %1256 = vst.msk [vmem:[#allocation2] sm:$0x3] %vm865_vm3, %v3048_v61  ;;  %v1043_v51 = vld [vmem:[#allocation2 + $0x11] ss:$2 sm:$0xff] }
 0x2a3   : > { %1038 = vst.msk [vmem:[#allocation3 + $0x8] sm:$0xff] %vm767_vm1, %v1034_v49  ;;  %v1045_v52 = vld [vmem:[#allocation2 + $0x21] ss:$2 sm:$0x3] }
 0x2a4   : > { %1039 = vst.msk [vmem:[#allocation3 + $0x10] sm:$0x3] %vm865_vm3, %v1036_v50 }
 0x2a5   : > { %1047 = vst.msk [vmem:[#allocation4 + $0x8] sm:$0xff] %vm767_vm1, %v1043_v51 }
 0x2a6   : > { %1048 = vst.msk [vmem:[#allocation4 + $0x10] sm:$0x3] %vm865_vm3, %v1045_v52 }
 0x2a7   : > { %v1051_v59 = vld [vmem:[#allocation3] sm:$0xff]  ;;  %1259 = vst.msk [vmem:[#allocation2 + $0x12] sm:$0x3] %vm865_vm3, %v3048_v61 }
 0x2a8   : > { %v1058_v62 = vld [vmem:[#allocation4] sm:$0xff]  ;;  %v1164_v63 = vmul.f32 %v1163_v53, %v1051_v59  ;;  %v1054_v0 = vmul.f32 %v1053_v54, %v1051_v59 }
 0x2a9   : > { %2711 = vmatmul.msk.bf16.gmra.mxu2 %vm767_vm1, %v1025_v58  ;;  %v1169_v1 = vmul.f32 %v1168_v56, %v1058_v62  ;;  %v1061_v3 = vmul.f32 %v1060_v57, %v1058_v62 }
 0x2aa   : > { %v1052_v4 = vld [vmem:[#allocation3 + $0x8] sm:$0xff] }
 0x2ab   : > { %v1065_v5 = vld [vmem:[#allocation3 + $0x1] sm:$0xff]  ;;  %v1066_v8 = vld [vmem:[#allocation3 + $0x9] sm:$0xff]  ;;  %v1165_v10 = vmul.f32 %v1163_v53, %v1052_v4  ;;  %v1171_v14 = vadd.f32 %v1169_v1, %v1164_v63  ;;  %v1055_v11 = vmul.f32 %v1053_v54, %v1052_v4  ;;  %v1063_v12 = vadd.f32 %v1061_v3, %v1054_v0 }
 0x2ac   : > { %v1079_v9 = vld [vmem:[#allocation3 + $0x2] sm:$0xff]  ;;  %v1174_v15 = vmul.f32 %v1173_v60, %v1065_v5  ;;  %v1072_v17 = vld [vmem:[#allocation4 + $0x1] sm:$0xff]  ;;  %v1175_v23 = vmul.f32 %v1173_v60, %v1066_v8  ;;  %v1068_v25 = vmul.f32 %v1067_v7, %v1065_v5  ;;  %v1080_v27 = vld [vmem:[#allocation3 + $0xa] sm:$0xff]  ;;  %v1069_v32 = vmul.f32 %v1067_v7, %v1066_v8 }
 0x2ad   : > { %v1059_v16 = vld [vmem:[#allocation4 + $0x8] sm:$0xff]  ;;  %v1179_v21 = vmul.f32 %v1178_v2, %v1072_v17  ;;  %v1184_v24 = vmul.f32 %v1183_v6, %v1079_v9  ;;  %v1075_v35 = vmul.f32 %v1074_v13, %v1072_v17  ;;  %v1185_v41 = vmul.f32 %v1183_v6, %v1080_v27 }
 0x2ae   : > { %v1073_v18 = vld [vmem:[#allocation4 + $0x9] sm:$0xff]  ;;  %v1170_v19 = vmul.f32 %v1168_v56, %v1059_v16  ;;  %v1176_v20 = vadd.f32 %v1174_v15, %v1171_v14  ;;  %v1062_v22 = vmul.f32 %v1060_v57, %v1059_v16  ;;  %v1070_v34 = vadd.f32 %v1068_v25, %v1063_v12 }
 0x2af   : > { %v1180_v33 = vmul.f32 %v1178_v2, %v1073_v18  ;;  %v1076_v39 = vmul.f32 %v1074_v13, %v1073_v18  ;;  %v1082_v42 = vmul.f32 %v1081_v26, %v1079_v9  ;;  %v1083_v47 = vmul.f32 %v1081_v26, %v1080_v27 }
 0x2b0   : > { %v1172_v28 = vadd.f32 %v1170_v19, %v1165_v10  ;;  %v1181_v29 = vadd.f32 %v1179_v21, %v1176_v20  ;;  %v1064_v31 = vadd.f32 %v1062_v22, %v1055_v11  ;;  %v1077_v40 = vadd.f32 %v1075_v35, %v1070_v34 }
 0x2b2   : > { %v1177_v36 = vadd.f32 %v1175_v23, %v1172_v28  ;;  %v1186_v37 = vadd.f32 %v1184_v24, %v1181_v29  ;;  %v1071_v38 = vadd.f32 %v1069_v32, %v1064_v31  ;;  %v1084_v48 = vadd.f32 %v1082_v42, %v1077_v40  ;;  %v2853_v42 = vld [vmem:[%s3813_s14 + $0x18] sm:$0xff] }
 0x2b3   : > { %1638 = vmatpush.bf16.msra.mxu3 %v2853_v42 }
 0x2b4   : > { %v1182_v44 = vadd.f32 %v1180_v33, %v1177_v36  ;;  %v3358_v45 = vadd.f32 %v2952_v30, %v1186_v37  ;;  %v1078_v46 = vadd.f32 %v1076_v39, %v1071_v38  ;;  %v3362_v52 = vadd.f32 %v2953_v43, %v1084_v48  ;;  %v2854_v48 = vld [vmem:[%s3813_s14 + $0x20] sm:$0xff] }
 0x2b5   : > { %v3049_v36 = vmov 512.0  }
 0x2b6   : > { %v1187_v49 = vadd.f32 %v1185_v41, %v1182_v44  ;;  %v1085_v50 = vadd.f32 %v1083_v47, %v1078_v46  ;;  %v1209_v51 = vmul.f32 %v3358_v45, %v3358_v45  ;;  %v1196_v54 = vsel %vm767_vm1, %v3358_v45, 0.0  ;;  %v2852_v47 = vld [vmem:[%s3813_s14 + $0x10] sm:$0xff] }
 0x2b7   : > { %v1097_v57 = vsel %vm767_vm1, %v3362_v52, 0.0  ;;  %v1110_v2 = vmul.f32 %v3362_v52, %v3362_v52  ;;  %2992 = vrcp.f32 %v3049_v36  ;;  %1639 = vmatpush.bf16.msra.mxu3 %v2852_v47 }
 0x2b8   : > { %v3364_v53 = vadd.f32 %v2952_v30, %v1187_v49  ;;  %v3368_v56 = vadd.f32 %v2953_v43, %v1085_v50  ;;  %v1211_v62 = vsel %vm767_vm1, %v1209_v51, 0.0  ;;  %v2855_v43 = vld [vmem:[%s3813_s14 + $0x28] sm:$0xff] }
 0x2b9   : > { %v1112_v5 = vsel %vm767_vm1, %v1110_v2, 0.0  ;;  %1848 = vmatpush.bf16.msra.mxu1 %v2855_v43  ;;  %v2681_v43 = vld [vmem:[%s3809_s10 + $0x8] sm:$0x1f] }
 0x2ba   : > { %v1197_v58 = vsel %vm767_vm1, %v3364_v53, 0.0  ;;  %v1098_v59 = vsel %vm767_vm1, %v3368_v56, 0.0  ;;  %v1210_v60 = vmul.f32 %v3364_v53, %v3364_v53  ;;  %v1111_v3 = vmul.f32 %v3368_v56, %v3368_v56 }
 0x2bb   : > { %v1198_v63 = vadd.f32 %v1197_v58, %v1196_v54  ;;  %v1099_v0 = vadd.f32 %v1098_v59, %v1097_v57  ;;  %v1358_v47 = vperm.slane %v2681_v43, 0 }
 0x2bc   : > { %v1212_v1 = vsel %vm767_vm1, %v1210_v60, 0.0  ;;  %v1113_v6 = vsel %vm767_vm1, %v1111_v3, 0.0  ;;  %v2856_v3 = vld [vmem:[%s3813_s14 + $0x30] sm:$0xff] }
 0x2bd   : > { %1199 = vadd.xlane.f32.xlu0 %v1198_v63  ;;  %1100 = vadd.xlane.f32.xlu2 %v1099_v0  ;;  %v1213_v4 = vadd.f32 %v1212_v1, %v1211_v62  ;;  %v1114_v7 = vadd.f32 %v1113_v6, %v1112_v5  ;;  %v2993_v37 = vpop.eup %2992  ;;  %v2857_v0 = vld [vmem:[%s3813_s14 + $0x38] sm:$0xff] }
 0x2be   : > { %v1126_v38 = vmul.f32 512.0, %v2993_v37  ;;  %vm1130_vm14 = vweird.f32 %v2993_v37  ;;  %1849 = vmatpush.bf16.msra.mxu1 %v2854_v48  ;;  %1819 = vmatpush.bf16.msrb.mxu3 %v2857_v0  ;;  %v1367_v0 = vperm.slane %v2681_v43, 3 }
 0x2bf   : > { %1214 = vadd.xlane.f32.xlu1 %v1213_v4 }
 0x2c0   : > { %v1127_v39 = vsub.f32 1.0, %v1126_v38 }
 0x2c2   : > { %v1128_v41 = vmul.f32 %v2993_v37, %v1127_v39  ;;  %1820 = vmatpush.bf16.msrb.mxu3 %v2856_v3 }
 0x2c4   : > { %v1129_v40 = vadd.f32 %v2993_v37, %v1128_v41 }
 0x2c5   : > { %1115 = vadd.xlane.f32.xlu2 %v1114_v7 }
 0x2c6   : > { %v3392_v46 = vsel %vm1130_vm14, %v2993_v37, %v1129_v40  ;;  %vm1438_vm14 = vcmask 259072  }
 0x330   : > { %v1200_v8 = vpop.xlane.xlu0 %1199  ;;  %v1101_v9 = vpop.xlane.xlu2 %1100 }
 0x331   : > { %v1201_v10 = vrot.slane %v1200_v8, 4  ;;  %v1102_v14 = vrot.slane %v1101_v9, 4 }
 0x332   : > { %v1215_v15 = vpop.xlane.xlu1 %1214 }
 0x333   : > { %v1103_v16 = vadd.f32 %v1102_v14, %v1101_v9  ;;  %v1216_v17 = vrot.slane %v1215_v15, 4  ;;  %v1202_v11 = vadd.f32 %v1201_v10, %v1200_v8 }
 0x335   : > { %v1104_v12 = vrot.slane %v1103_v16, 2  ;;  %v1217_v13 = vadd.f32 %v1216_v17, %v1215_v15  ;;  %v1203_v19 = vrot.slane %v1202_v11, 2 }
 0x337   : > { %v1105_v18 = vadd.f32 %v1104_v12, %v1103_v16  ;;  %v1218_v21 = vrot.slane %v1217_v13, 2  ;;  %v1204_v26 = vadd.f32 %v1203_v19, %v1202_v11  ;;  %v2954_v11 = vld [vmem:[%s3846_s26 + $0x1] ss:$0 sm:$0xff] }
 0x338   : > { %v1116_v20 = vpop.xlane.xlu2 %1115 }
 0x339   : > { %v1117_v22 = vrot.slane %v1116_v20, 4  ;;  %v1106_v23 = vrot.slane %v1105_v18, 1  ;;  %v1219_v28 = vadd.f32 %v1218_v21, %v1217_v13  ;;  %v1205_v30 = vrot.slane %v1204_v26, 1  ;;  %v2955_v21 = vld [vmem:[%s3811_s12] ss:$0 sm:$0xff] }
 0x33b   : > { %v1118_v24 = vadd.f32 %v1117_v22, %v1116_v20  ;;  %v1107_v25 = vadd.f32 %v1106_v23, %v1105_v18  ;;  %v1220_v32 = vrot.slane %v1219_v28, 1  ;;  %v1206_v34 = vadd.f32 %v1205_v30, %v1204_v26 }
 0x33d   : > { %v1119_v27 = vrot.slane %v1118_v24, 2  ;;  %2888 = vpush %v1107_v25  ;;  %v1221_v35 = vadd.f32 %v1220_v32, %v1219_v28 }
 0x33f   : > { %v1120_v29 = vadd.f32 %v1119_v27, %v1118_v24  ;;  %v2956_v24 = vld [vmem:[%s3808_s9 + $0x1] ss:$0 sm:$0xff] }
 0x341   : > { %v1121_v31 = vrot.slane %v1120_v29, 1 }
 0x343   : > { %v1122_v33 = vadd.f32 %v1121_v31, %v1120_v29  ;;  %v2957_v29 = vld [vmem:[%s3812_s13] ss:$0 sm:$0xff] }
 0x345   : > { %2890 = vpush %v1122_v33 }
 0x346   : > { %2892 = vpush %v1206_v34 }
 0x347   : > { %2894 = vpush %v1221_v35 }
 0x36e   : > { %s2889_s29 = spop %2888 }
 0x36f   : > { %v1109_v44 = vstv %s2889_s29 }
 0x370   : > { %v1132_v49 = vmul.f32 %v3392_v46, %v1109_v44  ;;  %v2677_v44 = vld [vmem:[%s3844_s5 + $0x10] sm:$0x1f] }
 0x371   : > { %v1271_v48 = vperm.slane %v2677_v44, 0 }
 0x372   : > { %v1134_v54 = vmul.f32 %v1132_v49, %v1132_v49  ;;  %v1137_v16 = vsub.f32 %v3362_v52, %v1132_v49  ;;  %v1138_v17 = vsub.f32 %v3368_v56, %v1132_v49  ;;  %v1361_v49 = vperm.slane %v2681_v43, 1 }
 0x374   : > { %v1142_v22 = vmul.f32 %v2954_v11, %v1137_v16  ;;  %v1143_v56 = vmul.f32 %v2954_v11, %v1138_v17 }
 0x376   : > { %s2891_s17 = spop %2890 }
 0x377   : > { %v1124_v50 = vstv %s2891_s17  ;;  %s2893_s0 = spop %2892 }
 0x378   : > { %v1133_v51 = vmul.f32 %v3392_v46, %v1124_v50  ;;  %v1208_v57 = vstv %s2893_s0  ;;  %s2895_s29 = spop %2894  ;;  %v1275_v50 = vperm.slane %v2677_v44, 1 }
 0x379   : > { %v1224_v58 = vmul.f32 %v1208_v57, %v3392_v46  ;;  %v1223_v59 = vstv %s2895_s29  ;;  %v1364_v57 = vperm.slane %v2681_v43, 2 }
 0x37a   : > { %v1135_v60 = vsub.f32 %v1133_v51, %v1134_v54  ;;  %v1225_v62 = vmul.f32 %v1223_v59, %v3392_v46  ;;  %v1279_v59 = vperm.slane %v2677_v44, 2 }
 0x37b   : > { %v1226_v63 = vmul.f32 %v1224_v58, %v1224_v58  ;;  %v1229_v19 = vsub.f32 %v3358_v45, %v1224_v58  ;;  %v1230_v20 = vsub.f32 %v3364_v53, %v1224_v58 }
 0x37c   : > { %v1136_v1 = vmax.f32 %v1135_v60, 0.0 }
 0x37d   : > { %v1227_v2 = vsub.f32 %v1225_v62, %v1226_v63  ;;  %v1234_v53 = vmul.f32 %v2955_v21, %v1229_v19  ;;  %v1235_v28 = vmul.f32 %v2955_v21, %v1230_v20  ;;  %v2959_v19 = vld [vmem:[%s3845_s28 + $0x2] ss:$0 sm:$0xff] }
 0x37e   : > { %v1144_v4 = vadd.f32 1e-08, %v1136_v1 }
 0x37f   : > { %v1228_v5 = vmax.f32 %v1227_v2, 0.0  ;;  %v1283_v2 = vperm.slane %v2677_v44, 3 }
 0x380   : > { %2994 = vrsqrt.f32 %v1144_v4  ;;  %vm1151_vm2 = vweird.f32 %v1144_v4 }
 0x381   : > { %v1236_v6 = vadd.f32 1e-08, %v1228_v5  ;;  %v1287_v5 = vperm.slane %v2677_v44, 4 }
 0x383   : > { %2996 = vrsqrt.f32 %v1236_v6  ;;  %vm1243_vm6 = vweird.f32 %v1236_v6 }
 0x386   : > { %v2995_v7 = vpop.eup %2994 }
 0x387   : > { %v1146_v8 = vmul.f32 %v2995_v7, %v1144_v4  ;;  %vm1152_vm15 = vweird.f32 %v2995_v7  ;;  %v1370_v4 = vperm.slane %v2681_v43, 4 }
 0x388   : > { %vm1153_vm4 = vmor %vm1151_vm2, %vm1152_vm15  ;;  %vm1474_vm15 = vcmask 257024  }
 0x389   : > { %v2997_v9 = vpop.eup %2996  ;;  %v1147_v10 = vmul.f32 %v2995_v7, %v1146_v8 }
 0x38a   : > { %v1238_v14 = vmul.f32 %v2997_v9, %v1236_v6  ;;  %vm1244_vm5 = vweird.f32 %v2997_v9 }
 0x38b   : > { %v1148_v15 = vmul.f32 0.5, %v1147_v10  ;;  %vm1245_vm7 = vmor %vm1243_vm6, %vm1244_vm5 }
 0x38c   : > { %v1239_v12 = vmul.f32 %v2997_v9, %v1238_v14 }
 0x38d   : > { %v1149_v13 = vsub.f32 1.5, %v1148_v15 }
 0x38e   : > { %v1240_v18 = vmul.f32 0.5, %v1239_v12  ;;  %v2958_v12 = vld [vmem:[%s3810_s11 + $0x1] ss:$0 sm:$0xff] }
 0x38f   : > { %v1150_v52 = vmul.f32 %v2995_v7, %v1149_v13 }
 0x390   : > { %v1241_v23 = vsub.f32 1.5, %v1240_v18 }
 0x391   : > { %v1154_v25 = vsel %vm1153_vm4, %v2995_v7, %v1150_v52 }
 0x392   : > { %v1155_v26 = vmul.f32 %v1154_v25, %v1142_v22  ;;  %v1156_v45 = vmul.f32 %v1154_v25, %v1143_v56  ;;  %v1242_v27 = vmul.f32 %v2997_v9, %v1241_v23 }
 0x394   : > { %v1160_v30 = vadd.f32 %v2956_v24, %v1155_v26  ;;  %v1161_v31 = vadd.f32 %v2956_v24, %v1156_v45  ;;  %v1246_v32 = vsel %vm1245_vm7, %v2997_v9, %v1242_v27 }
 0x395   : > { %v1247_v33 = vmul.f32 %v1246_v32, %v1234_v53  ;;  %v1248_v34 = vmul.f32 %v1246_v32, %v1235_v28 }
 0x396   : > { %v1255_v35 = vpack.c.bf16 %v1161_v31, %v1160_v30  ;;  %1257 = vst.msk [vmem:[#allocation2 + $0x2] sm:$0xff] %vm767_vm1, %v1160_v30 }
 0x397   : > { %1258 = vst.msk [vmem:[#allocation2 + $0xa] sm:$0xff] %vm767_vm1, %v1161_v31  ;;  %v1252_v36 = vadd.f32 %v2957_v29, %v1247_v33  ;;  %v1253_v37 = vadd.f32 %v2957_v29, %v1248_v34 }
 0x398   : > { %2701 = vmatmul.msk.bf16.vlgmr.msra.gmra.mxu3 %vm767_vm1, %v1255_v35 }
 0x399   : > { %v1254_v38 = vpack.c.bf16 %v1253_v37, %v1252_v36 }
 0x39b   : > { %2730 = vmatmul.msk.bf16.vlgmr.msra.gmra.mxu1 %vm767_vm1, %v1254_v38 }
 0x39e   : > { %v1260_v39 = vld [vmem:[#allocation2] ss:$2 sm:$0xff]  ;;  %v1261_v41 = vld [vmem:[#allocation2 + $0x10] ss:$2 sm:$0x3] }
 0x39f   : > { %1262 = vst.msk [vmem:[#allocation3] sm:$0xff] %vm767_vm1, %v1260_v39  ;;  %v1264_v40 = vld [vmem:[#allocation2 + $0x1] ss:$2 sm:$0xff]  ;;  %v1265_v42 = vld [vmem:[#allocation2 + $0x11] ss:$2 sm:$0x3] }
 0x3a0   : > { %1263 = vst.msk [vmem:[#allocation3 + $0x8] sm:$0x3] %vm865_vm3, %v1261_v41 }
 0x3a1   : > { %1266 = vst.msk [vmem:[#allocation4] sm:$0xff] %vm767_vm1, %v1264_v40 }
 0x3a2   : > { %1267 = vst.msk [vmem:[#allocation4 + $0x8] sm:$0x3] %vm865_vm3, %v1265_v42 }
 0x3a3   : > { %1434 = vst.msk [vmem:[#allocation2] sm:$0x3] %vm865_vm3, %v3048_v61 }
 0x3a4   : > { %1436 = vst.msk [vmem:[#allocation2 + $0xa] sm:$0x3] %vm865_vm3, %v3048_v61 }
 0x3a6   : > { %v1270_v51 = vld [vmem:[#allocation3] sm:$0xff] }
 0x3a7   : > { %v1359_v54 = vmul.f32 %v1358_v47, %v1270_v51  ;;  %v1272_v58 = vmul.f32 %v1271_v48, %v1270_v51  ;;  %v1278_v62 = vld [vmem:[#allocation3 + $0x1] sm:$0xff] }
 0x3a8   : > { %2721 = vmatmul.msk.bf16.vlgmr.msrb.gmra.mxu3 %vm767_vm1, %v1255_v35  ;;  %v1274_v60 = vld [vmem:[#allocation4] sm:$0xff]  ;;  %v1365_v61 = vmul.f32 %v1364_v57, %v1278_v62  ;;  %v1280_v8 = vmul.f32 %v1279_v59, %v1278_v62  ;;  %v1286_v9 = vld [vmem:[#allocation3 + $0x2] sm:$0xff] }
 0x3a9   : > { %v1362_v63 = vmul.f32 %v1361_v49, %v1274_v60  ;;  %v1276_v1 = vmul.f32 %v1275_v50, %v1274_v60  ;;  %v1282_v3 = vld [vmem:[#allocation4 + $0x1] sm:$0xff]  ;;  %v1371_v11 = vmul.f32 %v1370_v4, %v1286_v9  ;;  %v1288_v18 = vmul.f32 %v1287_v5, %v1286_v9 }
 0x3aa   : > { %v1368_v14 = vmul.f32 %v1367_v0, %v1282_v3  ;;  %v1284_v16 = vmul.f32 %v1283_v2, %v1282_v3  ;;  %v2859_v5 = vld [vmem:[%s3813_s14 + $0x48] sm:$0xff] }
 0x3ab   : > { %v1363_v6 = vadd.f32 %v1362_v63, %v1359_v54  ;;  %v1277_v7 = vadd.f32 %v1276_v1, %v1272_v58  ;;  %v3050_v63 = vmov 256.0   ;;  %1881 = vmatpush.bf16.msra.mxu3 %v2859_v5 }
 0x3ac   : > { %2998 = vrcp.f32 %v3050_v63  ;;  %v2689_v63 = vld [vmem:[%s3809_s10 + $0x10] sm:$0x1f] }
 0x3ad   : > { %v1366_v10 = vadd.f32 %v1365_v61, %v1363_v6  ;;  %v1281_v15 = vadd.f32 %v1280_v8, %v1277_v7  ;;  %v2863_v6 = vld [vmem:[%s3813_s14 + $0x68] sm:$0xff]  ;;  %v2858_v7 = vld [vmem:[%s3813_s14 + $0x40] sm:$0xff] }
 0x3ae   : > { %1998 = vmatpush.bf16.msrb.mxu0 %v2863_v6  ;;  %v2862_v8 = vld [vmem:[%s3813_s14 + $0x60] sm:$0xff]  ;;  %v1539_v6 = vperm.slane %v2689_v63, 2 }
 0x3af   : > { %v1369_v17 = vadd.f32 %v1368_v14, %v1366_v10  ;;  %v1285_v13 = vadd.f32 %v1284_v16, %v1281_v15  ;;  %v2861_v10 = vld [vmem:[%s3813_s14 + $0x58] sm:$0xff]  ;;  %1882 = vmatpush.bf16.msra.mxu3 %v2858_v7 }
 0x3b0   : > { %2026 = vmatpush.bf16.msrb.mxu1 %v2861_v10 }
 0x3b1   : > { %v1372_v20 = vadd.f32 %v1371_v11, %v1369_v17  ;;  %v1289_v21 = vadd.f32 %v1288_v18, %v1285_v13 }
 0x3b2   : > { %v2999_v0 = vpop.eup %2998  ;;  %1999 = vmatpush.bf16.msrb.mxu0 %v2862_v8 }
 0x3b3   : > { %v3451_v52 = vadd.f32 %v2958_v12, %v1372_v20  ;;  %v3453_v22 = vadd.f32 %v2959_v19, %v1289_v21  ;;  %v1324_v1 = vmul.f32 256.0, %v2999_v0  ;;  %vm1328_vm3 = vweird.f32 %v2999_v0  ;;  %v2860_v12 = vld [vmem:[%s3813_s14 + $0x50] sm:$0xff] }
 0x3b4   : > { %2027 = vmatpush.bf16.msrb.mxu1 %v2860_v12 }
 0x3b5   : > { %v1383_v56 = vsel %vm767_vm1, %v3451_v52, 0.0  ;;  %v1300_v23 = vsel %vm767_vm1, %v3453_v22, 0.0  ;;  %v1311_v24 = vmul.f32 %v3453_v22, %v3453_v22  ;;  %v1394_v26 = vmul.f32 %v3451_v52, %v3451_v52 }
 0x3b6   : > { %1384 = vadd.xlane.f32.xlu1 %v1383_v56  ;;  %1301 = vadd.xlane.f32.xlu2 %v1300_v23  ;;  %v1325_v2 = vsub.f32 1.0, %v1324_v1 }
 0x3b7   : > { %v1312_v25 = vsel %vm767_vm1, %v1311_v24, 0.0  ;;  %v1395_v45 = vsel %vm767_vm1, %v1394_v26, 0.0 }
 0x3b8   : > { %1313 = vadd.xlane.f32.xlu0 %v1312_v25  ;;  %v1326_v3 = vmul.f32 %v2999_v0, %v1325_v2  ;;  %v1533_v2 = vperm.slane %v2689_v63, 0 }
 0x3ba   : > { %v1327_v4 = vadd.f32 %v2999_v0, %v1326_v3 }
 0x3bc   : > { %v3473_v61 = vsel %vm1328_vm3, %v2999_v0, %v1327_v4  ;;  %v2685_v0 = vld [vmem:[%s3844_s5 + $0x18] sm:$0x1f]  ;;  %v1536_v4 = vperm.slane %v2689_v63, 1 }
 0x3bd   : > { %v1445_v3 = vperm.slane %v2685_v0, 0  ;;  %v1449_v5 = vperm.slane %v2685_v0, 1  ;;  %v1453_v7 = vperm.slane %v2685_v0, 2 }
 0x3be   : > { %1396 = vadd.xlane.f32.xlu2 %v1395_v45 }
 0x41b   : > { %v3465_v27 = vpop.f32.mrf.mxu3 }
 0x423   : > { %v1643_v53 = vpop.f32.mrf.mxu3 }
 0x424   : > { %1647 = vst [vmem:[#allocation2 + $0x10] ss:$2 sm:$0xff] %v1643_v53 }
 0x425   : > { %1649 = vst [vmem:[#allocation2 + $0x11] ss:$2 sm:$0xff] %v1643_v53 }
 0x429   : > { %v1385_v28 = vpop.xlane.xlu1 %1384  ;;  %v1302_v29 = vpop.xlane.xlu2 %1301 }
 0x42a   : > { %v1386_v30 = vrot.slane %v1385_v28, 4  ;;  %v1303_v31 = vrot.slane %v1302_v29, 4 }
 0x42b   : > { %v1314_v32 = vpop.xlane.xlu0 %1313 }
 0x42c   : > { %v1387_v33 = vadd.f32 %v1386_v30, %v1385_v28  ;;  %v1304_v34 = vadd.f32 %v1303_v31, %v1302_v29  ;;  %v1315_v35 = vrot.slane %v1314_v32, 4  ;;  %v1652_v8 = vld [vmem:[#allocation2 + $0x10] sm:$0xff] }
 0x42e   : > { %v1388_v36 = vrot.slane %v1387_v33, 2  ;;  %v1305_v37 = vrot.slane %v1304_v34, 2  ;;  %v1316_v38 = vadd.f32 %v1315_v35, %v1314_v32  ;;  %v2960_v32 = vld [vmem:[%s3846_s26 + $0x2] ss:$0 sm:$0xff] }
 0x430   : > { %v1317_v39 = vrot.slane %v1316_v38, 2  ;;  %v1306_v41 = vadd.f32 %v1305_v37, %v1304_v34  ;;  %v1389_v40 = vadd.f32 %v1388_v36, %v1387_v33  ;;  %v3495_v33 = vpop.f32.mrf.mxu2 }
 0x431   : > { %v1397_v42 = vpop.xlane.xlu2 %1396 }
 0x432   : > { %v1398_v43 = vrot.slane %v1397_v42, 4  ;;  %v1307_v44 = vrot.slane %v1306_v41, 1  ;;  %v1318_v47 = vadd.f32 %v1317_v39, %v1316_v38  ;;  %v1390_v48 = vrot.slane %v1389_v40, 1  ;;  %v2962_v39 = vld [vmem:[%s3808_s9 + $0x2] ss:$0 sm:$0xff] }
 0x434   : > { %v1399_v49 = vadd.f32 %v1398_v43, %v1397_v42  ;;  %v1308_v50 = vadd.f32 %v1307_v44, %v1306_v41  ;;  %v1319_v51 = vrot.slane %v1318_v47, 1  ;;  %v1391_v58 = vadd.f32 %v1390_v48, %v1389_v40  ;;  %v2961_v43 = vld [vmem:[%s3811_s12 + $0x1] ss:$0 sm:$0xff] }
 0x436   : > { %v1400_v54 = vrot.slane %v1399_v49, 2  ;;  %2896 = vpush %v1308_v50  ;;  %v1320_v57 = vadd.f32 %v1319_v51, %v1318_v47  ;;  %v2963_v51 = vld [vmem:[%s3812_s13 + $0x1] ss:$0 sm:$0xff] }
 0x438   : > { %2898 = vpush %v1320_v57  ;;  %v1401_v59 = vadd.f32 %v1400_v54, %v1399_v49  ;;  %v1683_v54 = vpop.f32.mrf.mxu2 }
 0x439   : > { %2900 = vpush %v1391_v58 }
 0x43a   : > { %v1402_v60 = vrot.slane %v1401_v59, 1 }
 0x43c   : > { %v1403_v62 = vadd.f32 %v1402_v60, %v1401_v59 }
 0x43e   : > { %2902 = vpush %v1403_v62 }
 0x440   : > { %v1686_v1 = vpop.f32.mrf.mxu2 }
 0x467   : > { %s2897_s17 = spop %2896 }
 0x468   : > { %v1310_v9 = vstv %s2897_s17 }
 0x469   : > { %v1330_v14 = vmul.f32 %v3473_v61, %v1310_v9  ;;  %s2899_s1 = spop %2898 }
 0x46a   : > { %v1322_v15 = vstv %s2899_s1  ;;  %s2901_s27 = spop %2900 }
 0x46b   : > { %v1332_v16 = vmul.f32 %v1330_v14, %v1330_v14  ;;  %v1331_v17 = vmul.f32 %v3473_v61, %v1322_v15  ;;  %v1393_v11 = vstv %s2901_s27  ;;  %v1335_v31 = vsub.f32 %v3453_v22, %v1330_v14  ;;  %s2712_s27 = sld [smem:[#allocation6 + $0x1]] }
 0x46c   : > { %v1406_v18 = vmul.f32 %v1393_v11, %v3473_v61  ;;  %v1457_v11 = vperm.slane %v2685_v0, 3 }
 0x46d   : > { %v1333_v13 = vsub.f32 %v1331_v17, %v1332_v16  ;;  %v1339_v38 = vmul.f32 %v2960_v32, %v1335_v31  ;;  %v1542_v16 = vperm.slane %v2689_v63, 3 }
 0x46e   : > { %v1408_v56 = vmul.f32 %v1406_v18, %v1406_v18  ;;  %v1411_v42 = vsub.f32 %v3451_v52, %v1406_v18 }
 0x46f   : > { %v1334_v19 = vmax.f32 %v1333_v13, 0.0  ;;  %s2903_s17 = spop %2902 }
 0x470   : > { %v1405_v20 = vstv %s2903_s17  ;;  %v1415_v49 = vmul.f32 %v2961_v43, %v1411_v42 }
 0x471   : > { %v1340_v21 = vadd.f32 1e-08, %v1334_v19  ;;  %v1407_v23 = vmul.f32 %v1405_v20, %v3473_v61  ;;  %v1687_v19 = vadd.f32 %v1686_v1, %v1652_v8 }
 0x473   : > { %3000 = vrsqrt.f32 %v1340_v21  ;;  %v1409_v24 = vsub.f32 %v1407_v23, %v1408_v56  ;;  %vm1347_vm9 = vweird.f32 %v1340_v21  ;;  %v1461_v56 = vperm.slane %v2685_v0, 4 }
 0x475   : > { %v1410_v25 = vmax.f32 %v1409_v24, 0.0 }
 0x477   : > { %v1416_v26 = vadd.f32 1e-08, %v1410_v25  ;;  %v2966_v25 = vld [vmem:[%s3814_s15] ss:$0 sm:$0xff] }
 0x479   : > { %v3001_v45 = vpop.eup %3000  ;;  %3002 = vrsqrt.f32 %v1416_v26  ;;  %vm1423_vm12 = vweird.f32 %v1416_v26 }
 0x47a   : > { %v1342_v53 = vmul.f32 %v3001_v45, %v1340_v21  ;;  %vm1348_vm8 = vweird.f32 %v3001_v45 }
 0x47b   : > { %vm1349_vm10 = vmor %vm1347_vm9, %vm1348_vm8 }
 0x47c   : > { %v1343_v28 = vmul.f32 %v3001_v45, %v1342_v53 }
 0x47e   : > { %v1344_v29 = vmul.f32 0.5, %v1343_v28  ;;  %v1653_v28 = vld [vmem:[#allocation2 + $0x18] sm:$0xff] }
 0x47f   : > { %v3003_v30 = vpop.eup %3002 }
 0x480   : > { %v1345_v34 = vsub.f32 1.5, %v1344_v29  ;;  %v1418_v35 = vmul.f32 %v3003_v30, %v1416_v26  ;;  %vm1424_vm11 = vweird.f32 %v3003_v30 }
 0x481   : > { %vm1425_vm13 = vmor %vm1423_vm12, %vm1424_vm11 }
 0x482   : > { %v1346_v36 = vmul.f32 %v3001_v45, %v1345_v34  ;;  %v1419_v37 = vmul.f32 %v3003_v30, %v1418_v35  ;;  %v1688_v34 = vpop.f32.mrf.mxu2 }
 0x484   : > { %v1350_v41 = vsel %vm1349_vm10, %v3001_v45, %v1346_v36  ;;  %v1420_v22 = vmul.f32 0.5, %v1419_v37 }
 0x485   : > { %v1351_v40 = vmul.f32 %v1350_v41, %v1339_v38 }
 0x486   : > { %v1421_v44 = vsub.f32 1.5, %v1420_v22  ;;  %v1689_v22 = vadd.f32 %v1688_v34, %v1653_v28 }
 0x487   : > { %v1355_v47 = vadd.f32 %v2962_v39, %v1351_v40  ;;  %v3527_v40 = vadd.f32 %v2966_v25, %v1687_v19 }
 0x488   : > { %v1422_v48 = vmul.f32 %v3003_v30, %v1421_v44  ;;  %v2965_v44 = vld [vmem:[%s3845_s28 + $0x3] ss:$0 sm:$0xff] }
 0x489   : > { %v1433_v50 = vpack.c.bf16 %v1355_v47, %v1355_v47  ;;  %1435 = vst.msk [vmem:[#allocation2 + $0x2] sm:$0xff] %vm767_vm1, %v1355_v47 }
 0x48a   : > { %v1426_v52 = vsel %vm1425_vm13, %v3003_v30, %v1422_v48 }
 0x48b   : > { %2739 = vmatmul.msk.bf16.vlgmr.msra.gmra.mxu3 %vm767_vm1, %v1433_v50  ;;  %2752 = vmatmul.msk.bf16.vlgmr.msrb.gmra.mxu0 %vm767_vm1, %v1433_v50  ;;  %v1427_v57 = vmul.f32 %v1426_v52, %v1415_v49  ;;  %v3541_v52 = vadd.f32 %v2966_v25, %v1689_v22 }
 0x48d   : > { %v1431_v58 = vadd.f32 %v2963_v51, %v1427_v57  ;;  %v1720_v57 = vmul.f32 %v3527_v40, %v3527_v40 }
 0x48f   : > { %v1432_v59 = vpack.c.bf16 %v1431_v58, %v1431_v58 }
 0x490   : > { %v1437_v60 = vld [vmem:[#allocation2] ss:$2 sm:$0x3f]  ;;  %v1440_v62 = vld [vmem:[#allocation2 + $0x1] ss:$2 sm:$0x3f] }
 0x491   : > { %2761 = vmatmul.msk.bf16.vlgmr.msrb.gmra.mxu1 %vm767_vm1, %v1432_v59  ;;  %1439 = vst.msk [vmem:[#allocation3] sm:$0x3f] %vm1438_vm14, %v1437_v60 }
 0x492   : > { %1441 = vst.msk [vmem:[#allocation4] sm:$0x3f] %vm1438_vm14, %v1440_v62 }
 0x493   : > { %1646 = vst [vmem:[#allocation2] ss:$2 sm:$0xff] %v3465_v27 }
 0x494   : > { %1648 = vst [vmem:[#allocation2 + $0x1] ss:$2 sm:$0xff] %v3465_v27  ;;  %v1545_v27 = vperm.slane %v2689_v63, 4 }
 0x498   : > { %v1444_v9 = vld [vmem:[#allocation3] sm:$0xf] }
 0x499   : > { %v1452_v10 = vld [vmem:[#allocation3 + $0x1] sm:$0xf]  ;;  %v1448_v14 = vld [vmem:[#allocation4] sm:$0xf]  ;;  %v1534_v15 = vmul.f32 %v1533_v2, %v1444_v9  ;;  %v1446_v17 = vmul.f32 %v1445_v3, %v1444_v9  ;;  %v1704_v9 = vsel %vm767_vm1, %v3527_v40, 0.0 }
 0x49a   : > { %v1456_v12 = vld [vmem:[#allocation4 + $0x1] sm:$0xf]  ;;  %v1537_v13 = vmul.f32 %v1536_v4, %v1448_v14  ;;  %v1450_v18 = vmul.f32 %v1449_v5, %v1448_v14  ;;  %v1540_v20 = vmul.f32 %v1539_v6, %v1452_v10  ;;  %v1454_v21 = vmul.f32 %v1453_v7, %v1452_v10  ;;  %v1460_v26 = vld [vmem:[#allocation3 + $0x2] sm:$0xf] }
 0x49b   : > { %v1650_v23 = vld [vmem:[#allocation2] sm:$0xff]  ;;  %v1651_v24 = vld [vmem:[#allocation2 + $0x8] sm:$0xff]  ;;  %v1543_v31 = vmul.f32 %v1542_v16, %v1456_v12  ;;  %v1458_v32 = vmul.f32 %v1457_v11, %v1456_v12  ;;  %v1546_v39 = vmul.f32 %v1545_v27, %v1460_v26  ;;  %v1462_v41 = vmul.f32 %v1461_v56, %v1460_v26  ;;  %v1851_v12 = vpop.f32.mrf.mxu1 }
 0x49c   : > { %v1538_v45 = vadd.f32 %v1537_v13, %v1534_v15  ;;  %v1451_v53 = vadd.f32 %v1450_v18, %v1446_v17  ;;  %v1682_v29 = vadd.f32 %v3495_v33, %v1650_v23  ;;  %v1684_v30 = vadd.f32 %v1683_v54, %v1651_v24  ;;  %v2964_v33 = vld [vmem:[%s3810_s11 + $0x2] ss:$0 sm:$0xff]  ;;  %v1822_v13 = vpop.f32.mrf.mxu3 }
 0x49d   : > { %v1721_v5 = vmul.f32 %v3541_v52, %v3541_v52  ;;  %v1725_v6 = vsel %vm767_vm1, %v1720_v57, 0.0  ;;  %v1706_v17 = vsel %vm767_vm1, %v3541_v52, 0.0  ;;  %v1852_v24 = vadd.f32 %v1851_v12, %v1822_v13 }
 0x49e   : > { %v1541_v35 = vadd.f32 %v1540_v20, %v1538_v45  ;;  %v1455_v36 = vadd.f32 %v1454_v21, %v1451_v53  ;;  %v3523_v37 = vadd.f32 %v2966_v25, %v1682_v29  ;;  %v3525_v38 = vadd.f32 %v2966_v25, %v1684_v30  ;;  %v2967_v53 = vld [vmem:[%s3814_s15 + $0x1] ss:$0 sm:$0xff] }
 0x49f   : > { %v1727_v14 = vsel %vm767_vm1, %v1721_v5, 0.0 }
 0x4a0   : > { %v1544_v42 = vadd.f32 %v1543_v31, %v1541_v35  ;;  %v1459_v43 = vadd.f32 %v1458_v32, %v1455_v36  ;;  %v1718_v47 = vmul.f32 %v3523_v37, %v3523_v37  ;;  %v1719_v48 = vmul.f32 %v3525_v38, %v3525_v38 }
 0x4a1   : > { %v1701_v60 = vsel %vm767_vm1, %v3523_v37, 0.0  ;;  %v1702_v62 = vsel %vm767_vm1, %v3525_v38, 0.0 }
 0x4a2   : > { %v1547_v49 = vadd.f32 %v1546_v39, %v1544_v42  ;;  %v1463_v50 = vadd.f32 %v1462_v41, %v1459_v43  ;;  %v1722_v51 = vsel %vm767_vm1, %v1718_v47, 0.0  ;;  %v1723_v54 = vsel %vm767_vm1, %v1719_v48, 0.0 }
 0x4a3   : > { %v1724_v63 = vadd.f32 %v1723_v54, %v1722_v51  ;;  %v1703_v3 = vadd.f32 %v1702_v62, %v1701_v60  ;;  %v1853_v18 = vpop.f32.mrf.mxu1 }
 0x4a4   : > { %v3545_v58 = vadd.f32 %v2964_v33, %v1547_v49  ;;  %v3547_v59 = vadd.f32 %v2965_v44, %v1463_v50  ;;  %v1824_v19 = vpop.f32.mrf.mxu3 }
 0x4a5   : > { %v1726_v7 = vadd.f32 %v1725_v6, %v1724_v63  ;;  %v1705_v10 = vadd.f32 %v1704_v9, %v1703_v3  ;;  %v1854_v25 = vadd.f32 %v1853_v18, %v1824_v19 }
 0x4a6   : > { %v1558_v0 = vsel %vm1474_vm15, %v3545_v58, 0.0  ;;  %v1475_v1 = vsel %vm1474_vm15, %v3547_v59, 0.0  ;;  %v1486_v2 = vmul.f32 %v3547_v59, %v3547_v59  ;;  %v1569_v8 = vmul.f32 %v3545_v58, %v3545_v58 }
 0x4a7   : > { %1559 = vadd.xlane.f32.xlu2 %v1558_v0  ;;  %1476 = vadd.xlane.f32.xlu0 %v1475_v1  ;;  %v1728_v15 = vadd.f32 %v1727_v14, %v1726_v7  ;;  %v1707_v11 = vadd.f32 %v1706_v17, %v1705_v10 }
 0x4a8   : > { %v1487_v4 = vsel %vm1474_vm15, %v1486_v2, 0.0  ;;  %v1570_v16 = vsel %vm1474_vm15, %v1569_v8, 0.0 }
 0x4a9   : > { %1488 = vadd.xlane.f32.xlu1 %v1487_v4 }
 0x4af   : > { %1571 = vadd.xlane.f32.xlu0 %v1570_v16  ;;  %1729 = vadd.xlane.f32.xlu2 %v1728_v15 }
 0x4b1   : > { %1708 = vadd.xlane.f32.xlu1 %v1707_v11 }
 0x508   : > { %v2001_v20 = vpop.f32.mrf.mxu0 }
 0x50e   : > { %v1884_v27 = vpop.f32.mrf.mxu3  ;;  %v2029_v21 = vpop.f32.mrf.mxu1 }
 0x50f   : > { %1888 = vst [vmem:[#allocation2] ss:$2 sm:$0xff] %v1884_v27  ;;  %v3571_v56 = vadd.f32 %v2029_v21, %v2001_v20 }
 0x510   : > { %1889 = vst [vmem:[#allocation2 + $0x1] ss:$2 sm:$0xff] %v1884_v27  ;;  %v2003_v23 = vpop.f32.mrf.mxu0 }
 0x516   : > { %v1886_v26 = vpop.f32.mrf.mxu3  ;;  %v2031_v45 = vpop.f32.mrf.mxu1 }
 0x517   : > { %v1890_v28 = vld [vmem:[#allocation2] sm:$0xff]  ;;  %v1891_v29 = vld [vmem:[#allocation2 + $0x8] sm:$0xff] }
 0x518   : > { %v1892_v30 = vadd.f32 %v1890_v28, %v1852_v24  ;;  %v1893_v31 = vadd.f32 %v1891_v29, %v1854_v25 }
 0x51a   : > { %v1477_v32 = vpop.xlane.xlu0 %1476  ;;  %v1560_v34 = vpop.xlane.xlu2 %1559  ;;  %v3576_v35 = vadd.f32 %v2967_v53, %v1892_v30  ;;  %v3578_v36 = vadd.f32 %v2967_v53, %v1893_v31  ;;  %v3051_v30 = vmov 128.0  }
 0x51b   : > { %v1478_v39 = vrot.slane %v1477_v32, 4  ;;  %v1561_v41 = vrot.slane %v1560_v34, 4  ;;  %3004 = vrcp.f32 %v3051_v30 }
 0x51c   : > { %v1489_v22 = vpop.xlane.xlu1 %1488  ;;  %v1905_v42 = vsel %vm767_vm1, %v3576_v35, 0.0  ;;  %v1906_v33 = vsel %vm767_vm1, %v3578_v36, 0.0  ;;  %v1918_v43 = vmul.f32 %v3576_v35, %v3576_v35  ;;  %v1919_v44 = vmul.f32 %v3578_v36, %v3578_v36 }
 0x51d   : > { %v1479_v47 = vadd.f32 %v1478_v39, %v1477_v32  ;;  %v1562_v48 = vadd.f32 %v1561_v41, %v1560_v34  ;;  %v1490_v49 = vrot.slane %v1489_v22, 4  ;;  %v1907_v50 = vadd.f32 %v1906_v33, %v1905_v42  ;;  %v2869_v33 = vld [vmem:[%s3813_s14 + $0x98] sm:$0xff] }
 0x51e   : > { %v1920_v51 = vsel %vm767_vm1, %v1918_v43, 0.0  ;;  %v1921_v54 = vsel %vm767_vm1, %v1919_v44, 0.0  ;;  %2160 = vmatpush.bf16.msrb.mxu3 %v2869_v33 }
 0x51f   : > { %v1480_v57 = vrot.slane %v1479_v47, 2  ;;  %v1563_v60 = vrot.slane %v1562_v48, 2  ;;  %v1491_v62 = vadd.f32 %v1490_v49, %v1489_v22  ;;  %1908 = vadd.xlane.f32.xlu0 %v1907_v50  ;;  %v1922_v63 = vadd.f32 %v1921_v54, %v1920_v51  ;;  %v2865_v22 = vld [vmem:[%s3813_s14 + $0x78] sm:$0xff] }
 0x520   : > { %2058 = vmatpush.bf16.msrb.mxu2 %v2865_v22 }
 0x521   : > { %v1492_v0 = vrot.slane %v1491_v62, 2  ;;  %1923 = vadd.xlane.f32.xlu1 %v1922_v63  ;;  %v1481_v1 = vadd.f32 %v1480_v57, %v1479_v47  ;;  %v1564_v2 = vadd.f32 %v1563_v60, %v1562_v48  ;;  %v3005_v31 = vpop.eup %3004  ;;  %v2864_v47 = vld [vmem:[%s3813_s14 + $0x70] sm:$0xff]  ;;  %v2867_v57 = vld [vmem:[%s3813_s14 + $0x88] sm:$0xff] }
 0x522   : > { %v1572_v3 = vpop.xlane.xlu0 %1571  ;;  %v1730_v4 = vpop.xlane.xlu2 %1729  ;;  %v1499_v32 = vmul.f32 128.0, %v3005_v31  ;;  %vm1503_vm2 = vweird.f32 %v3005_v31  ;;  %v2868_v48 = vld [vmem:[%s3813_s14 + $0x90] sm:$0xff]  ;;  %2188 = vmatpush.bf16.msra.mxu0 %v2867_v57 }
 0x523   : > { %v1573_v5 = vrot.slane %v1572_v3, 4  ;;  %v1731_v6 = vrot.slane %v1730_v4, 4  ;;  %v1482_v7 = vrot.slane %v1481_v1, 1  ;;  %v1493_v8 = vadd.f32 %v1492_v0, %v1491_v62  ;;  %2161 = vmatpush.bf16.msrb.mxu3 %v2868_v48 }
 0x524   : > { %v1709_v9 = vpop.xlane.xlu1 %1708  ;;  %v1565_v10 = vrot.slane %v1564_v2, 1  ;;  %v1500_v34 = vsub.f32 1.0, %v1499_v32  ;;  %2059 = vmatpush.bf16.msrb.mxu2 %v2864_v47  ;;  %v2969_v32 = vld [vmem:[%s3811_s12 + $0x2] ss:$0 sm:$0xff] }
 0x525   : > { %v1574_v14 = vadd.f32 %v1573_v5, %v1572_v3  ;;  %v1732_v15 = vadd.f32 %v1731_v6, %v1730_v4  ;;  %v1710_v16 = vrot.slane %v1709_v9, 4  ;;  %v1483_v17 = vadd.f32 %v1482_v7, %v1481_v1  ;;  %v2866_v1 = vld [vmem:[%s3813_s14 + $0x80] sm:$0xff]  ;;  %v2871_v4 = vld [vmem:[%s3817_s18 + $0x8] sm:$0xff] }
 0x526   : > { %v1494_v11 = vrot.slane %v1493_v8, 1  ;;  %v1566_v27 = vadd.f32 %v1565_v10, %v1564_v2  ;;  %v1501_v39 = vmul.f32 %v3005_v31, %v1500_v34  ;;  %2189 = vmatpush.bf16.msra.mxu0 %v2866_v1  ;;  %v2870_v10 = vld [vmem:[%s3817_s18] sm:$0xff] }
 0x527   : > { %v1575_v12 = vrot.slane %v1574_v14, 2  ;;  %v1733_v13 = vrot.slane %v1732_v15, 2  ;;  %v1711_v18 = vadd.f32 %v1710_v16, %v1709_v9  ;;  %2904 = vpush %v1483_v17 }
 0x528   : > { %v1495_v19 = vadd.f32 %v1494_v11, %v1493_v8  ;;  %v1502_v41 = vadd.f32 %v3005_v31, %v1501_v39  ;;  %2329 = vmatpush.bf16.msra.mxu2 %v2871_v4 }
 0x529   : > { %v1712_v20 = vrot.slane %v1711_v18, 2  ;;  %v1576_v21 = vadd.f32 %v1575_v12, %v1574_v14  ;;  %v1734_v23 = vadd.f32 %v1733_v13, %v1732_v15 }
 0x52a   : > { %2906 = vpush %v1495_v19  ;;  %v3593_v42 = vsel %vm1503_vm2, %v3005_v31, %v1502_v41  ;;  %v2971_v31 = vld [vmem:[%s3808_s9 + $0x3] ss:$0 sm:$0xff] }
 0x52b   : > { %2908 = vpush %v1566_v27  ;;  %v1577_v24 = vrot.slane %v1576_v21, 1  ;;  %v1713_v25 = vadd.f32 %v1712_v20, %v1711_v18  ;;  %v1735_v26 = vrot.slane %v1734_v23, 1 }
 0x52c   : > { %2330 = vmatpush.bf16.msra.mxu2 %v2870_v10 }
 0x52d   : > { %v1578_v45 = vadd.f32 %v1577_v24, %v1576_v21  ;;  %v1714_v53 = vrot.slane %v1713_v25, 1  ;;  %v1736_v29 = vadd.f32 %v1735_v26, %v1734_v23  ;;  %v2968_v24 = vld [vmem:[%s3846_s26 + $0x3] ss:$0 sm:$0xff] }
 0x52f   : > { %2910 = vpush %v1578_v45  ;;  %v1715_v28 = vadd.f32 %v1714_v53, %v1713_v25 }
 0x531   : > { %2912 = vpush %v1715_v28 }
 0x532   : > { %2914 = vpush %v1736_v29 }
 0x558   : > { %s2905_s0 = spop %2904 }
 0x559   : > { %v1485_v43 = vstv %s2905_s0 }
 0x55a   : > { %v1505_v44 = vmul.f32 %v3593_v42, %v1485_v43 }
 0x55b   : > { %s2907_s29 = spop %2906 }
 0x55c   : > { %v1507_v49 = vmul.f32 %v1505_v44, %v1505_v44  ;;  %v1497_v50 = vstv %s2907_s29  ;;  %s2909_s4 = spop %2908  ;;  %v1510_v23 = vsub.f32 %v3547_v59, %v1505_v44 }
 0x55d   : > { %v1506_v51 = vmul.f32 %v3593_v42, %v1497_v50  ;;  %v1568_v54 = vstv %s2909_s4 }
 0x55e   : > { %v1581_v60 = vmul.f32 %v1568_v54, %v3593_v42  ;;  %v1514_v29 = vmul.f32 %v2968_v24, %v1510_v23  ;;  %v2970_v54 = vld [vmem:[%s3815_s16] ss:$0 sm:$0xff] }
 0x55f   : > { %v1508_v62 = vsub.f32 %v1506_v51, %v1507_v49 }
 0x560   : > { %s2911_s0 = spop %2910  ;;  %v1583_v2 = vmul.f32 %v1581_v60, %v1581_v60  ;;  %v1586_v59 = vsub.f32 %v3545_v58, %v1581_v60  ;;  %v2972_v58 = vld [vmem:[%s3812_s13 + $0x2] ss:$0 sm:$0xff] }
 0x561   : > { %v1509_v63 = vmax.f32 %v1508_v62, 0.0  ;;  %v1580_v0 = vstv %s2911_s0 }
 0x562   : > { %v1582_v3 = vmul.f32 %v1580_v0, %v3593_v42  ;;  %s2913_s29 = spop %2912  ;;  %v1590_v47 = vmul.f32 %v2969_v32, %v1586_v59 }
 0x563   : > { %v1515_v5 = vadd.f32 1e-08, %v1509_v63  ;;  %v1717_v6 = vstv %s2913_s29  ;;  %s2915_s4 = spop %2914 }
 0x564   : > { %v1584_v7 = vsub.f32 %v1582_v3, %v1583_v2  ;;  %v3618_v8 = vmul.f32 %v1717_v6, %v3238_v55  ;;  %v1738_v9 = vstv %s2915_s4  ;;  %v1782_v6 = vstv %s2712_s27 }
 0x565   : > { %3006 = vrsqrt.f32 %v1515_v5  ;;  %v1740_v15 = vmul.f32 %v1738_v9, %v3238_v55  ;;  %vm1522_vm5 = vweird.f32 %v1515_v5 }
 0x566   : > { %v1585_v14 = vmax.f32 %v1584_v7, 0.0  ;;  %v1741_v16 = vmul.f32 %v3618_v8, %v3618_v8  ;;  %v1744_v50 = vsub.f32 %v3523_v37, %v3618_v8  ;;  %v1745_v51 = vsub.f32 %v3525_v38, %v3618_v8  ;;  %v2973_v38 = vld [vmem:[%s3847_s3] ss:$0 sm:$0xff] }
 0x568   : > { %v1591_v17 = vadd.f32 1e-08, %v1585_v14  ;;  %v1742_v11 = vsub.f32 %v1740_v15, %v1741_v16  ;;  %v1751_v1 = vmul.f32 %v2970_v54, %v1744_v50  ;;  %v1752_v37 = vmul.f32 %v2970_v54, %v1745_v51 }
 0x569   : > { %v1746_v15 = vsub.f32 %v3527_v40, %v3618_v8  ;;  %v1747_v16 = vsub.f32 %v3541_v52, %v3618_v8 }
 0x56a   : > { %3008 = vrsqrt.f32 %v1591_v17  ;;  %v1743_v13 = vmax.f32 %v1742_v11, 0.0  ;;  %vm1598_vm3 = vweird.f32 %v1591_v17 }
 0x56b   : > { %v3007_v12 = vpop.eup %3006 }
 0x56c   : > { %v1517_v18 = vmul.f32 %v3007_v12, %v1515_v5  ;;  %v1755_v19 = vadd.f32 1e-08, %v1743_v13  ;;  %vm1523_vm4 = vweird.f32 %v3007_v12  ;;  %v1754_v13 = vmul.f32 %v2970_v54, %v1747_v16 }
 0x56d   : > { %vm1524_vm6 = vmor %vm1522_vm5, %vm1523_vm4 }
 0x56e   : > { %v1518_v20 = vmul.f32 %v3007_v12, %v1517_v18  ;;  %3010 = vrsqrt.f32 %v1755_v19  ;;  %vm1762_vm10 = vweird.f32 %v1755_v19 }
 0x570   : > { %v3009_v27 = vpop.eup %3008  ;;  %v1519_v21 = vmul.f32 0.5, %v1518_v20 }
 0x571   : > { %v1593_v25 = vmul.f32 %v3009_v27, %v1591_v17  ;;  %vm1599_vm7 = vweird.f32 %v3009_v27 }
 0x572   : > { %v1520_v26 = vsub.f32 1.5, %v1519_v21  ;;  %vm1600_vm8 = vmor %vm1598_vm3, %vm1599_vm7 }
 0x573   : > { %v1594_v45 = vmul.f32 %v3009_v27, %v1593_v25 }
 0x574   : > { %v1521_v53 = vmul.f32 %v3007_v12, %v1520_v26  ;;  %v3011_v28 = vpop.eup %3010 }
 0x575   : > { %v1595_v30 = vmul.f32 0.5, %v1594_v45  ;;  %v1757_v34 = vmul.f32 %v3011_v28, %v1755_v19  ;;  %vm1763_vm9 = vweird.f32 %v3011_v28 }
 0x576   : > { %v1525_v39 = vsel %vm1524_vm6, %v3007_v12, %v1521_v53  ;;  %vm1764_vm11 = vmor %vm1762_vm10, %vm1763_vm9  ;;  %v1753_v12 = vmul.f32 %v2970_v54, %v1746_v15 }
 0x577   : > { %v1596_v41 = vsub.f32 1.5, %v1595_v30  ;;  %v1526_v22 = vmul.f32 %v1525_v39, %v1514_v29  ;;  %v1758_v33 = vmul.f32 %v3011_v28, %v1757_v34 }
 0x579   : > { %v1597_v43 = vmul.f32 %v3009_v27, %v1596_v41  ;;  %v1530_v44 = vadd.f32 %v2971_v31, %v1526_v22  ;;  %v1759_v48 = vmul.f32 0.5, %v1758_v33  ;;  %v2873_v33 = vld [vmem:[%s3817_s18 + $0x18] sm:$0xff] }
 0x57a   : > { %2289 = vmatpush.bf16.msra.mxu1 %v2873_v33 }
 0x57b   : > { %v1601_v49 = vsel %vm1600_vm8, %v3009_v27, %v1597_v43  ;;  %v1608_v57 = vpack.c.bf16 %v1530_v44, %v1530_v44  ;;  %v1760_v62 = vsub.f32 1.5, %v1759_v48 }
 0x57c   : > { %v1602_v60 = vmul.f32 %v1601_v49, %v1590_v47  ;;  %v2872_v47 = vld [vmem:[%s3817_s18 + $0x10] sm:$0xff] }
 0x57d   : > { %2770 = vmatmul.msk.bf16.vlgmr.msrb.gmra.mxu2 %vm767_vm1, %v1608_v57  ;;  %2783 = vmatmul.msk.bf16.vlgmr.msrb.gmra.mxu3 %vm767_vm1, %v1608_v57  ;;  %v1761_v63 = vmul.f32 %v3011_v28, %v1760_v62 }
 0x57e   : > { %v1606_v0 = vadd.f32 %v2972_v58, %v1602_v60  ;;  %2290 = vmatpush.bf16.msra.mxu1 %v2872_v47 }
 0x57f   : > { %v1765_v2 = vsel %vm1764_vm11, %v3011_v28, %v1761_v63 }
 0x580   : > { %v1607_v3 = vpack.c.bf16 %v1606_v0, %v1606_v0  ;;  %v1766_v4 = vmul.f32 %v1765_v2, %v1751_v1  ;;  %v1767_v5 = vmul.f32 %v1765_v2, %v1752_v37  ;;  %v1768_v19 = vmul.f32 %v1765_v2, %v1753_v12  ;;  %v2974_v37 = vld [vmem:[%s3815_s16 + $0x1] ss:$0 sm:$0xff]  ;;  %v2976_v12 = vld [vmem:[%s3814_s15 + $0x3] ss:$0 sm:$0xff] }
 0x581   : > { %v1769_v20 = vmul.f32 %v1765_v2, %v1754_v13 }
 0x582   : > { %2792 = vmatmul.msk.bf16.vlgmr.msra.gmra.mxu0 %vm767_vm1, %v1607_v3  ;;  %v1773_v7 = vadd.f32 %v2973_v38, %v1766_v4  ;;  %v1774_v9 = vadd.f32 %v2973_v38, %v1767_v5  ;;  %v1775_v27 = vadd.f32 %v2973_v38, %v1768_v19  ;;  %v2975_v4 = vld [vmem:[%s3847_s3 + $0x1] ss:$0 sm:$0xff] }
 0x583   : > { %v1776_v21 = vadd.f32 %v2973_v38, %v1769_v20 }
 0x584   : > { %vm1778_vm12 = vcmp.ge.f32.partialorder %v1773_v7, 0.0  ;;  %vm1779_vm13 = vcmp.ge.f32.partialorder %v1774_v9, 0.0  ;;  %v1783_v10 = vmul.f32 %v1782_v6, %v1773_v7  ;;  %v1784_v14 = vmul.f32 %v1782_v6, %v1774_v9 }
 0x585   : > { %v1785_v26 = vmul.f32 %v1782_v6, %v1775_v27  ;;  %v1786_v45 = vmul.f32 %v1782_v6, %v1776_v21  ;;  %vm1780_vm14 = vcmp.ge.f32.partialorder %v1775_v27, 0.0  ;;  %vm1781_vm2 = vcmp.ge.f32.partialorder %v1776_v21, 0.0 }
 0x586   : > { %v1787_v17 = vsel %vm1778_vm12, %v1773_v7, %v1783_v10  ;;  %v1788_v11 = vsel %vm1779_vm13, %v1774_v9, %v1784_v14  ;;  %v1966_v7 = vstv %s2743_s30  ;;  %s719_s30 = scalar_lea.vmem %s3823_s24, %s2847_s7 }
 0x587   : > { %v1791_v18 = vpack.c.bf16 %v1788_v11, %v1787_v17  ;;  %v1789_v28 = vsel %vm1780_vm14, %v1775_v27, %v1785_v26  ;;  %v1790_v29 = vsel %vm1781_vm2, %v1776_v21, %v1786_v45 }
 0x588   : > { %v1792_v59 = vpack.c.bf16 %v1790_v29, %v1789_v28 }
 0x58d   : > { %2814 = vmatmul.msk.bf16.vlgmr.msra.gmra.mxu2 %vm767_vm1, %v1791_v18 }
 0x592   : > { %v1909_v23 = vpop.xlane.xlu0 %1908 }
 0x593   : > { %v1910_v24 = vrot.slane %v1909_v23, 4 }
 0x594   : > { %v1924_v25 = vpop.xlane.xlu1 %1923 }
 0x595   : > { %v1911_v40 = vadd.f32 %v1910_v24, %v1909_v23  ;;  %v1925_v53 = vrot.slane %v1924_v25, 4 }
 0x597   : > { %v1912_v52 = vrot.slane %v1911_v40, 2  ;;  %v1926_v8 = vadd.f32 %v1925_v53, %v1924_v25  ;;  %v2977_v25 = vld [vmem:[%s3814_s15 + $0x2] ss:$0 sm:$0xff] }
 0x599   : > { %v1927_v30 = vrot.slane %v1926_v8, 2  ;;  %v1913_v31 = vadd.f32 %v1912_v52, %v1911_v40 }
 0x59b   : > { %v1914_v32 = vrot.slane %v1913_v31, 1  ;;  %v1928_v34 = vadd.f32 %v1927_v30, %v1926_v8 }
 0x59d   : > { %2815 = vmatmul.msk.bf16.gmra.mxu2 %vm767_vm1, %v1792_v59  ;;  %v1915_v39 = vadd.f32 %v1914_v32, %v1913_v31  ;;  %v1929_v41 = vrot.slane %v1928_v34, 1 }
 0x59f   : > { %2916 = vpush %v1915_v39  ;;  %v1930_v22 = vadd.f32 %v1929_v41, %v1928_v34 }
 0x5a1   : > { %2918 = vpush %v1930_v22 }
 0x5d0   : > { %s2917_s25 = spop %2916 }
 0x5d1   : > { %v1917_v43 = vstv %s2917_s25 }
 0x5d2   : > { %v1933_v44 = vmul.f32 %v1917_v43, %v3392_v46  ;;  %s2919_s27 = spop %2918 }
 0x5d3   : > { %v1932_v48 = vstv %s2919_s27 }
 0x5d4   : > { %v1934_v58 = vmul.f32 %v1932_v48, %v3392_v46  ;;  %v1935_v49 = vmul.f32 %v1933_v44, %v1933_v44  ;;  %v1938_v0 = vsub.f32 %v3576_v35, %v1933_v44  ;;  %v1939_v1 = vsub.f32 %v3578_v36, %v1933_v44 }
 0x5d6   : > { %v1936_v50 = vsub.f32 %v1934_v58, %v1935_v49  ;;  %v1943_v2 = vmul.f32 %v2974_v37, %v1938_v0  ;;  %v1944_v3 = vmul.f32 %v2974_v37, %v1939_v1 }
 0x5d8   : > { %v1937_v51 = vmax.f32 %v1936_v50, 0.0 }
 0x5da   : > { %v1945_v54 = vadd.f32 1e-08, %v1937_v51 }
 0x5dc   : > { %3012 = vrsqrt.f32 %v1945_v54  ;;  %vm1952_vm5 = vweird.f32 %v1945_v54 }
 0x5e2   : > { %v3013_v57 = vpop.eup %3012 }
 0x5e3   : > { %v1947_v60 = vmul.f32 %v3013_v57, %v1945_v54  ;;  %vm1953_vm4 = vweird.f32 %v3013_v57 }
 0x5e4   : > { %vm1954_vm6 = vmor %vm1952_vm5, %vm1953_vm4 }
 0x5e5   : > { %v1948_v62 = vmul.f32 %v3013_v57, %v1947_v60 }
 0x5e7   : > { %v1949_v63 = vmul.f32 0.5, %v1948_v62 }
 0x5e9   : > { %v1950_v46 = vsub.f32 1.5, %v1949_v63 }
 0x5eb   : > { %v1951_v38 = vmul.f32 %v3013_v57, %v1950_v46 }
 0x5ed   : > { %v1955_v5 = vsel %vm1954_vm6, %v3013_v57, %v1951_v38 }
 0x5ee   : > { %v1956_v6 = vmul.f32 %v1955_v5, %v1943_v2  ;;  %v1957_v35 = vmul.f32 %v1955_v5, %v1944_v3 }
 0x5f0   : > { %v1961_v36 = vadd.f32 %v2975_v4, %v1956_v6  ;;  %v1962_v9 = vadd.f32 %v2975_v4, %v1957_v35  ;;  %v2875_v4 = vld [vmem:[%s3817_s18 + $0x28] sm:$0xff] }
 0x5f1   : > { %2367 = vmatpush.bf16.msra.mxu3 %v2875_v4 }
 0x5f2   : > { %vm1964_vm7 = vcmp.ge.f32.partialorder %v1961_v36, 0.0  ;;  %vm1965_vm3 = vcmp.ge.f32.partialorder %v1962_v9, 0.0  ;;  %v1967_v10 = vmul.f32 %v1966_v7, %v1961_v36  ;;  %v1968_v14 = vmul.f32 %v1966_v7, %v1962_v9 }
 0x5f4   : > { %v1969_v15 = vsel %vm1964_vm7, %v1961_v36, %v1967_v10  ;;  %v1970_v16 = vsel %vm1965_vm3, %v1962_v9, %v1968_v14  ;;  %v2874_v10 = vld [vmem:[%s3817_s18 + $0x20] sm:$0xff] }
 0x5f5   : > { %v1971_v17 = vpack.c.bf16 %v1970_v16, %v1969_v15  ;;  %2368 = vmatpush.bf16.msra.mxu3 %v2874_v10  ;;  %v2877_v16 = vld [vmem:[%s3817_s18 + $0x38] sm:$0xff] }
 0x5f6   : > { %2413 = vmatpush.bf16.msrb.mxu0 %v2877_v16 }
 0x5f7   : > { %2805 = vmatmul.msk.bf16.vlgmr.msra.gmra.mxu1 %vm767_vm1, %v1971_v17 }
 0x5ff   : > { %v2191_v11 = vpop.f32.mrf.mxu0 }
 0x600   : > { %v2061_v13 = vpop.f32.mrf.mxu2  ;;  %v2163_v18 = vpop.f32.mrf.mxu3 }
 0x601   : > { %2065 = vst [vmem:[#allocation2] ss:$2 sm:$0xf] %v2061_v13  ;;  %v2192_v19 = vadd.f32 %v2191_v11, %v2163_v18 }
 0x602   : > { %2066 = vst [vmem:[#allocation2 + $0x1] ss:$2 sm:$0xf] %v2061_v13 }
 0x603   : > { %v3679_v20 = vadd.f32 %v2976_v12, %v2192_v19 }
 0x605   : > { %v2205_v27 = vsel %vm1474_vm15, %v3679_v20, 0.0  ;;  %v2216_v28 = vmul.f32 %v3679_v20, %v3679_v20 }
 0x606   : > { %2206 = vadd.xlane.f32.xlu1 %v2205_v27 }
 0x607   : > { %v2193_v21 = vpop.f32.mrf.mxu0  ;;  %v2217_v29 = vsel %vm1474_vm15, %v2216_v28, 0.0 }
 0x608   : > { %v2063_v23 = vpop.f32.mrf.mxu2  ;;  %v2165_v24 = vpop.f32.mrf.mxu3 }
 0x609   : > { %v2067_v26 = vld [vmem:[#allocation2] sm:$0xff] }
 0x60a   : > { %v2068_v45 = vadd.f32 %v2067_v26, %v3571_v56 }
 0x60c   : > { %v3687_v40 = vadd.f32 %v2977_v25, %v2068_v45 }
 0x60e   : > { %v2079_v53 = vsel %vm767_vm1, %v3687_v40, 0.0  ;;  %v2090_v52 = vmul.f32 %v3687_v40, %v3687_v40 }
 0x60f   : > { %2080 = vadd.xlane.f32.xlu2 %v2079_v53 }
 0x610   : > { %v2091_v8 = vsel %vm767_vm1, %v2090_v52, 0.0  ;;  %v2978_v52 = vld [vmem:[%s3815_s16 + $0x2] ss:$0 sm:$0xff] }
 0x611   : > { %2092 = vadd.xlane.f32.xlu0 %v2091_v8 }
 0x617   : > { %2218 = vadd.xlane.f32.xlu2 %v2217_v29 }
 0x674   : > { %v2292_v30 = vpop.f32.mrf.mxu1 }
 0x675   : > { %2297 = vst [vmem:[#allocation2] ss:$2 sm:$0xff] %v2292_v30 }
 0x676   : > { %2299 = vst [vmem:[#allocation2 + $0x1] ss:$2 sm:$0xff] %v2292_v30 }
 0x679   : > { %v2207_v56 = vpop.xlane.xlu1 %2206 }
 0x67a   : > { %v2208_v31 = vrot.slane %v2207_v56, 4 }
 0x67c   : > { %v2294_v59 = vpop.f32.mrf.mxu1  ;;  %v2209_v32 = vadd.f32 %v2208_v31, %v2207_v56  ;;  %v2979_v56 = vld [vmem:[%s3847_s3 + $0x2] ss:$0 sm:$0xff] }
 0x67d   : > { %2298 = vst [vmem:[#allocation2 + $0x10] ss:$2 sm:$0xff] %v2294_v59 }
 0x67e   : > { %2300 = vst [vmem:[#allocation2 + $0x11] ss:$2 sm:$0xff] %v2294_v59  ;;  %v2210_v41 = vrot.slane %v2209_v32, 2 }
 0x680   : > { %v2211_v48 = vadd.f32 %v2210_v41, %v2209_v32 }
 0x682   : > { %v2081_v34 = vpop.xlane.xlu2 %2080  ;;  %v2212_v60 = vrot.slane %v2211_v48, 1 }
 0x683   : > { %v2082_v39 = vrot.slane %v2081_v34, 4 }
 0x684   : > { %v2093_v22 = vpop.xlane.xlu0 %2092  ;;  %v2213_v46 = vadd.f32 %v2212_v60, %v2211_v48 }
 0x685   : > { %v2083_v33 = vadd.f32 %v2082_v39, %v2081_v34  ;;  %v2094_v43 = vrot.slane %v2093_v22, 4  ;;  %v2980_v34 = vld [vmem:[%s3815_s16 + $0x3] ss:$0 sm:$0xff] }
 0x687   : > { %v2084_v44 = vrot.slane %v2083_v33, 2  ;;  %v2095_v47 = vadd.f32 %v2094_v43, %v2093_v22 }
 0x689   : > { %v2096_v58 = vrot.slane %v2095_v47, 2  ;;  %v2085_v49 = vadd.f32 %v2084_v44, %v2083_v33  ;;  %v2981_v44 = vld [vmem:[%s3847_s3 + $0x3] ss:$0 sm:$0xff] }
 0x68a   : > { %v2219_v50 = vpop.xlane.xlu2 %2218 }
 0x68b   : > { %v2220_v51 = vrot.slane %v2219_v50, 4  ;;  %v2086_v54 = vrot.slane %v2085_v49, 1  ;;  %v2097_v57 = vadd.f32 %v2096_v58, %v2095_v47 }
 0x68d   : > { %v2221_v62 = vadd.f32 %v2220_v51, %v2219_v50  ;;  %v2087_v63 = vadd.f32 %v2086_v54, %v2085_v49  ;;  %v2098_v0 = vrot.slane %v2097_v57, 1 }
 0x68f   : > { %v2222_v1 = vrot.slane %v2221_v62, 2  ;;  %2920 = vpush %v2087_v63  ;;  %v2099_v37 = vadd.f32 %v2098_v0, %v2097_v57  ;;  %v2301_v63 = vld [vmem:[#allocation2] sm:$0xff] }
 0x691   : > { %v2223_v38 = vadd.f32 %v2222_v1, %v2221_v62  ;;  %2922 = vpush %v2099_v37  ;;  %v2332_v62 = vpop.f32.mrf.mxu2  ;;  %v2302_v37 = vld [vmem:[#allocation2 + $0x8] sm:$0xff] }
 0x692   : > { %2924 = vpush %v2213_v46  ;;  %v2303_v46 = vld [vmem:[#allocation2 + $0x10] sm:$0xff]  ;;  %v2333_v10 = vadd.f32 %v2332_v62, %v2301_v63 }
 0x693   : > { %v2224_v2 = vrot.slane %v2223_v38, 1 }
 0x695   : > { %v2225_v3 = vadd.f32 %v2224_v2, %v2223_v38  ;;  %v2304_v38 = vld [vmem:[#allocation2 + $0x18] sm:$0xff] }
 0x697   : > { %2926 = vpush %v2225_v3 }
 0x699   : > { %v2334_v2 = vpop.f32.mrf.mxu2 }
 0x6c0   : > { %s2921_s29 = spop %2920 }
 0x6c1   : > { %v2089_v5 = vstv %s2921_s29 }
 0x6c2   : > { %v2102_v6 = vmul.f32 %v2089_v5, %v3473_v61  ;;  %s2923_s1 = spop %2922 }
 0x6c3   : > { %v2101_v35 = vstv %s2923_s1  ;;  %s2925_s27 = spop %2924 }
 0x6c4   : > { %v2104_v7 = vmul.f32 %v2102_v6, %v2102_v6  ;;  %v2103_v36 = vmul.f32 %v2101_v35, %v3473_v61  ;;  %v2215_v9 = vstv %s2925_s27  ;;  %v2876_v61 = vld [vmem:[%s3817_s18 + $0x30] sm:$0xff]  ;;  %s2774_s27 = sld [smem:[#allocation6 + $0x3]]  ;;  %v2107_v53 = vsub.f32 %v3687_v40, %v2102_v6 }
 0x6c5   : > { %v2228_v15 = vmul.f32 %v2215_v9, %v3593_v42  ;;  %2414 = vmatpush.bf16.msrb.mxu0 %v2876_v61 }
 0x6c6   : > { %v2105_v14 = vsub.f32 %v2103_v36, %v2104_v7  ;;  %v2111_v30 = vmul.f32 %v2978_v52, %v2107_v53  ;;  %v2337_v36 = vpop.f32.mrf.mxu2 }
 0x6c7   : > { %v2230_v13 = vmul.f32 %v2228_v15, %v2228_v15  ;;  %v2233_v32 = vsub.f32 %v3679_v20, %v2228_v15  ;;  %v2338_v15 = vadd.f32 %v2337_v36, %v2303_v46 }
 0x6c8   : > { %v2106_v17 = vmax.f32 %v2105_v14, 0.0  ;;  %s2927_s25 = spop %2926  ;;  %v2335_v14 = vadd.f32 %v2334_v2, %v2302_v37 }
 0x6c9   : > { %v2227_v11 = vstv %s2927_s25  ;;  %s2796_s25 = sld [smem:[#allocation6 + $0x4]]  ;;  %v2237_v43 = vmul.f32 %v2980_v34, %v2233_v32 }
 0x6ca   : > { %v2112_v12 = vadd.f32 1e-08, %v2106_v17  ;;  %v2229_v18 = vmul.f32 %v2227_v11, %v3593_v42  ;;  %v2130_v41 = vstv %s2774_s27  ;;  %s2834_s27 = sld [smem:[#allocation6 + $0x5]] }
 0x6cc   : > { %3014 = vrsqrt.f32 %v2112_v12  ;;  %v2231_v19 = vsub.f32 %v2229_v18, %v2230_v13  ;;  %vm2119_vm8 = vweird.f32 %v2112_v12 }
 0x6ce   : > { %v2232_v27 = vmax.f32 %v2231_v19, 0.0  ;;  %v2339_v9 = vpop.f32.mrf.mxu2 }
 0x6cf   : > { %v2256_v50 = vstv %s2796_s25  ;;  %v2340_v16 = vadd.f32 %v2339_v9, %v2304_v38  ;;  %v2879_v38 = vld [vmem:[%s3821_s22 + $0x8] sm:$0xff] }
 0x6d0   : > { %v2238_v21 = vadd.f32 1e-08, %v2232_v27  ;;  %2582 = vmatpush.bf16.msrb.mxu1 %v2879_v38 }
 0x6d2   : > { %v3015_v23 = vpop.eup %3014  ;;  %3016 = vrsqrt.f32 %v2238_v21  ;;  %vm2245_vm11 = vweird.f32 %v2238_v21 }
 0x6d3   : > { %v2114_v24 = vmul.f32 %v3015_v23, %v2112_v12  ;;  %vm2120_vm15 = vweird.f32 %v3015_v23  ;;  %v2982_v12 = vld [vmem:[%s3818_s19] ss:$0 sm:$0xff] }
 0x6d4   : > { %vm2121_vm9 = vmor %vm2119_vm8, %vm2120_vm15 }
 0x6d5   : > { %v2115_v25 = vmul.f32 %v3015_v23, %v2114_v24 }
 0x6d7   : > { %v2116_v26 = vmul.f32 0.5, %v2115_v25 }
 0x6d8   : > { %v3017_v45 = vpop.eup %3016 }
 0x6d9   : > { %v2117_v8 = vsub.f32 1.5, %v2116_v26  ;;  %v2240_v42 = vmul.f32 %v3017_v45, %v2238_v21  ;;  %vm2246_vm10 = vweird.f32 %v3017_v45 }
 0x6da   : > { %vm2247_vm12 = vmor %vm2245_vm11, %vm2246_vm10 }
 0x6db   : > { %v2118_v28 = vmul.f32 %v3015_v23, %v2117_v8  ;;  %v2241_v29 = vmul.f32 %v3017_v45, %v2240_v42 }
 0x6dd   : > { %v2122_v31 = vsel %vm2121_vm9, %v3015_v23, %v2118_v28  ;;  %v2242_v59 = vmul.f32 0.5, %v2241_v29 }
 0x6de   : > { %v2123_v40 = vmul.f32 %v2122_v31, %v2111_v30 }
 0x6df   : > { %v2243_v39 = vsub.f32 1.5, %v2242_v59 }
 0x6e0   : > { %v2127_v22 = vadd.f32 %v2979_v56, %v2123_v40 }
 0x6e1   : > { %v2244_v33 = vmul.f32 %v3017_v45, %v2243_v39 }
 0x6e2   : > { %vm2129_vm13 = vcmp.ge.f32.partialorder %v2127_v22, 0.0  ;;  %v2131_v47 = vmul.f32 %v2130_v41, %v2127_v22 }
 0x6e3   : > { %v2248_v48 = vsel %vm2247_vm12, %v3017_v45, %v2244_v33 }
 0x6e4   : > { %v2249_v20 = vmul.f32 %v2248_v48, %v2237_v43  ;;  %v2132_v58 = vsel %vm2129_vm13, %v2127_v22, %v2131_v47 }
 0x6e5   : > { %v2133_v49 = vpack.c.bf16 %v2132_v58, %v2132_v58 }
 0x6e6   : > { %v2253_v51 = vadd.f32 %v2981_v44, %v2249_v20 }
 0x6e7   : > { %2824 = vmatmul.msk.bf16.vlgmr.msra.gmra.mxu3 %vm767_vm1, %v2133_v49 }
 0x6e8   : > { %vm2255_vm14 = vcmp.ge.f32.partialorder %v2253_v51, 0.0  ;;  %v2257_v54 = vmul.f32 %v2256_v50, %v2253_v51 }
 0x6ea   : > { %v2258_v57 = vsel %vm2255_vm14, %v2253_v51, %v2257_v54 }
 0x6eb   : > { %v2259_v60 = vpack.c.bf16 %v2258_v57, %v2258_v57 }
 0x6ed   : > { %2833 = vmatmul.msk.bf16.vlgmr.msrb.gmra.mxu0 %vm767_vm1, %v2259_v60 }
 0x76a   : > { %v2370_v0 = vpop.f32.mrf.mxu3  ;;  %v2416_v1 = vpop.f32.mrf.mxu0 }
 0x76b   : > { %2374 = vst [vmem:[#allocation2] ss:$4 sm:$0xff] %v2370_v0 }
 0x76c   : > { %2375 = vst [vmem:[#allocation2 + $0x1] ss:$4 sm:$0xff] %v2370_v0 }
 0x76d   : > { %2377 = vst [vmem:[#allocation2 + $0x2] ss:$4 sm:$0xff] %v2370_v0 }
 0x76e   : > { %2379 = vst [vmem:[#allocation2 + $0x3] ss:$4 sm:$0xff] %v2370_v0 }
 0x772   : > { %v2372_v3 = vpop.f32.mrf.mxu3  ;;  %v2418_v4 = vpop.f32.mrf.mxu0 }
 0x773   : > { %v2878_v4 = vld [vmem:[%s3821_s22] sm:$0xff] }
 0x774   : > { %2583 = vmatpush.bf16.msrb.mxu1 %v2878_v4 }
 0x775   : > { %v2380_v5 = vld [vmem:[#allocation2] sm:$0xff]  ;;  %v2381_v6 = vld [vmem:[#allocation2 + $0x8] sm:$0xff]  ;;  %v2382_v35 = vld [vmem:[#allocation2 + $0x10] sm:$0xff] }
 0x776   : > { %v2383_v7 = vld [vmem:[#allocation2 + $0x18] sm:$0xff]  ;;  %v2384_v17 = vadd.f32 %v2380_v5, %v2333_v10  ;;  %v2385_v61 = vadd.f32 %v2381_v6, %v2335_v14  ;;  %v2386_v11 = vadd.f32 %v2382_v35, %v2338_v15 }
 0x777   : > { %2420 = vst [vmem:[#allocation2] ss:$8 sm:$0xf] %v2416_v1  ;;  %v2387_v13 = vadd.f32 %v2383_v7, %v2340_v16 }
 0x778   : > { %2422 = vst [vmem:[#allocation2 + $0x1] ss:$8 sm:$0xf] %v2416_v1 }
 0x779   : > { %2424 = vst [vmem:[#allocation2 + $0x2] ss:$8 sm:$0xf] %v2416_v1 }
 0x77a   : > { %2426 = vst [vmem:[#allocation2 + $0x3] ss:$8 sm:$0xf] %v2416_v1 }
 0x77b   : > { %2429 = vst [vmem:[#allocation2 + $0x4] ss:$8 sm:$0xf] %v2416_v1 }
 0x77c   : > { %2432 = vst [vmem:[#allocation2 + $0x5] ss:$8 sm:$0xf] %v2416_v1 }
 0x77d   : > { %2435 = vst [vmem:[#allocation2 + $0x6] ss:$8 sm:$0xf] %v2416_v1 }
 0x77e   : > { %2438 = vst [vmem:[#allocation2 + $0x7] ss:$8 sm:$0xf] %v2416_v1 }
 0x785   : > { %v2440_v18 = vld [vmem:[#allocation2] sm:$0xff]  ;;  %v2441_v19 = vld [vmem:[#allocation2 + $0x8] sm:$0xff]  ;;  %v2442_v27 = vld [vmem:[#allocation2 + $0x10] sm:$0xff] }
 0x786   : > { %v2443_v21 = vld [vmem:[#allocation2 + $0x18] sm:$0xff]  ;;  %v2444_v23 = vadd.f32 %v2440_v18, %v2384_v17  ;;  %v2445_v24 = vadd.f32 %v2441_v19, %v2385_v61  ;;  %v2446_v25 = vadd.f32 %v2442_v27, %v2386_v11  ;;  %v2983_v11 = vld [vmem:[%s3819_s20] ss:$0 sm:$0xff] }
 0x787   : > { %v2447_v26 = vadd.f32 %v2443_v21, %v2387_v13  ;;  %v2984_v19 = vld [vmem:[%s3820_s21] ss:$0 sm:$0xff] }
 0x788   : > { %v3732_v45 = vadd.f32 %v2982_v12, %v2444_v23  ;;  %v3734_v53 = vadd.f32 %v2982_v12, %v2445_v24  ;;  %v3736_v52 = vadd.f32 %v2982_v12, %v2446_v25  ;;  %v2539_v24 = vstv %s2834_s27 }
 0x789   : > { %v3738_v8 = vadd.f32 %v2982_v12, %v2447_v26 }
 0x78a   : > { %v2458_v42 = vsel %vm767_vm1, %v3732_v45, 0.0  ;;  %v2459_v28 = vsel %vm767_vm1, %v3734_v53, 0.0  ;;  %v2475_v29 = vmul.f32 %v3732_v45, %v3732_v45  ;;  %v2476_v56 = vmul.f32 %v3734_v53, %v3734_v53 }
 0x78b   : > { %v2460_v30 = vadd.f32 %v2459_v28, %v2458_v42  ;;  %v2477_v31 = vmul.f32 %v3736_v52, %v3736_v52  ;;  %v2461_v59 = vsel %vm767_vm1, %v3736_v52, 0.0  ;;  %v2478_v34 = vmul.f32 %v3738_v8, %v3738_v8 }
 0x78c   : > { %v2479_v40 = vsel %vm767_vm1, %v2475_v29, 0.0  ;;  %v2480_v39 = vsel %vm767_vm1, %v2476_v56, 0.0  ;;  %v2463_v41 = vsel %vm767_vm1, %v3738_v8, 0.0 }
 0x78d   : > { %v2462_v32 = vadd.f32 %v2461_v59, %v2460_v30  ;;  %v2481_v22 = vadd.f32 %v2480_v39, %v2479_v40  ;;  %v2482_v43 = vsel %vm767_vm1, %v2477_v31, 0.0  ;;  %v2484_v47 = vsel %vm767_vm1, %v2478_v34, 0.0 }
 0x78f   : > { %v2464_v33 = vadd.f32 %v2463_v41, %v2462_v32  ;;  %v2483_v44 = vadd.f32 %v2482_v43, %v2481_v22  ;;  %v2985_v43 = vld [vmem:[%s3822_s23] ss:$0 sm:$0xff] }
 0x791   : > { %2465 = vadd.xlane.f32.xlu0 %v2464_v33  ;;  %v2485_v48 = vadd.f32 %v2484_v47, %v2483_v44 }
 0x793   : > { %2486 = vadd.xlane.f32.xlu1 %v2485_v48  ;;  %v3020_v48 = vld [vmem:[%s3199_s8] sm:$0xff] }
 0x804   : > { %v2466_v20 = vpop.xlane.xlu0 %2465 }
 0x805   : > { %v2467_v58 = vrot.slane %v2466_v20, 4 }
 0x806   : > { %v2487_v50 = vpop.xlane.xlu1 %2486 }
 0x807   : > { %v2468_v49 = vadd.f32 %v2467_v58, %v2466_v20  ;;  %v2488_v51 = vrot.slane %v2487_v50, 4 }
 0x809   : > { %v2469_v54 = vrot.slane %v2468_v49, 2  ;;  %v2489_v57 = vadd.f32 %v2488_v51, %v2487_v50  ;;  %v3021_v50 = vld [vmem:[%s3199_s8 + $0x8] sm:$0xff] }
 0x80b   : > { %v2470_v60 = vadd.f32 %v2469_v54, %v2468_v49  ;;  %v2490_v62 = vrot.slane %v2489_v57, 2 }
 0x80d   : > { %v2471_v63 = vrot.slane %v2470_v60, 1  ;;  %v2491_v0 = vadd.f32 %v2490_v62, %v2489_v57 }
 0x80f   : > { %v2472_v1 = vadd.f32 %v2471_v63, %v2470_v60  ;;  %v2492_v37 = vrot.slane %v2491_v0, 1  ;;  %v3022_v60 = vld [vmem:[%s3199_s8 + $0x10] sm:$0xff] }
 0x811   : > { %2928 = vpush %v2472_v1  ;;  %v2493_v46 = vadd.f32 %v2492_v37, %v2491_v0  ;;  %v3023_v1 = vld [vmem:[%s3199_s8 + $0x18] sm:$0xff] }
 0x813   : > { %2930 = vpush %v2493_v46 }
 0x842   : > { %s2929_s29 = spop %2928 }
 0x843   : > { %v2474_v2 = vstv %s2929_s29 }
 0x844   : > { %v2496_v3 = vmul.f32 %v2474_v2, %v3238_v55  ;;  %s2931_s17 = spop %2930 }
 0x845   : > { %v2495_v5 = vstv %s2931_s17 }
 0x846   : > { %v2498_v6 = vmul.f32 %v2496_v3, %v2496_v3  ;;  %v2497_v35 = vmul.f32 %v2495_v5, %v3238_v55  ;;  %v2501_v17 = vsub.f32 %v3732_v45, %v2496_v3  ;;  %v2502_v61 = vsub.f32 %v3734_v53, %v2496_v3 }
 0x847   : > { %v2503_v25 = vsub.f32 %v3736_v52, %v2496_v3  ;;  %v2504_v26 = vsub.f32 %v3738_v8, %v2496_v3 }
 0x848   : > { %v2499_v7 = vsub.f32 %v2497_v35, %v2498_v6  ;;  %v2508_v13 = vmul.f32 %v2983_v11, %v2501_v17  ;;  %v2509_v18 = vmul.f32 %v2983_v11, %v2502_v61 }
 0x849   : > { %v2510_v56 = vmul.f32 %v2983_v11, %v2503_v25  ;;  %v2511_v31 = vmul.f32 %v2983_v11, %v2504_v26 }
 0x84a   : > { %v2500_v36 = vmax.f32 %v2499_v7, 0.0 }
 0x84c   : > { %v2512_v9 = vadd.f32 1e-08, %v2500_v36 }
 0x84e   : > { %3018 = vrsqrt.f32 %v2512_v9  ;;  %vm2519_vm4 = vweird.f32 %v2512_v9 }
 0x854   : > { %v3019_v10 = vpop.eup %3018 }
 0x855   : > { %v2514_v14 = vmul.f32 %v3019_v10, %v2512_v9  ;;  %vm2520_vm2 = vweird.f32 %v3019_v10 }
 0x856   : > { %vm2521_vm5 = vmor %vm2519_vm4, %vm2520_vm2 }
 0x857   : > { %v2515_v15 = vmul.f32 %v3019_v10, %v2514_v14 }
 0x859   : > { %v2516_v16 = vmul.f32 0.5, %v2515_v15 }
 0x85b   : > { %v2517_v12 = vsub.f32 1.5, %v2516_v16 }
 0x85d   : > { %v2518_v55 = vmul.f32 %v3019_v10, %v2517_v12 }
 0x85f   : > { %v2522_v27 = vsel %vm2521_vm5, %v3019_v10, %v2518_v55 }
 0x860   : > { %v2523_v21 = vmul.f32 %v2522_v27, %v2508_v13  ;;  %v2524_v23 = vmul.f32 %v2522_v27, %v2509_v18  ;;  %v2525_v40 = vmul.f32 %v2522_v27, %v2510_v56  ;;  %v2526_v32 = vmul.f32 %v2522_v27, %v2511_v31 }
 0x862   : > { %v2530_v45 = vadd.f32 %v2984_v19, %v2523_v21  ;;  %v2531_v53 = vadd.f32 %v2984_v19, %v2524_v23  ;;  %v2532_v52 = vadd.f32 %v2984_v19, %v2525_v40  ;;  %v2533_v34 = vadd.f32 %v2984_v19, %v2526_v32 }
 0x864   : > { %vm2535_vm6 = vcmp.ge.f32.partialorder %v2530_v45, 0.0  ;;  %vm2536_vm7 = vcmp.ge.f32.partialorder %v2531_v53, 0.0  ;;  %v2540_v42 = vmul.f32 %v2539_v24, %v2530_v45  ;;  %v2541_v28 = vmul.f32 %v2539_v24, %v2531_v53 }
 0x865   : > { %v2542_v8 = vmul.f32 %v2539_v24, %v2532_v52  ;;  %v2543_v39 = vmul.f32 %v2539_v24, %v2533_v34  ;;  %vm2537_vm3 = vcmp.ge.f32.partialorder %v2532_v52, 0.0  ;;  %vm2538_vm15 = vcmp.ge.f32.partialorder %v2533_v34, 0.0 }
 0x866   : > { %v2544_v29 = vsel %vm2535_vm6, %v2530_v45, %v2540_v42  ;;  %v2545_v30 = vsel %vm2536_vm7, %v2531_v53, %v2541_v28 }
 0x867   : > { %v2548_v59 = vpack.c.bf16 %v2545_v30, %v2544_v29  ;;  %v2546_v41 = vsel %vm2537_vm3, %v2532_v52, %v2542_v8  ;;  %v2547_v22 = vsel %vm2538_vm15, %v2533_v34, %v2543_v39 }
 0x868   : > { %v2549_v33 = vpack.c.bf16 %v2547_v22, %v2546_v41 }
 0x869   : > { %2843 = vmatmul.msk.bf16.vlgmr.msrb.gmra.mxu1 %vm767_vm1, %v2548_v59 }
 0x879   : > { %2844 = vmatmul.msk.bf16.gmra.mxu1 %vm767_vm1, %v2549_v33 }
 0x8e6   : > { %v2585_v44 = vpop.f32.mrf.mxu1 }
 0x8e7   : > { %v2586_v47 = vadd.f32 %v2985_v43, %v2585_v44 }
 0x8e9   : > { %v2595_v20 = vadd.f32 %v3020_v48, %v2586_v47 }
 0x8eb   : > { %2599 = vst.msk [vmem:[%s719_s30] sm:$0xff] %vm739_vm0, %v2595_v20 }
 0x8ee   : > { %v2587_v58 = vpop.f32.mrf.mxu1 }
 0x8ef   : > { %v2588_v49 = vadd.f32 %v2985_v43, %v2587_v58 }
 0x8f1   : > { %v2596_v51 = vadd.f32 %v3021_v50, %v2588_v49 }
 0x8f3   : > { %2600 = vst.msk [vmem:[%s719_s30 + $0x8] sm:$0xff] %vm739_vm0, %v2596_v51 }
 0x8f6   : > { %v2590_v54 = vpop.f32.mrf.mxu1 }
 0x8f7   : > { %v2591_v57 = vadd.f32 %v2985_v43, %v2590_v54 }
 0x8f9   : > { %v2597_v62 = vadd.f32 %v3022_v60, %v2591_v57 }
 0x8fb   : > { %2601 = vst.msk [vmem:[%s719_s30 + $0x10] sm:$0xff] %vm739_vm0, %v2597_v62 }
 0x8fe   : > { %v2592_v63 = vpop.f32.mrf.mxu1 }
 0x8ff   : > { %v2593_v0 = vadd.f32 %v2985_v43, %v2592_v63 }
 0x901   : > { %v2598_v37 = vadd.f32 %v3023_v1, %v2593_v0 }
 0x903   : > { %2602 = vst.msk [vmem:[%s719_s30 + $0x18] sm:$0xff] %vm739_vm0, %v2598_v37 }
 0x904 PF: > { %s42_s6 = sadd.s32 1, %s3044_s6  }
 0x905   : > { %p39_p4 = scmp.ge.s32.totalorder %s42_s6, 4  }
 0x907   :  { %41 = sbr.rel (!%p39_p4) target bundleno = 23 (0x17), region = 182 }

</bundles_post_ra>
